<compile_context>
chip_gen: v6e
topology: v6e:2x2x1
jax: 0.10.0
libtpu: 0.0.40
codegen_flags: <defaults>
</compile_context>

<pallas_src>
import jax
import jax.numpy as jnp
from jax.experimental import pallas as pl
from jax.experimental.pallas import tpu as pltpu


def convgru_kernel(h_ref, x_ref, wx_ref, wzr_ref, wq_ref, b_ref, out_ref):
    # Block shapes:
    #   h_ref   (1, H, W, CH)      bf16
    #   x_ref   (1, H, W, CX)      bf16
    #   wx_ref  (3, 3*CX, 3*CH)    bf16   x-side weights of z|r|q, fused
    #   wzr_ref (3, 3*CH, 2*CH)    bf16   h-side weights of z|r, fused
    #   wq_ref  (3, 3*CH, CH)      bf16   h-side weights of q
    #   b_ref   (1, 3*CH)          f32    biases [bz|br|bq]
    #   out_ref (1, H, W, CH)      f32
    _, H, W, CH = out_ref.shape

    def conv3x3(inp_hwc, w_ref):
        # 3x3 "SAME" conv as 3 wide matmuls (W-im2col per kernel row dy).
        # inp_hwc: (H, W, Cin) bf16; w_ref: (3, 3*Cin, Cout) bf16.
        cin = inp_hwc.shape[-1]
        cout = w_ref.shape[-1]
        padded = jnp.pad(inp_hwc, ((1, 1), (1, 1), (0, 0)))   # zero pad => SAME
        acc = jnp.zeros((H * W, cout), dtype=jnp.float32)
        for dy in range(3):                                   # static unroll
            rows = padded[dy:dy + H]                          # (H, W+2, Cin)
            patch = jnp.concatenate(
                [rows[:, 0:W], rows[:, 1:W + 1], rows[:, 2:W + 2]],
                axis=-1).reshape(H * W, 3 * cin)              # (H*W, 3*Cin)
            acc = acc + jnp.dot(patch, w_ref[dy],
                                preferred_element_type=jnp.float32)
        return acc                                            # (H*W, Cout) f32

    h_bf = h_ref[0]                                           # (H, W, CH) bf16
    h = h_bf.reshape(H * W, CH).astype(jnp.float32)           # f32 for gating

    # Fused x-side contributions of z, r, q (+ all biases, added once).
    xc = conv3x3(x_ref[0], wx_ref) + b_ref[...]               # (H*W, 3*CH)
    # Fused h-side contributions of z, r.
    zr = conv3x3(h_bf, wzr_ref)                               # (H*W, 2*CH)

    z = jax.nn.sigmoid(xc[:, :CH] + zr[:, :CH])
    r = jax.nn.sigmoid(xc[:, CH:2 * CH] + zr[:, CH:])

    rh = (r * h).astype(h_ref.dtype).reshape(H, W, CH)        # bf16 for MXU
    q = jnp.tanh(xc[:, 2 * CH:] + conv3x3(rh, wq_ref))

    out = (1.0 - z) * h + z * q                               # (H*W, CH) f32
    out_ref[0] = out.reshape(H, W, CH).astype(out_ref.dtype)


def _prep_weights(params, hidden_dim, input_dim):
    """PyTorch-layout params -> fused/split kernel weight layouts (bf16)."""
    wz, bz, wr, br, wq, bq = params       # w*: (CH, CH+CX, 3, 3), b*: (CH,)
    CH, CX = hidden_dim, input_dim

    def split_and_pack(w):
        # (Cout, Cin, kh, kw) -> (kh, kw, Cin, Cout), split Cin into h|x parts,
        # then flatten (kw, Cin_part) -> 3*Cin_part to match the W-im2col patch.
        w = jnp.transpose(w, (2, 3, 1, 0))                    # (3, 3, Cin, CH)
        w_h = w[:, :, :CH, :].reshape(3, 3 * CH, CH)
        w_x = w[:, :, CH:, :].reshape(3, 3 * CX, CH)
        return w_h, w_x

    wz_h, wz_x = split_and_pack(wz)
    wr_h, wr_x = split_and_pack(wr)
    wq_h, wq_x = split_and_pack(wq)

    wx_all = jnp.concatenate([wz_x, wr_x, wq_x], axis=-1)     # (3, 3*CX, 3*CH)
    wzr_h = jnp.concatenate([wz_h, wr_h], axis=-1)            # (3, 3*CH, 2*CH)
    b_all = jnp.concatenate([bz, br, bq]).reshape(1, 3 * CH)  # (1, 3*CH)
    return (wx_all.astype(jnp.bfloat16),
            wzr_h.astype(jnp.bfloat16),
            wq_h.astype(jnp.bfloat16),
            b_all.astype(jnp.float32))


def convgru_pallas(h_nchw, x_nchw, params):
    """h_nchw: (N, CH, H, W), x_nchw: (N, CX, H, W)  ->  (N, CH, H, W) f32."""
    CH = h_nchw.shape[1]
    CX = x_nchw.shape[1]
    wx_all, wzr_h, wq_h, b_all = _prep_weights(params, CH, CX)

    # NOTE: when ConvGRU is called many times per flow update, keep h/x NHWC
    # across iterations and hoist these transposes out of the loop.
    h = jnp.transpose(h_nchw, (0, 2, 3, 1)).astype(jnp.bfloat16)   # NHWC bf16
    x = jnp.transpose(x_nchw, (0, 2, 3, 1)).astype(jnp.bfloat16)   # NHWC bf16
    N, H, W, _ = h.shape

    out_nhwc = pl.pallas_call(
        convgru_kernel,
        out_shape=jax.ShapeDtypeStruct((N, H, W, CH), jnp.float32),
        grid_spec=pltpu.PrefetchScalarGridSpec(
            num_scalar_prefetch=0,
            grid=(N,),
            in_specs=[
                pl.BlockSpec((1, H, W, CH), lambda b: (b, 0, 0, 0)),
                pl.BlockSpec((1, H, W, CX), lambda b: (b, 0, 0, 0)),
                pl.BlockSpec((3, 3 * CX, 3 * CH), lambda b: (0, 0, 0)),
                pl.BlockSpec((3, 3 * CH, 2 * CH), lambda b: (0, 0, 0)),
                pl.BlockSpec((3, 3 * CH, CH), lambda b: (0, 0, 0)),
                pl.BlockSpec((1, 3 * CH), lambda b: (0, 0)),
            ],
            out_specs=pl.BlockSpec((1, H, W, CH), lambda b: (b, 0, 0, 0)),
        ),
        compiler_params=pltpu.CompilerParams(
            dimension_semantics=("parallel",)),   # batch elems independent
    )(h, x, wx_all, wzr_h, wq_h, b_all)

    return jnp.transpose(out_nhwc, (0, 3, 1, 2))  # back to NCHW


# -------------------- pure-JAX reference (for verification) --------------------
def convgru_ref(h_nchw, x_nchw, params, emulate_bf16=True):
    """Reference of the PyTorch module.  With emulate_bf16=True the inputs,
    weights and r*h are rounded to bf16 (as the kernel does) so the comparison
    validates the kernel structure tightly; math itself is f32."""
    wz, bz, wr, br, wq, bq = params
    bf = ((lambda a: a.astype(jnp.bfloat16).astype(jnp.float32))
          if emulate_bf16 else (lambda a: a))

    def conv(inp, w, b):
        out = jax.lax.conv_general_dilated(
            inp, bf(w), (1, 1), 'SAME',
            dimension_numbers=('NCHW', 'OIHW', 'NCHW'),
            precision=jax.lax.Precision.HIGHEST)
        return out + b[None, :, None, None]

    h = bf(h_nchw)
    x = bf(x_nchw)
    hx = jnp.concatenate([h, x], axis=1)
    z = jax.nn.sigmoid(conv(hx, wz, bz))
    r = jax.nn.sigmoid(conv(hx, wr, br))
    q = jnp.tanh(conv(jnp.concatenate([bf(r * h), x], axis=1), wq, bq))
    return (1.0 - z) * h + z * q


def init_params(key, hidden_dim, input_dim):
    """PyTorch Conv2d layout: weight (Cout, Cin, 3, 3), bias (Cout,)."""
    cin = hidden_dim + input_dim
    keys = jax.random.split(key, 6)
    s = 0.05
    wz = s * jax.random.normal(keys[0], (hidden_dim, cin, 3, 3), jnp.float32)
    wr = s * jax.random.normal(keys[1], (hidden_dim, cin, 3, 3), jnp.float32)
    wq = s * jax.random.normal(keys[2], (hidden_dim, cin, 3, 3), jnp.float32)
    bz = s * jax.random.normal(keys[3], (hidden_dim,), jnp.float32)
    br = s * jax.random.normal(keys[4], (hidden_dim,), jnp.float32)
    bq = s * jax.random.normal(keys[5], (hidden_dim,), jnp.float32)
    return (wz, bz, wr, br, wq, bq)


if __name__ == "__main__":
    # Small shapes consistent with the module (hidden_dim + input_dim = Cin).
    N, HIDDEN, INPUT, H, W = 2, 32, 64, 16, 16

    key = jax.random.PRNGKey(0)
    k_h, k_x, k_p = jax.random.split(key, 3)
    h0 = jax.random.normal(k_h, (N, HIDDEN, H, W), jnp.float32)   # NCHW
    x0 = jax.random.normal(k_x, (N, INPUT, H, W), jnp.float32)    # NCHW
    params = init_params(k_p, HIDDEN, INPUT)

    out = jax.block_until_ready(convgru_pallas(h0, x0, params))
    ref = jax.block_until_ready(convgru_ref(h0, x0, params))

    assert out.shape == (N, HIDDEN, H, W)
    assert jnp.allclose(out, ref, atol=5e-3), (
        f"max abs err {jnp.max(jnp.abs(out - ref))}")

    print("KERNEL_OK")
</pallas_src>

<mosaic_0001>
module attributes {stable_mosaic.version = 11 : i64} {
  func.func @convgru_kernel(%arg0: i32, %arg1: memref<1x16x16x32xbf16, #tpu.memory_space<vmem>>, %arg2: memref<1x16x16x64xbf16, #tpu.memory_space<vmem>>, %arg3: memref<3x192x96xbf16, #tpu.memory_space<vmem>>, %arg4: memref<3x96x64xbf16, #tpu.memory_space<vmem>>, %arg5: memref<3x96x32xbf16, #tpu.memory_space<vmem>>, %arg6: memref<1x96xf32, #tpu.memory_space<vmem>>, %arg7: memref<1x16x16x32xf32, #tpu.memory_space<vmem>>) attributes {dimension_semantics = [#tpu.dimension_semantics<parallel>], iteration_bounds = array<i64: 2>, scalar_prefetch = 0 : i64, scratch_operands = 0 : i64, tpu.core_type = #tpu.core_type<tc>, window_params = [{transform_indices = @transform_0, window_bounds = array<i64: 1, 16, 16, 32>}, {transform_indices = @transform_1, window_bounds = array<i64: 1, 16, 16, 64>}, {pipeline_mode = #tpu.pipeline_mode<synchronous>, transform_indices = @transform_2, window_bounds = array<i64: 3, 192, 96>}, {pipeline_mode = #tpu.pipeline_mode<synchronous>, transform_indices = @transform_3, window_bounds = array<i64: 3, 96, 64>}, {pipeline_mode = #tpu.pipeline_mode<synchronous>, transform_indices = @transform_4, window_bounds = array<i64: 3, 96, 32>}, {pipeline_mode = #tpu.pipeline_mode<synchronous>, transform_indices = @transform_5, window_bounds = array<i64: 1, 96>}, {transform_indices = @transform_6, window_bounds = array<i64: 1, 16, 16, 32>}]} {
    %c0 = arith.constant 0 : index
    %c0_0 = arith.constant 0 : index
    %c0_1 = arith.constant 0 : index
    %c0_2 = arith.constant 0 : index
    %0 = vector.load %arg1[%c0, %c0_0, %c0_1, %c0_2] : memref<1x16x16x32xbf16, #tpu.memory_space<vmem>>, vector<1x16x16x32xbf16>
    %1 = vector.shape_cast %0 : vector<1x16x16x32xbf16> to vector<16x16x32xbf16>
    %2 = vector.shape_cast %1 : vector<16x16x32xbf16> to vector<256x32xbf16>
    %3 = arith.extf %2 : vector<256x32xbf16> to vector<256x32xf32>
    %c0_3 = arith.constant 0 : index
    %c0_4 = arith.constant 0 : index
    %c0_5 = arith.constant 0 : index
    %c0_6 = arith.constant 0 : index
    %4 = vector.load %arg2[%c0_3, %c0_4, %c0_5, %c0_6] : memref<1x16x16x64xbf16, #tpu.memory_space<vmem>>, vector<1x16x16x64xbf16>
    %5 = vector.shape_cast %4 : vector<1x16x16x64xbf16> to vector<16x16x64xbf16>
    %c0_i32 = arith.constant 0 : i32
    %6 = arith.sitofp %c0_i32 : i32 to bf16
    %7 = vector.broadcast %6 : bf16 to vector<1x16x64xbf16>
    %8 = tpu.concatenate %7, %5 in 0 : vector<1x16x64xbf16>, vector<16x16x64xbf16> -> vector<17x16x64xbf16>
    %9 = vector.broadcast %6 : bf16 to vector<1x16x64xbf16>
    %10 = tpu.concatenate %8, %9 in 0 : vector<17x16x64xbf16>, vector<1x16x64xbf16> -> vector<18x16x64xbf16>
    %11 = vector.broadcast %6 : bf16 to vector<18x1x64xbf16>
    %12 = tpu.concatenate %11, %10 in 1 : vector<18x1x64xbf16>, vector<18x16x64xbf16> -> vector<18x17x64xbf16>
    %13 = vector.broadcast %6 : bf16 to vector<18x1x64xbf16>
    %14 = tpu.concatenate %12, %13 in 1 : vector<18x17x64xbf16>, vector<18x1x64xbf16> -> vector<18x18x64xbf16>
    %cst = arith.constant 0.000000e+00 : f32
    %15 = vector.broadcast %cst : f32 to vector<256x96xf32>
    %16 = vector.extract_strided_slice %14 {offsets = [0, 0, 0], sizes = [16, 18, 64], strides = [1, 1, 1]} : vector<18x18x64xbf16> to vector<16x18x64xbf16>
    %17 = vector.extract_strided_slice %16 {offsets = [0, 0, 0], sizes = [16, 16, 64], strides = [1, 1, 1]} : vector<16x18x64xbf16> to vector<16x16x64xbf16>
    %18 = vector.extract_strided_slice %16 {offsets = [0, 1, 0], sizes = [16, 16, 64], strides = [1, 1, 1]} : vector<16x18x64xbf16> to vector<16x16x64xbf16>
    %19 = vector.extract_strided_slice %16 {offsets = [0, 2, 0], sizes = [16, 16, 64], strides = [1, 1, 1]} : vector<16x18x64xbf16> to vector<16x16x64xbf16>
    %20 = tpu.concatenate %17, %18, %19 in 2 : vector<16x16x64xbf16>, vector<16x16x64xbf16>, vector<16x16x64xbf16> -> vector<16x16x192xbf16>
    %21 = vector.shape_cast %20 : vector<16x16x192xbf16> to vector<256x192xbf16>
    %c0_7 = arith.constant 0 : index
    %c0_8 = arith.constant 0 : index
    %c0_9 = arith.constant 0 : index
    %22 = vector.load %arg3[%c0_7, %c0_8, %c0_9] : memref<3x192x96xbf16, #tpu.memory_space<vmem>>, vector<1x192x96xbf16>
    %23 = vector.shape_cast %22 : vector<1x192x96xbf16> to vector<192x96xbf16>
    %cst_10 = arith.constant dense<0.000000e+00> : vector<256x96xf32>
    %24 = tpu.matmul %21, %23, %cst_10 {dimension_numbers = #tpu.dot_dimension_numbers<[1], [0], [0], [1], [0, 0, 1, 1], [], []>} : vector<256x192xbf16>, vector<192x96xbf16>, vector<256x96xf32> -> vector<256x96xf32>
    %25 = arith.addf %15, %24 : vector<256x96xf32>
    %26 = vector.extract_strided_slice %14 {offsets = [1, 0, 0], sizes = [16, 18, 64], strides = [1, 1, 1]} : vector<18x18x64xbf16> to vector<16x18x64xbf16>
    %27 = vector.extract_strided_slice %26 {offsets = [0, 0, 0], sizes = [16, 16, 64], strides = [1, 1, 1]} : vector<16x18x64xbf16> to vector<16x16x64xbf16>
    %28 = vector.extract_strided_slice %26 {offsets = [0, 1, 0], sizes = [16, 16, 64], strides = [1, 1, 1]} : vector<16x18x64xbf16> to vector<16x16x64xbf16>
    %29 = vector.extract_strided_slice %26 {offsets = [0, 2, 0], sizes = [16, 16, 64], strides = [1, 1, 1]} : vector<16x18x64xbf16> to vector<16x16x64xbf16>
    %30 = tpu.concatenate %27, %28, %29 in 2 : vector<16x16x64xbf16>, vector<16x16x64xbf16>, vector<16x16x64xbf16> -> vector<16x16x192xbf16>
    %31 = vector.shape_cast %30 : vector<16x16x192xbf16> to vector<256x192xbf16>
    %c1 = arith.constant 1 : index
    %c0_11 = arith.constant 0 : index
    %c0_12 = arith.constant 0 : index
    %32 = vector.load %arg3[%c1, %c0_11, %c0_12] : memref<3x192x96xbf16, #tpu.memory_space<vmem>>, vector<1x192x96xbf16>
    %33 = vector.shape_cast %32 : vector<1x192x96xbf16> to vector<192x96xbf16>
    %cst_13 = arith.constant dense<0.000000e+00> : vector<256x96xf32>
    %34 = tpu.matmul %31, %33, %cst_13 {dimension_numbers = #tpu.dot_dimension_numbers<[1], [0], [0], [1], [0, 0, 1, 1], [], []>} : vector<256x192xbf16>, vector<192x96xbf16>, vector<256x96xf32> -> vector<256x96xf32>
    %35 = arith.addf %25, %34 : vector<256x96xf32>
    %36 = vector.extract_strided_slice %14 {offsets = [2, 0, 0], sizes = [16, 18, 64], strides = [1, 1, 1]} : vector<18x18x64xbf16> to vector<16x18x64xbf16>
    %37 = vector.extract_strided_slice %36 {offsets = [0, 0, 0], sizes = [16, 16, 64], strides = [1, 1, 1]} : vector<16x18x64xbf16> to vector<16x16x64xbf16>
    %38 = vector.extract_strided_slice %36 {offsets = [0, 1, 0], sizes = [16, 16, 64], strides = [1, 1, 1]} : vector<16x18x64xbf16> to vector<16x16x64xbf16>
    %39 = vector.extract_strided_slice %36 {offsets = [0, 2, 0], sizes = [16, 16, 64], strides = [1, 1, 1]} : vector<16x18x64xbf16> to vector<16x16x64xbf16>
    %40 = tpu.concatenate %37, %38, %39 in 2 : vector<16x16x64xbf16>, vector<16x16x64xbf16>, vector<16x16x64xbf16> -> vector<16x16x192xbf16>
    %41 = vector.shape_cast %40 : vector<16x16x192xbf16> to vector<256x192xbf16>
    %c2 = arith.constant 2 : index
    %c0_14 = arith.constant 0 : index
    %c0_15 = arith.constant 0 : index
    %42 = vector.load %arg3[%c2, %c0_14, %c0_15] : memref<3x192x96xbf16, #tpu.memory_space<vmem>>, vector<1x192x96xbf16>
    %43 = vector.shape_cast %42 : vector<1x192x96xbf16> to vector<192x96xbf16>
    %cst_16 = arith.constant dense<0.000000e+00> : vector<256x96xf32>
    %44 = tpu.matmul %41, %43, %cst_16 {dimension_numbers = #tpu.dot_dimension_numbers<[1], [0], [0], [1], [0, 0, 1, 1], [], []>} : vector<256x192xbf16>, vector<192x96xbf16>, vector<256x96xf32> -> vector<256x96xf32>
    %45 = arith.addf %35, %44 : vector<256x96xf32>
    %c0_17 = arith.constant 0 : index
    %c0_18 = arith.constant 0 : index
    %46 = vector.load %arg6[%c0_17, %c0_18] : memref<1x96xf32, #tpu.memory_space<vmem>>, vector<1x96xf32>
    %47 = vector.broadcast %46 : vector<1x96xf32> to vector<256x96xf32>
    %48 = arith.addf %45, %47 : vector<256x96xf32>
    %c0_i32_19 = arith.constant 0 : i32
    %49 = arith.sitofp %c0_i32_19 : i32 to bf16
    %50 = vector.broadcast %49 : bf16 to vector<1x16x32xbf16>
    %51 = tpu.concatenate %50, %1 in 0 : vector<1x16x32xbf16>, vector<16x16x32xbf16> -> vector<17x16x32xbf16>
    %52 = vector.broadcast %49 : bf16 to vector<1x16x32xbf16>
    %53 = tpu.concatenate %51, %52 in 0 : vector<17x16x32xbf16>, vector<1x16x32xbf16> -> vector<18x16x32xbf16>
    %54 = vector.broadcast %49 : bf16 to vector<18x1x32xbf16>
    %55 = tpu.concatenate %54, %53 in 1 : vector<18x1x32xbf16>, vector<18x16x32xbf16> -> vector<18x17x32xbf16>
    %56 = vector.broadcast %49 : bf16 to vector<18x1x32xbf16>
    %57 = tpu.concatenate %55, %56 in 1 : vector<18x17x32xbf16>, vector<18x1x32xbf16> -> vector<18x18x32xbf16>
    %cst_20 = arith.constant 0.000000e+00 : f32
    %58 = vector.broadcast %cst_20 : f32 to vector<256x64xf32>
    %59 = vector.extract_strided_slice %57 {offsets = [0, 0, 0], sizes = [16, 18, 32], strides = [1, 1, 1]} : vector<18x18x32xbf16> to vector<16x18x32xbf16>
    %60 = vector.extract_strided_slice %59 {offsets = [0, 0, 0], sizes = [16, 16, 32], strides = [1, 1, 1]} : vector<16x18x32xbf16> to vector<16x16x32xbf16>
    %61 = vector.extract_strided_slice %59 {offsets = [0, 1, 0], sizes = [16, 16, 32], strides = [1, 1, 1]} : vector<16x18x32xbf16> to vector<16x16x32xbf16>
    %62 = vector.extract_strided_slice %59 {offsets = [0, 2, 0], sizes = [16, 16, 32], strides = [1, 1, 1]} : vector<16x18x32xbf16> to vector<16x16x32xbf16>
    %63 = tpu.concatenate %60, %61, %62 in 2 : vector<16x16x32xbf16>, vector<16x16x32xbf16>, vector<16x16x32xbf16> -> vector<16x16x96xbf16>
    %64 = vector.shape_cast %63 : vector<16x16x96xbf16> to vector<256x96xbf16>
    %c0_21 = arith.constant 0 : index
    %c0_22 = arith.constant 0 : index
    %c0_23 = arith.constant 0 : index
    %65 = vector.load %arg4[%c0_21, %c0_22, %c0_23] : memref<3x96x64xbf16, #tpu.memory_space<vmem>>, vector<1x96x64xbf16>
    %66 = vector.shape_cast %65 : vector<1x96x64xbf16> to vector<96x64xbf16>
    %cst_24 = arith.constant dense<0.000000e+00> : vector<256x64xf32>
    %67 = tpu.matmul %64, %66, %cst_24 {dimension_numbers = #tpu.dot_dimension_numbers<[1], [0], [0], [1], [0, 0, 1, 1], [], []>} : vector<256x96xbf16>, vector<96x64xbf16>, vector<256x64xf32> -> vector<256x64xf32>
    %68 = arith.addf %58, %67 : vector<256x64xf32>
    %69 = vector.extract_strided_slice %57 {offsets = [1, 0, 0], sizes = [16, 18, 32], strides = [1, 1, 1]} : vector<18x18x32xbf16> to vector<16x18x32xbf16>
    %70 = vector.extract_strided_slice %69 {offsets = [0, 0, 0], sizes = [16, 16, 32], strides = [1, 1, 1]} : vector<16x18x32xbf16> to vector<16x16x32xbf16>
    %71 = vector.extract_strided_slice %69 {offsets = [0, 1, 0], sizes = [16, 16, 32], strides = [1, 1, 1]} : vector<16x18x32xbf16> to vector<16x16x32xbf16>
    %72 = vector.extract_strided_slice %69 {offsets = [0, 2, 0], sizes = [16, 16, 32], strides = [1, 1, 1]} : vector<16x18x32xbf16> to vector<16x16x32xbf16>
    %73 = tpu.concatenate %70, %71, %72 in 2 : vector<16x16x32xbf16>, vector<16x16x32xbf16>, vector<16x16x32xbf16> -> vector<16x16x96xbf16>
    %74 = vector.shape_cast %73 : vector<16x16x96xbf16> to vector<256x96xbf16>
    %c1_25 = arith.constant 1 : index
    %c0_26 = arith.constant 0 : index
    %c0_27 = arith.constant 0 : index
    %75 = vector.load %arg4[%c1_25, %c0_26, %c0_27] : memref<3x96x64xbf16, #tpu.memory_space<vmem>>, vector<1x96x64xbf16>
    %76 = vector.shape_cast %75 : vector<1x96x64xbf16> to vector<96x64xbf16>
    %cst_28 = arith.constant dense<0.000000e+00> : vector<256x64xf32>
    %77 = tpu.matmul %74, %76, %cst_28 {dimension_numbers = #tpu.dot_dimension_numbers<[1], [0], [0], [1], [0, 0, 1, 1], [], []>} : vector<256x96xbf16>, vector<96x64xbf16>, vector<256x64xf32> -> vector<256x64xf32>
    %78 = arith.addf %68, %77 : vector<256x64xf32>
    %79 = vector.extract_strided_slice %57 {offsets = [2, 0, 0], sizes = [16, 18, 32], strides = [1, 1, 1]} : vector<18x18x32xbf16> to vector<16x18x32xbf16>
    %80 = vector.extract_strided_slice %79 {offsets = [0, 0, 0], sizes = [16, 16, 32], strides = [1, 1, 1]} : vector<16x18x32xbf16> to vector<16x16x32xbf16>
    %81 = vector.extract_strided_slice %79 {offsets = [0, 1, 0], sizes = [16, 16, 32], strides = [1, 1, 1]} : vector<16x18x32xbf16> to vector<16x16x32xbf16>
    %82 = vector.extract_strided_slice %79 {offsets = [0, 2, 0], sizes = [16, 16, 32], strides = [1, 1, 1]} : vector<16x18x32xbf16> to vector<16x16x32xbf16>
    %83 = tpu.concatenate %80, %81, %82 in 2 : vector<16x16x32xbf16>, vector<16x16x32xbf16>, vector<16x16x32xbf16> -> vector<16x16x96xbf16>
    %84 = vector.shape_cast %83 : vector<16x16x96xbf16> to vector<256x96xbf16>
    %c2_29 = arith.constant 2 : index
    %c0_30 = arith.constant 0 : index
    %c0_31 = arith.constant 0 : index
    %85 = vector.load %arg4[%c2_29, %c0_30, %c0_31] : memref<3x96x64xbf16, #tpu.memory_space<vmem>>, vector<1x96x64xbf16>
    %86 = vector.shape_cast %85 : vector<1x96x64xbf16> to vector<96x64xbf16>
    %cst_32 = arith.constant dense<0.000000e+00> : vector<256x64xf32>
    %87 = tpu.matmul %84, %86, %cst_32 {dimension_numbers = #tpu.dot_dimension_numbers<[1], [0], [0], [1], [0, 0, 1, 1], [], []>} : vector<256x96xbf16>, vector<96x64xbf16>, vector<256x64xf32> -> vector<256x64xf32>
    %88 = arith.addf %78, %87 : vector<256x64xf32>
    %89 = vector.extract_strided_slice %48 {offsets = [0, 0], sizes = [256, 32], strides = [1, 1]} : vector<256x96xf32> to vector<256x32xf32>
    %90 = vector.extract_strided_slice %88 {offsets = [0, 0], sizes = [256, 32], strides = [1, 1]} : vector<256x64xf32> to vector<256x32xf32>
    %91 = arith.addf %89, %90 : vector<256x32xf32>
    %92 = arith.negf %91 : vector<256x32xf32>
    %93 = math.exp %92 : vector<256x32xf32>
    %cst_33 = arith.constant 1.000000e+00 : f32
    %94 = vector.broadcast %cst_33 : f32 to vector<256x32xf32>
    %95 = arith.addf %94, %93 : vector<256x32xf32>
    %96 = arith.divf %94, %95 : vector<256x32xf32>
    %97 = vector.extract_strided_slice %48 {offsets = [0, 32], sizes = [256, 32], strides = [1, 1]} : vector<256x96xf32> to vector<256x32xf32>
    %98 = vector.extract_strided_slice %88 {offsets = [0, 32], sizes = [256, 32], strides = [1, 1]} : vector<256x64xf32> to vector<256x32xf32>
    %99 = arith.addf %97, %98 : vector<256x32xf32>
    %100 = arith.negf %99 : vector<256x32xf32>
    %101 = math.exp %100 : vector<256x32xf32>
    %cst_34 = arith.constant 1.000000e+00 : f32
    %102 = vector.broadcast %cst_34 : f32 to vector<256x32xf32>
    %103 = arith.addf %102, %101 : vector<256x32xf32>
    %104 = arith.divf %102, %103 : vector<256x32xf32>
    %105 = arith.mulf %104, %3 : vector<256x32xf32>
    %106 = arith.truncf %105 : vector<256x32xf32> to vector<256x32xbf16>
    %107 = vector.shape_cast %106 : vector<256x32xbf16> to vector<16x16x32xbf16>
    %108 = vector.extract_strided_slice %48 {offsets = [0, 64], sizes = [256, 32], strides = [1, 1]} : vector<256x96xf32> to vector<256x32xf32>
    %c0_i32_35 = arith.constant 0 : i32
    %109 = arith.sitofp %c0_i32_35 : i32 to bf16
    %110 = vector.broadcast %109 : bf16 to vector<1x16x32xbf16>
    %111 = tpu.concatenate %110, %107 in 0 : vector<1x16x32xbf16>, vector<16x16x32xbf16> -> vector<17x16x32xbf16>
    %112 = vector.broadcast %109 : bf16 to vector<1x16x32xbf16>
    %113 = tpu.concatenate %111, %112 in 0 : vector<17x16x32xbf16>, vector<1x16x32xbf16> -> vector<18x16x32xbf16>
    %114 = vector.broadcast %109 : bf16 to vector<18x1x32xbf16>
    %115 = tpu.concatenate %114, %113 in 1 : vector<18x1x32xbf16>, vector<18x16x32xbf16> -> vector<18x17x32xbf16>
    %116 = vector.broadcast %109 : bf16 to vector<18x1x32xbf16>
    %117 = tpu.concatenate %115, %116 in 1 : vector<18x17x32xbf16>, vector<18x1x32xbf16> -> vector<18x18x32xbf16>
    %cst_36 = arith.constant 0.000000e+00 : f32
    %118 = vector.broadcast %cst_36 : f32 to vector<256x32xf32>
    %119 = vector.extract_strided_slice %117 {offsets = [0, 0, 0], sizes = [16, 18, 32], strides = [1, 1, 1]} : vector<18x18x32xbf16> to vector<16x18x32xbf16>
    %120 = vector.extract_strided_slice %119 {offsets = [0, 0, 0], sizes = [16, 16, 32], strides = [1, 1, 1]} : vector<16x18x32xbf16> to vector<16x16x32xbf16>
    %121 = vector.extract_strided_slice %119 {offsets = [0, 1, 0], sizes = [16, 16, 32], strides = [1, 1, 1]} : vector<16x18x32xbf16> to vector<16x16x32xbf16>
    %122 = vector.extract_strided_slice %119 {offsets = [0, 2, 0], sizes = [16, 16, 32], strides = [1, 1, 1]} : vector<16x18x32xbf16> to vector<16x16x32xbf16>
    %123 = tpu.concatenate %120, %121, %122 in 2 : vector<16x16x32xbf16>, vector<16x16x32xbf16>, vector<16x16x32xbf16> -> vector<16x16x96xbf16>
    %124 = vector.shape_cast %123 : vector<16x16x96xbf16> to vector<256x96xbf16>
    %c0_37 = arith.constant 0 : index
    %c0_38 = arith.constant 0 : index
    %c0_39 = arith.constant 0 : index
    %125 = vector.load %arg5[%c0_37, %c0_38, %c0_39] : memref<3x96x32xbf16, #tpu.memory_space<vmem>>, vector<1x96x32xbf16>
    %126 = vector.shape_cast %125 : vector<1x96x32xbf16> to vector<96x32xbf16>
    %cst_40 = arith.constant dense<0.000000e+00> : vector<256x32xf32>
    %127 = tpu.matmul %124, %126, %cst_40 {dimension_numbers = #tpu.dot_dimension_numbers<[1], [0], [0], [1], [0, 0, 1, 1], [], []>} : vector<256x96xbf16>, vector<96x32xbf16>, vector<256x32xf32> -> vector<256x32xf32>
    %128 = arith.addf %118, %127 : vector<256x32xf32>
    %129 = vector.extract_strided_slice %117 {offsets = [1, 0, 0], sizes = [16, 18, 32], strides = [1, 1, 1]} : vector<18x18x32xbf16> to vector<16x18x32xbf16>
    %130 = vector.extract_strided_slice %129 {offsets = [0, 0, 0], sizes = [16, 16, 32], strides = [1, 1, 1]} : vector<16x18x32xbf16> to vector<16x16x32xbf16>
    %131 = vector.extract_strided_slice %129 {offsets = [0, 1, 0], sizes = [16, 16, 32], strides = [1, 1, 1]} : vector<16x18x32xbf16> to vector<16x16x32xbf16>
    %132 = vector.extract_strided_slice %129 {offsets = [0, 2, 0], sizes = [16, 16, 32], strides = [1, 1, 1]} : vector<16x18x32xbf16> to vector<16x16x32xbf16>
    %133 = tpu.concatenate %130, %131, %132 in 2 : vector<16x16x32xbf16>, vector<16x16x32xbf16>, vector<16x16x32xbf16> -> vector<16x16x96xbf16>
    %134 = vector.shape_cast %133 : vector<16x16x96xbf16> to vector<256x96xbf16>
    %c1_41 = arith.constant 1 : index
    %c0_42 = arith.constant 0 : index
    %c0_43 = arith.constant 0 : index
    %135 = vector.load %arg5[%c1_41, %c0_42, %c0_43] : memref<3x96x32xbf16, #tpu.memory_space<vmem>>, vector<1x96x32xbf16>
    %136 = vector.shape_cast %135 : vector<1x96x32xbf16> to vector<96x32xbf16>
    %cst_44 = arith.constant dense<0.000000e+00> : vector<256x32xf32>
    %137 = tpu.matmul %134, %136, %cst_44 {dimension_numbers = #tpu.dot_dimension_numbers<[1], [0], [0], [1], [0, 0, 1, 1], [], []>} : vector<256x96xbf16>, vector<96x32xbf16>, vector<256x32xf32> -> vector<256x32xf32>
    %138 = arith.addf %128, %137 : vector<256x32xf32>
    %139 = vector.extract_strided_slice %117 {offsets = [2, 0, 0], sizes = [16, 18, 32], strides = [1, 1, 1]} : vector<18x18x32xbf16> to vector<16x18x32xbf16>
    %140 = vector.extract_strided_slice %139 {offsets = [0, 0, 0], sizes = [16, 16, 32], strides = [1, 1, 1]} : vector<16x18x32xbf16> to vector<16x16x32xbf16>
    %141 = vector.extract_strided_slice %139 {offsets = [0, 1, 0], sizes = [16, 16, 32], strides = [1, 1, 1]} : vector<16x18x32xbf16> to vector<16x16x32xbf16>
    %142 = vector.extract_strided_slice %139 {offsets = [0, 2, 0], sizes = [16, 16, 32], strides = [1, 1, 1]} : vector<16x18x32xbf16> to vector<16x16x32xbf16>
    %143 = tpu.concatenate %140, %141, %142 in 2 : vector<16x16x32xbf16>, vector<16x16x32xbf16>, vector<16x16x32xbf16> -> vector<16x16x96xbf16>
    %144 = vector.shape_cast %143 : vector<16x16x96xbf16> to vector<256x96xbf16>
    %c2_45 = arith.constant 2 : index
    %c0_46 = arith.constant 0 : index
    %c0_47 = arith.constant 0 : index
    %145 = vector.load %arg5[%c2_45, %c0_46, %c0_47] : memref<3x96x32xbf16, #tpu.memory_space<vmem>>, vector<1x96x32xbf16>
    %146 = vector.shape_cast %145 : vector<1x96x32xbf16> to vector<96x32xbf16>
    %cst_48 = arith.constant dense<0.000000e+00> : vector<256x32xf32>
    %147 = tpu.matmul %144, %146, %cst_48 {dimension_numbers = #tpu.dot_dimension_numbers<[1], [0], [0], [1], [0, 0, 1, 1], [], []>} : vector<256x96xbf16>, vector<96x32xbf16>, vector<256x32xf32> -> vector<256x32xf32>
    %148 = arith.addf %138, %147 : vector<256x32xf32>
    %149 = arith.addf %108, %148 : vector<256x32xf32>
    %150 = math.tanh %149 : vector<256x32xf32>
    %cst_49 = arith.constant 1.000000e+00 : f32
    %151 = vector.broadcast %cst_49 : f32 to vector<256x32xf32>
    %152 = arith.subf %151, %96 : vector<256x32xf32>
    %153 = arith.mulf %152, %3 : vector<256x32xf32>
    %154 = arith.mulf %96, %150 : vector<256x32xf32>
    %155 = arith.addf %153, %154 : vector<256x32xf32>
    %156 = vector.shape_cast %155 : vector<256x32xf32> to vector<16x16x32xf32>
    %c0_50 = arith.constant 0 : index
    %c0_51 = arith.constant 0 : index
    %c0_52 = arith.constant 0 : index
    %c0_53 = arith.constant 0 : index
    %157 = vector.load %arg7[%c0_50, %c0_51, %c0_52, %c0_53] : memref<1x16x16x32xf32, #tpu.memory_space<vmem>>, vector<1x16x16x32xf32>
    %158 = vector.shape_cast %157 : vector<1x16x16x32xf32> to vector<16x16x32xf32>
    %159 = vector.shape_cast %156 : vector<16x16x32xf32> to vector<1x16x16x32xf32>
    tpu.vector_store %arg7[%c0_50, %c0_51, %c0_52, %c0_53], %159 {strides = array<i32>} : memref<1x16x16x32xf32, #tpu.memory_space<vmem>>, vector<1x16x16x32xf32>,
    return
  }
  func.func @transform_0(%arg0: i32) -> (i32, i32, i32, i32) {
    %c0_i32 = arith.constant 0 : i32
    %c0_i32_0 = arith.constant 0 : i32
    %c0_i32_1 = arith.constant 0 : i32
    %c0_i32_2 = arith.constant 0 : i32
    return %arg0, %c0_i32, %c0_i32_0, %c0_i32_1 : i32, i32, i32, i32
  }
  func.func @transform_1(%arg0: i32) -> (i32, i32, i32, i32) {
    %c0_i32 = arith.constant 0 : i32
    %c0_i32_0 = arith.constant 0 : i32
    %c0_i32_1 = arith.constant 0 : i32
    %c0_i32_2 = arith.constant 0 : i32
    return %arg0, %c0_i32, %c0_i32_0, %c0_i32_1 : i32, i32, i32, i32
  }
  func.func @transform_2(%arg0: i32) -> (i32, i32, i32) {
    %c0_i32 = arith.constant 0 : i32
    %c0_i32_0 = arith.constant 0 : i32
    %c0_i32_1 = arith.constant 0 : i32
    %c0_i32_2 = arith.constant 0 : i32
    return %c0_i32, %c0_i32_0, %c0_i32_1 : i32, i32, i32
  }
  func.func @transform_3(%arg0: i32) -> (i32, i32, i32) {
    %c0_i32 = arith.constant 0 : i32
    %c0_i32_0 = arith.constant 0 : i32
    %c0_i32_1 = arith.constant 0 : i32
    %c0_i32_2 = arith.constant 0 : i32
    return %c0_i32, %c0_i32_0, %c0_i32_1 : i32, i32, i32
  }
  func.func @transform_4(%arg0: i32) -> (i32, i32, i32) {
    %c0_i32 = arith.constant 0 : i32
    %c0_i32_0 = arith.constant 0 : i32
    %c0_i32_1 = arith.constant 0 : i32
    %c0_i32_2 = arith.constant 0 : i32
    return %c0_i32, %c0_i32_0, %c0_i32_1 : i32, i32, i32
  }
  func.func @transform_5(%arg0: i32) -> (i32, i32) {
    %c0_i32 = arith.constant 0 : i32
    %c0_i32_0 = arith.constant 0 : i32
    %c0_i32_1 = arith.constant 0 : i32
    return %c0_i32, %c0_i32_0 : i32, i32
  }
  func.func @transform_6(%arg0: i32) -> (i32, i32, i32, i32) {
    %c0_i32 = arith.constant 0 : i32
    %c0_i32_0 = arith.constant 0 : i32
    %c0_i32_1 = arith.constant 0 : i32
    %c0_i32_2 = arith.constant 0 : i32
    return %arg0, %c0_i32, %c0_i32_0, %c0_i32_1 : i32, i32, i32, i32
  }
}

</mosaic_0001>

<bundles_post_ra>
// kernel: tpu_custom_call.1
= control target key start
LH: loop header
LB: loop body
LE: loop exit
PB: predicated region body
PF: predicated region fallthrough
CT: control target
= control target key end

     0   :  { %s10085_s0 = inlined_call_operand.hbm [shape: bf16[2,16,16,32], index: 0, kind: input, shape index: {}]   ;;  %s10086_s1 = inlined_call_operand.hbm [shape: bf16[2,16,16,64], index: 1, kind: input, shape index: {}]   ;;  %s10087_s2 = inlined_call_operand.vmem [shape: bf16[3,192,96], index: 2, kind: input, shape index: {}]   ;;  %s10088_s3 = inlined_call_operand.vmem [shape: bf16[3,96,64], index: 3, kind: input, shape index: {}]   ;;  %s10089_s4 = inlined_call_operand.vmem [shape: bf16[3,96,32], index: 4, kind: input, shape index: {}]   ;;  %s10090_s5 = inlined_call_operand.vmem [shape: f32[1,96], index: 5, kind: input, shape index: {}]   ;;  %s10091_s6 = inlined_call_operand.hbm [shape: f32[2,16,16,32], index: 6, kind: output, shape index: {}]  }
   0x1   :  { %10274 = sst [smem:[#allocation92_spill]] %s10085_s0 }
   0x2   :  { %11 = vsyncpa [#allocation3], 0 }
   0x3   :  { %13 = vsyncpa [#allocation3 + $0x1], 0 }
   0x4   :  { %14 = vsyncpa [#allocation6], 0 }
   0x5   :  { %16 = vsyncpa [#allocation6 + $0x1], 0 }
   0x6   :  { %17 = vsyncpa [#allocation4], 0 }
   0x7   :  { %19 = vsyncpa [#allocation4 + $0x1], 0  ;;  %s7050_s21 = smov 0   ;;  %s7052_s22 = smov 0  }
   0x8   :  { %s7054_s23 = smov 0   ;;  %s7056_s24 = smov 0  }
   0x9 LB: > { %s7071_s25 = sadd.s32 4294967295, %s7002_s24   ;;  %s5617_s26 = sadd.s32 4294967294, %s7002_s24   ;;  %s7002_s24 = sphi %s7056_s24, %s10591_s24   ;;  %s6998_s23 = sphi %s7054_s23, %s10590_s23   ;;  %s6994_s22 = sphi %s7052_s22, %s10589_s22   ;;  %s6990_s21 = sphi %s7050_s21, %s10588_s21  }
   0xa   : > { %s7075_s27 = sadd.s32 1, %s7002_s24   ;;  %s32_s28 = sadd.s32 1, %s6998_s23 }
   0xb   : > { %s29_s29 = ssub.s32 %s7002_s24, %s7075_s27  ;;  %p39_p0 = scmp.ne.s32.totalorder %s6998_s23, %s6994_s22 }
   0xc   : > { %p30_p1 = scmp.eq.s32.totalorder %s29_s29, 0  ;;  %p40_p2 = scmp.eq.s32.totalorder %s7002_s24, 0 }
   0xd   : > { %p45_p3 = scmp.ne.s32.totalorder %s6994_s22, %s6990_s21  ;;  %p46_p4 = scmp.eq.s32.totalorder %s7071_s25, 0 }
   0xe   : > { %s7087_s30 = scalar_select %p30_p1, %s6998_s23, %s32_s28  }
   0xf   : > { %p7089_p5 = por %p40_p2, %p39_p0  ;;  %p7093_p6 = por %p46_p4, %p45_p3 }
  0x10   : > { %p179_p7 = scmp.eq.s32.totalorder %s7071_s25, 1  ;;  %p185_p8 = scmp.eq.s32.totalorder %s5617_s26, 1 }
  0x11   : > { %s10276_s8 = scalar_select %p7093_p6, 1, 0 }
  0x12   : > { %p6428_p10 = scmp.lt.s32.totalorder %s7002_s24, 2  ;;  %p7100_p11 = por %p179_p7, %p39_p0 }
  0x13   : > { %p7104_p12 = por %p185_p8, %p45_p3  ;;  %s7109_s11 = sand.u32 1, %s6998_s23  }
  0x14   : > { %s10277_s9 = scalar_select %p7100_p11, 1, 0 }
  0x15   : > { %s10278_s10 = scalar_select %p7104_p12, 1, 0 }
  0x16   : > { %s6012_s12 = sshll.u32 %s7002_s24, 11  ;;  %s10092_s13 = sshll.u32 %s7109_s11, 7 }
  0x17   : > { %s10279_s0 = sld [smem:[#allocation92_spill]]  ;;  %s221_s17 = scalar_lea.vmem [#allocation2], %s10092_s13 }
  0x18   : > { %s228_s18 = sshll.u32 %s221_s17, 4  ;;  %p7124_p13 = pnand %p6428_p10, %p7089_p5  ;;  %s7128_s18 = int_to_ptr.vmem [resolvable:$true] %s228_s18 }
  0x19   : > { %s218_s20 = scalar_lea.sflag [#allocation3], %s7109_s11 }
  0x1a   : > { %p6880_p1 = pneg %p7124_p13 }
  0x1d   : > { %s7118_s16 = scalar_lea.hbm %s10279_s0, %s6012_s12  ;;  %s6883_s7 = scalar_lea.hbm %s10279_s0, 4096 }
  0x1e   : > { %s6878_s26 = scalar_lea.hbm %s7118_s16, 2048  ;;  %p6884_p4 = scmp.lt.s32.totalorder %s7118_s16, %s10279_s0 }
  0x1f   : > { %p6879_p0 = scmp.ne.s32.totalorder %s7118_s16, %s6878_s26  ;;  %p6885_p5 = scmp.lt.s32.totalorder %s6883_s7, %s6878_s26 }
  0x21   : > { %p6881_p2 = pnand %p6880_p1, %p6879_p0  ;;  %p6886_p7 = por %p6885_p5, %p6884_p4 }
  0x23   : > { %p6882_p3 = pneg %p6881_p2 }
  0x25   : > { %p6887_p8 = pnand %p6886_p7, %p6882_p3 }
  0x27   : > { %6890 = shalt.err (!%p6887_p8)
}
  0x28   : > { %s6891_s17 = scalar_lea.vmem %s7128_s18, 2048  ;;  %s7004_s28 = smov [#allocation2]  }
  0x29   : > { %p6892_p10 = scmp.ne.s32.totalorder %s7128_s18, %s6891_s17  ;;  %s6896_s29 = sshll.u32 %s7004_s28, 4  ;;  %s6897_s29 = int_to_ptr.vmem [resolvable:$false] %s6896_s29 }
  0x2a   : > { %s6898_s13 = scalar_lea.vmem %s6897_s29, 4096  ;;  %p6899_p9 = scmp.lt.s32.totalorder %s7128_s18, %s6897_s29 }
  0x2b   : > { %p6894_p0 = pnand %p6892_p10, %p6880_p1  ;;  %p6900_p12 = scmp.lt.s32.totalorder %s6898_s13, %s6891_s17 }
  0x2d   : > { %p6895_p2 = pneg %p6894_p0  ;;  %p6901_p11 = por %p6900_p12, %p6899_p9 }
  0x2f   : > { %p6902_p4 = pnand %p6901_p11, %p6895_p2 }
  0x31   : > { %6905 = shalt.err (!%p6902_p4)
}
  0x32   : > { %s10094_s26 = smov 64   ;;  %s7006_s7 = smov 4  }
  0x33   : > { %6420 = dma.hbm_to_vmem [thread:$0]  (!%p7124_p13), %s7118_s16, 2048, %s7128_s18, %s218_s20, %s10094_s26, %s10094_s26, %s7006_s7  }
  0x34   : > { %p5626_p9 = scmp.ge.s32.totalorder %s7002_s24, 1  ;;  %p257_p11 = scmp.lt.s32.totalorder %s7002_s24, 3 }
  0x35   : > { %s7171_s17 = scalar_lea.hbm %s10086_s1, %s6012_s12  ;;  %s10282_s28 = sshll.u32 %s7109_s11, 7 }
  0x36   : > { %p7162_p12 = pnand %p5626_p9, %p257_p11  ;;  %s242_s29 = scalar_lea.vmem [#allocation5], %s10282_s28 }
  0x37   : > { %s249_s0 = sshll.u32 %s242_s29, 4  ;;  %s239_s16 = scalar_lea.sflag [#allocation6], %s7109_s11  ;;  %s7175_s0 = int_to_ptr.vmem [resolvable:$true] %s249_s0 }
  0x38   : > { %s6906_s18 = scalar_lea.hbm %s7171_s17, 2048  ;;  %s6911_s12 = scalar_lea.hbm %s10086_s1, 4096 }
  0x39   : > { %p6907_p3 = scmp.ne.s32.totalorder %s7171_s17, %s6906_s18  ;;  %p6912_p8 = scmp.lt.s32.totalorder %s7171_s17, %s10086_s1 }
  0x3a   : > { %p6913_p10 = scmp.lt.s32.totalorder %s6911_s12, %s6906_s18 }
  0x3b   : > { %p6909_p5 = pnand %p6907_p3, %p6880_p1 }
  0x3c   : > { %p6914_p0 = por %p6913_p10, %p6912_p8 }
  0x3d   : > { %p6910_p7 = pneg %p6909_p5 }
  0x3f   : > { %p6915_p2 = pnand %p6914_p0, %p6910_p7 }
  0x41   : > { %6918 = shalt.err (!%p6915_p2)
}
  0x42   : > { %s6919_s11 = scalar_lea.vmem %s7175_s0, 2048  ;;  %s7007_s26 = smov [#allocation5]  }
  0x43   : > { %p6920_p4 = scmp.ne.s32.totalorder %s7175_s0, %s6919_s11  ;;  %s6924_s28 = sshll.u32 %s7007_s26, 4  ;;  %s6925_s28 = int_to_ptr.vmem [resolvable:$false] %s6924_s28 }
  0x44   : > { %s6926_s29 = scalar_lea.vmem %s6925_s28, 4096  ;;  %p6927_p3 = scmp.lt.s32.totalorder %s7175_s0, %s6925_s28 }
  0x45   : > { %p6922_p9 = pnand %p6920_p4, %p6880_p1  ;;  %p6928_p5 = scmp.lt.s32.totalorder %s6926_s29, %s6919_s11 }
  0x47   : > { %p6923_p11 = pneg %p6922_p9  ;;  %p6929_p6 = por %p6928_p5, %p6927_p3 }
  0x49   : > { %p6930_p8 = pnand %p6929_p6, %p6923_p11 }
  0x4b   : > { %6933 = shalt.err (!%p6930_p8)
}
  0x4c   : > { %s10283_s18 = smov 64   ;;  %261 = sbr.rel (%p7162_p12) target bundleno = 1562 (0x61a), region = 44 }
  0x4d   : > { %6423 = dma.hbm_to_vmem [thread:$0]  (!%p7124_p13), %s7171_s17, 2048, %s7175_s0, %s239_s16, %s10283_s18, %s10283_s18, %s7006_s7  }
  0x51   : > { %s7206_s20 = sand.u32 1, %s6994_s22   ;;  %p10284_p6 = scmp.ne.s32.totalorder %s10276_s8, 0 }
  0x52   : > { %s5627_s12 = sshll.u32 %s7206_s20, 7  ;;  %s264_s14 = scalar_lea.sflag [#allocation3], %s7206_s20 }
  0x53   : > { %s7210_s15 = scalar_lea.vmem [#allocation2], %s5627_s12 }
  0x54   : > { %6977 = dma.done.wait (%p10284_p6), %s264_s14, 2048  }
  0x55   : > { %6979 = vsyncadd (%p10284_p6), %s264_s14, 4294965248  ;;  %s273_s0 = scalar_lea.sflag [#allocation6], %s7206_s20  ;;  %s7217_s19 = scalar_lea.vmem [#allocation5], %s5627_s12 }
  0x56   : > { %6981 = dma.done.wait (%p10284_p6), %s273_s0, 2048  }
  0x57   : > { %6983 = vsyncadd (%p10284_p6), %s273_s0, 4294965248  ;;  %vm640_vm0 = vcmask 1040384   ;;  %vm641_vm1 = vsmask.f32 256  ;;  %v10096_v0 = vmov 0   ;;  %v10285_v2 = vmov 0 }
  0x58   : > { %v490_v1 = vrot.slane %v10096_v0, 7  ;;  %1223 = vmatprep.subr.bf16.mxu0 %v10096_v0  ;;  %1459 = vmatprep.subr.bf16.mxu1 %v10096_v0  ;;  %vm7226_vm2 = vmand %vm640_vm0, %vm641_vm1  ;;  %v6550_v8 = vld [vmem:[%s7217_s19] sm:$0xff]   ;;  %v6551_v10 = vld [vmem:[%s7217_s19 + $0x8] sm:$0xff]   ;;  %vm677_vm3 = vsmask.f32 7424  ;;  %s7009_s16 = smov 64  }
  0x59   : > { %v10286_v2 = vsel %vm7226_vm2, 4294967295, %v10285_v2  ;;  %v495_v12 = vshrl.u32 %v6550_v8, 16  ;;  %v498_v13 = vshll.u32 %v6550_v8, 16  ;;  %v502_v14 = vshrl.u32 %v6551_v10, 16  ;;  %v6552_v16 = vld [vmem:[%s7217_s19 + $0x20] sm:$0xff]   ;;  %v6553_v17 = vld [vmem:[%s7217_s19 + $0x30] sm:$0xff]  }
  0x5a   : > { %10287 = vst [vmem:[#allocation11_spill] sm:$0xff] %v10286_v2  ;;  %v7232_v3 = vsel %vm7226_vm2, 0, %v490_v1  ;;  %v7236_v4 = vsel %vm7226_vm2, %v490_v1, 0  ;;  %v505_v15 = vshll.u32 %v6551_v10, 16  ;;  %v6554_v19 = vld [vmem:[%s7217_s19 + $0x10] sm:$0xff]   ;;  %v523_v22 = vshrl.u32 %v6552_v16, 16 }
  0x5b   : > { %v681_v5 = vshll.u32 %v7232_v3, 16  ;;  %v686_v6 = vshll.u32 %v7236_v4, 16  ;;  %v679_v7 = vshrl.u32 %v7232_v3, 16  ;;  %v497_v18 = vrot.slane %v495_v12, 7  ;;  %v6555_v49 = vld [vmem:[%s7217_s19 + $0x18] sm:$0xff]   ;;  %v6556_v63 = vld [vmem:[%s7217_s19 + $0x28] sm:$0xff]  }
  0x5c   : > { %v504_v21 = vrot.slane %v502_v14, 7  ;;  %v526_v23 = vshll.u32 %v6552_v16, 16  ;;  %v537_v24 = vshrl.u32 %v6553_v17, 16  ;;  %v540_v27 = vshll.u32 %v6553_v17, 16  ;;  %v6559_v58 = vld [vmem:[%s10087_s2 + $0x98] sm:$0xff]   ;;  %v6560_v8 = vld [vmem:[%s10087_s2 + $0x90] sm:$0xff]  }
  0x5d   : > { %v683_v9 = vrot.slane %v681_v5, 1  ;;  %v688_v11 = vrot.slane %v686_v6, 1  ;;  %v500_v25 = vor.u32 %v498_v13, %v497_v18  ;;  %v7248_v26 = vsel %vm7226_vm2, %v497_v18, 0  ;;  %1224 = vmatpush1.bf16.msra.mxu0 %v6559_v58  ;;  %v6557_v17 = vld [vmem:[%s7217_s19 + $0x38] sm:$0xff]   ;;  %s7010_s7 = smov 32   ;;  %s7011_s8 = smov 96  }
  0x5e   : > { %v509_v28 = vshrl.u32 %v6554_v19, 16  ;;  %v698_v29 = vshll.u32 %v7248_v26, 16  ;;  %v507_v30 = vor.u32 %v505_v15, %v504_v21  ;;  %v7253_v31 = vsel %vm7226_vm2, %v504_v21, 0  ;;  %1225 = vmatprep.subr.bf16.mxu0 %v10096_v0  ;;  %v6566_v58 = vld [vmem:[%s10087_s2 + $0x38] sm:$0xff]   ;;  %s5629_s14 = sshll.u32 %s7206_s20, 8  ;;  %p10585_p1 = scmp.ne.s32.totalorder %s10277_s9, 0 }
  0x5f   : > { %v684_v20 = vor.u32 %v683_v9, %v679_v7  ;;  %v525_v32 = vrot.slane %v523_v22, 7  ;;  %v7257_v33 = vsel %vm7226_vm2, 0, %v500_v25  ;;  %v710_v34 = vshll.u32 %v7253_v31, 16  ;;  %v6558_v22 = vld [vmem:[%s7217_s19 + $0x40] sm:$0xff]   ;;  %1460 = vmatpush1.bf16.msra.mxu1 %v6566_v58  ;;  %s7012_s11 = smov [#allocation7]  }
  0x60   : > { %v539_v35 = vrot.slane %v537_v24, 7  ;;  %v511_v36 = vrot.slane %v509_v28, 7  ;;  %v691_v37 = vshrl.u32 %v7257_v33, 16  ;;  %v693_v38 = vshll.u32 %v7257_v33, 16  ;;  %v6562_v28 = vld [vmem:[%s10087_s2 + $0x88] sm:$0xff]   ;;  %1461 = vmatprep.subr.bf16.mxu1 %v10096_v0  ;;  %s6938_s26 = sshll.u32 %s7012_s11, 4  ;;  %s6939_s26 = int_to_ptr.vmem [resolvable:$false] %s6938_s26 }
  0x61   : > { %v700_v39 = vrot.slane %v698_v29, 1  ;;  %v7264_v40 = vsel %vm7226_vm2, 0, %v507_v30  ;;  %v712_v43 = vrot.slane %v710_v34, 1  ;;  %v528_v44 = vor.u32 %v526_v23, %v525_v32  ;;  %1226 = vmatpush1.bf16.msra.mxu0 %v6560_v8  ;;  %v6564_v8 = vld [vmem:[%s7217_s19 + $0x50] sm:$0xff]  }
  0x62   : > { %v703_v41 = vshrl.u32 %v7264_v40, 16  ;;  %v705_v42 = vshll.u32 %v7264_v40, 16  ;;  %v695_v45 = vrot.slane %v693_v38, 1  ;;  %v7270_v46 = vsel %vm7226_vm2, %v525_v32, 0  ;;  %1227 = vmatprep.subr.bf16.mxu0 %v10096_v0 }
  0x63   : > { %v542_v47 = vor.u32 %v540_v27, %v539_v35  ;;  %v7274_v48 = vsel %vm7226_vm2, %v539_v35, 0  ;;  %v7279_v51 = vsel %vm7226_vm2, 0, %v528_v44  ;;  %v746_v52 = vshll.u32 %v7270_v46, 16  ;;  %v7335_v44 = vld [vmem:[%s7217_s19 + $0x48] sm:$0xff]  }
  0x64   : > { %v707_v50 = vrot.slane %v705_v42, 1  ;;  %v770_v53 = vshll.u32 %v7274_v48, 16  ;;  %v696_v54 = vor.u32 %v695_v45, %v691_v37  ;;  %v739_v55 = vshrl.u32 %v7279_v51, 16 }
  0x65   : > { %v741_v56 = vshll.u32 %v7279_v51, 16  ;;  %v7287_v57 = vsel %vm7226_vm2, 0, %v542_v47  ;;  %v7295_v62 = vsel %vm677_vm3, %v684_v20, %v688_v11  ;;  %v748_v6 = vrot.slane %v746_v52, 1  ;;  %1228 = vmatpush1.bf16.msra.mxu0 %v6562_v28  ;;  %v6563_v52 = vld [vmem:[%s10087_s2 + $0x80] sm:$0xff]  }
  0x66   : > { %v708_v59 = vor.u32 %v707_v50, %v703_v41  ;;  %v763_v60 = vshrl.u32 %v7287_v57, 16  ;;  %v765_v61 = vshll.u32 %v7287_v57, 16  ;;  %v701_v1 = vsel %vm677_vm3, %v696_v54, %v700_v39  ;;  %1229 = vmatprep.subr.bf16.mxu0 %v10096_v0 }
  0x67   : > { %v743_v5 = vrot.slane %v741_v56, 1  ;;  %v512_v7 = vshll.u32 %v6554_v19, 16  ;;  %872 = vrot.lane.b32.xlu0 %v701_v1, %s7009_s16  ;;  %v772_v10 = vrot.slane %v770_v53, 1  ;;  %v7305_v11 = vsel %vm7226_vm2, %v511_v36, 0 }
  0x68   : > { %v767_v9 = vrot.slane %v765_v61, 1  ;;  %v516_v12 = vshrl.u32 %v6555_v49, 16  ;;  %v713_v13 = vsel %vm677_vm3, %v708_v59, %v712_v43  ;;  %v722_v16 = vshll.u32 %v7305_v11, 16 }
  0x69   : > { %v744_v14 = vor.u32 %v743_v5, %v739_v55  ;;  %v514_v15 = vor.u32 %v512_v7, %v511_v36  ;;  %v519_v20 = vshll.u32 %v6555_v49, 16  ;;  %v530_v21 = vshrl.u32 %v6556_v63, 16  ;;  %1230 = vmatpush1.bf16.msra.mxu0 %v6563_v52 }
  0x6a   : > { %v768_v18 = vor.u32 %v767_v9, %v763_v60  ;;  %v518_v19 = vrot.slane %v516_v12, 7  ;;  %v724_v25 = vrot.slane %v722_v16, 1  ;;  %v533_v27 = vshll.u32 %v6556_v63, 16  ;;  %v6565_v9 = vld [vmem:[%s10087_s2 + $0x78] sm:$0xff]   ;;  %1231 = vmatprep.subr.bf16.mxu0 %v10096_v0 }
  0x6b   : > { %v749_v23 = vsel %vm677_vm3, %v744_v14, %v748_v6  ;;  %v7315_v24 = vsel %vm7226_vm2, 0, %v514_v15  ;;  %874 = vrot.lane.b32.xlu0 %v713_v13, %s7009_s16  ;;  %v532_v36 = vrot.slane %v530_v21, 7  ;;  %v544_v37 = vshrl.u32 %v6557_v17, 16  ;;  %v6568_v15 = vld [vmem:[%s7217_s19 + $0x58] sm:$0xff]  }
  0x6c   : > { %v773_v29 = vsel %vm677_vm3, %v768_v18, %v772_v10  ;;  %v715_v30 = vshrl.u32 %v7315_v24, 16  ;;  %v717_v32 = vshll.u32 %v7315_v24, 16  ;;  %v521_v34 = vor.u32 %v519_v20, %v518_v19 }
  0x6d   : > { %v7327_v35 = vsel %vm7226_vm2, %v518_v19, 0  ;;  %v547_v38 = vshll.u32 %v6557_v17, 16  ;;  %v551_v43 = vshrl.u32 %v6558_v22, 16  ;;  %v535_v49 = vor.u32 %v533_v27, %v532_v36  ;;  %1232 = vmatpush1.bf16.msra.mxu0 %v6565_v9  ;;  %v6573_v9 = vld [vmem:[%s7217_s19 + $0x60] sm:$0xff]  }
  0x6e   : > { %v719_v39 = vrot.slane %v717_v32, 1  ;;  %v7331_v41 = vsel %vm7226_vm2, 0, %v521_v34  ;;  %v734_v42 = vshll.u32 %v7327_v35, 16  ;;  %v7341_v50 = vsel %vm7226_vm2, %v532_v36, 0  ;;  %v6567_v32 = vld [vmem:[%s10087_s2 + $0x70] sm:$0xff]   ;;  %1233 = vmatprep.subr.bf16.mxu0 %v10096_v0 }
  0x6f   : > { %v727_v45 = vshrl.u32 %v7331_v41, 16  ;;  %v729_v47 = vshll.u32 %v7331_v41, 16  ;;  %880 = vrot.lane.b32.xlu0 %v749_v23, %s7009_s16  ;;  %v758_v55 = vshll.u32 %v7341_v50, 16  ;;  %v546_v56 = vrot.slane %v544_v37, 7 }
  0x70   : > { %v720_v53 = vor.u32 %v719_v39, %v715_v30  ;;  %v736_v54 = vrot.slane %v734_v42, 1  ;;  %v7354_v60 = vsel %vm7226_vm2, 0, %v535_v49  ;;  %v553_v61 = vrot.slane %v551_v43, 7 }
  0x71   : > { %v731_v59 = vrot.slane %v729_v47, 1  ;;  %v554_v63 = vshll.u32 %v6558_v22, 16  ;;  %v751_v5 = vshrl.u32 %v7354_v60, 16  ;;  %v753_v6 = vshll.u32 %v7354_v60, 16  ;;  %v6571_v47 = vld [vmem:[%s10087_s2 + $0x28] sm:$0xff]   ;;  %1234 = vmatpush1.bf16.msra.mxu0 %v6567_v32 }
  0x72   : > { %v725_v1 = vsel %vm677_vm3, %v720_v53, %v724_v25  ;;  %v760_v7 = vrot.slane %v758_v55, 1  ;;  %v549_v12 = vor.u32 %v547_v38, %v546_v56  ;;  %v7366_v13 = vsel %vm7226_vm2, %v546_v56, 0  ;;  %v6569_v25 = vld [vmem:[%s10087_s2 + $0x30] sm:$0xff]   ;;  %v6570_v55 = vld [vmem:[%s10087_s2 + $0x68] sm:$0xff]   ;;  %1235 = vmatprep.subr.bf16.mxu0 %v10096_v0 }
  0x73   : > { %876 = vrot.lane.b32.xlu1 %v725_v1, %s7009_s16  ;;  %v732_v10 = vor.u32 %v731_v59, %v727_v45  ;;  %v556_v14 = vor.u32 %v554_v63, %v553_v61  ;;  %884 = vrot.lane.b32.xlu0 %v773_v29, %s7009_s16  ;;  %v755_v16 = vrot.slane %v753_v6, 1  ;;  %v782_v17 = vshll.u32 %v7366_v13, 16 }
  0x74   : > { %v7373_v18 = vsel %vm7226_vm2, %v553_v61, 0  ;;  %v558_v19 = vshrl.u32 %v7335_v44, 16  ;;  %v7380_v21 = vsel %vm7226_vm2, 0, %v549_v12  ;;  %v561_v43 = vshll.u32 %v7335_v44, 16  ;;  %1462 = vmatpush1.bf16.msra.mxu1 %v6569_v25  ;;  %v6572_v25 = vld [vmem:[%s10087_s2 + $0x60] sm:$0xff]  }
  0x75   : > { %v737_v20 = vsel %vm677_vm3, %v732_v10, %v736_v54  ;;  %v7384_v22 = vsel %vm7226_vm2, 0, %v556_v14  ;;  %v794_v23 = vshll.u32 %v7373_v18, 16  ;;  %v756_v27 = vor.u32 %v755_v16, %v751_v5  ;;  %1463 = vmatprep.subr.bf16.mxu1 %v10096_v0  ;;  %v6574_v16 = vld [vmem:[%s10087_s2 + $0x20] sm:$0xff]   ;;  %1236 = vmatpush1.bf16.msra.mxu0 %v6570_v55 }
  0x76   : > { %v775_v28 = vshrl.u32 %v7380_v21, 16  ;;  %v777_v29 = vshll.u32 %v7380_v21, 16  ;;  %v784_v30 = vrot.slane %v782_v17, 1  ;;  %v787_v34 = vshrl.u32 %v7384_v22, 16  ;;  %1237 = vmatprep.subr.bf16.mxu0 %v10096_v0 }
  0x77   : > { %878 = vrot.lane.b32.xlu1 %v737_v20, %s7009_s16  ;;  %v789_v36 = vshll.u32 %v7384_v22, 16  ;;  %v796_v37 = vrot.slane %v794_v23, 1  ;;  %v560_v38 = vrot.slane %v558_v19, 7  ;;  %870 = vrot.lane.b32.xlu0 %v7295_v62, %s7009_s16  ;;  %v761_v39 = vsel %vm677_vm3, %v756_v27, %v760_v7 }
  0x78   : > { %v779_v42 = vrot.slane %v777_v29, 1  ;;  %v565_v45 = vshrl.u32 %v6564_v8, 16  ;;  %v568_v53 = vshll.u32 %v6564_v8, 16  ;;  %v572_v54 = vshrl.u32 %v6568_v15, 16  ;;  %1464 = vmatpush1.bf16.msra.mxu1 %v6571_v47 }
  0x79   : > { %v791_v49 = vrot.slane %v789_v36, 1  ;;  %v7409_v52 = vsel %vm7226_vm2, %v560_v38, 0  ;;  %v563_v56 = vor.u32 %v561_v43, %v560_v38  ;;  %v575_v1 = vshll.u32 %v6568_v15, 16  ;;  %1465 = vmatprep.subr.bf16.mxu1 %v10096_v0  ;;  %1238 = vmatpush1.bf16.msra.mxu0 %v6572_v25  ;;  %v6581_v25 = vld [vmem:[%s10087_s2 + $0x8] sm:$0xff]  }
  0x7a   : > { %v780_v44 = vor.u32 %v779_v42, %v775_v28  ;;  %v806_v58 = vshll.u32 %v7409_v52, 16  ;;  %v567_v59 = vrot.slane %v565_v45, 7  ;;  %v574_v63 = vrot.slane %v572_v54, 7  ;;  %v6576_v45 = vld [vmem:[%s10087_s2 + $0x18] sm:$0xff]   ;;  %1247 = vmatprep.subr.bf16.mxu0 %v10096_v0 }
  0x7b   : > { %882 = vrot.lane.b32.xlu1 %v761_v39, %s7009_s16  ;;  %v792_v61 = vor.u32 %v791_v49, %v787_v34  ;;  %v7420_v6 = vsel %vm7226_vm2, 0, %v563_v56  ;;  %v579_v36 = vshrl.u32 %v6573_v9, 16  ;;  %v6575_v49 = vld [vmem:[%s10087_s2 + $0xb8] sm:$0xff]   ;;  %vm934_vm4 = vcmask 1046528  }
  0x7c   : > { %v785_v5 = vsel %vm677_vm3, %v780_v44, %v784_v30  ;;  %v808_v7 = vrot.slane %v806_v58, 1  ;;  %v570_v8 = vor.u32 %v568_v53, %v567_v59  ;;  %v799_v12 = vshrl.u32 %v7420_v6, 16  ;;  %1466 = vmatpush1.bf16.msra.mxu1 %v6574_v16 }
  0x7d   : > { %v797_v10 = vsel %vm677_vm3, %v792_v61, %v796_v37  ;;  %v801_v14 = vshll.u32 %v7420_v6, 16  ;;  %v7429_v15 = vsel %vm7226_vm2, %v567_v59, 0  ;;  %v577_v20 = vor.u32 %v575_v1, %v574_v63  ;;  %1467 = vmatprep.subr.bf16.mxu1 %v10096_v0  ;;  %v6578_v59 = vld [vmem:[%s7217_s19 + $0x68] sm:$0xff]   ;;  %1248 = vmatpush2.bf16.msra.mxu0 %v6575_v49 }
  0x7e   : > { %v7436_v17 = vsel %vm7226_vm2, 0, %v570_v8  ;;  %v818_v19 = vshll.u32 %v7429_v15, 16  ;;  %v7441_v23 = vsel %vm7226_vm2, %v574_v63, 0  ;;  %v582_v37 = vshll.u32 %v6573_v9, 16  ;;  %1249 = vmatprep.subr.bf16.mxu0 %v10096_v0 }
  0x7f   : > { %886 = vrot.lane.b32.xlu1 %v785_v5, %s7009_s16  ;;  %v803_v27 = vrot.slane %v801_v14, 1  ;;  %v811_v28 = vshrl.u32 %v7436_v17, 16  ;;  %v813_v29 = vshll.u32 %v7436_v17, 16  ;;  %v830_v30 = vshll.u32 %v7441_v23, 16  ;;  %v6579_v5 = vld [vmem:[%s10087_s2 + $0x10] sm:$0xff]  }
  0x80   : > { %v820_v32 = vrot.slane %v818_v19, 1  ;;  %v7453_v34 = vsel %vm7226_vm2, 0, %v577_v20  ;;  %v581_v47 = vrot.slane %v579_v36, 7  ;;  %1468 = vmatpush1.bf16.msra.mxu1 %v6576_v45  ;;  %v586_v8 = vshrl.u32 %v6578_v59, 16  ;;  %v6577_v19 = vld [vmem:[%s10087_s2 + $0xb0] sm:$0xff]  }
  0x81   : > { %v804_v38 = vor.u32 %v803_v27, %v799_v12  ;;  %v815_v39 = vrot.slane %v813_v29, 1  ;;  %v823_v42 = vshrl.u32 %v7453_v34, 16  ;;  %v825_v43 = vshll.u32 %v7453_v34, 16  ;;  %1469 = vmatprep.subr.bf16.mxu1 %v10096_v0  ;;  %1250 = vmatpush2.bf16.msra.mxu0 %v6577_v19 }
  0x82   : > { %v832_v44 = vrot.slane %v830_v30, 1  ;;  %v584_v56 = vor.u32 %v582_v37, %v581_v47  ;;  %v7470_v58 = vsel %vm7226_vm2, %v581_v47, 0  ;;  %v589_v9 = vshll.u32 %v6578_v59, 16  ;;  %v6580_v37 = vld [vmem:[%s10087_s2 + $0xa8] sm:$0xff]   ;;  %1251 = vmatprep.subr.bf16.mxu0 %v10096_v0 }
  0x83   : > { %888 = vrot.lane.b32.xlu1 %v797_v10, %s7009_s16  ;;  %v809_v53 = vsel %vm677_vm3, %v804_v38, %v808_v7  ;;  %v816_v54 = vor.u32 %v815_v39, %v811_v28  ;;  %v827_v55 = vrot.slane %v825_v43, 1  ;;  %v842_v1 = vshll.u32 %v7470_v58, 16  ;;  %v6583_v28 = vld [vmem:[%s7217_s19 + $0x70] sm:$0xff]  }
  0x84   : > { %890 = vrot.lane.b32.xlu0 %v809_v53, %s7009_s16  ;;  %v7481_v7 = vsel %vm7226_vm2, 0, %v584_v56  ;;  %v588_v20 = vrot.slane %v586_v8, 7  ;;  %1470 = vmatpush1.bf16.msra.mxu1 %v6579_v5  ;;  %v593_v38 = vshrl.u32 %v6583_v28, 16  ;;  %v596_v39 = vshll.u32 %v6583_v28, 16  ;;  %v6582_v53 = vld [vmem:[%s10087_s2 + $0xa0] sm:$0xff]  }
  0x85   : > { %v821_v61 = vsel %vm677_vm3, %v816_v54, %v820_v32  ;;  %v828_v63 = vor.u32 %v827_v55, %v823_v42  ;;  %v835_v12 = vshrl.u32 %v7481_v7, 16  ;;  %v837_v14 = vshll.u32 %v7481_v7, 16  ;;  %1471 = vmatprep.subr.bf16.mxu1 %v10096_v0  ;;  %v6584_v54 = vld [vmem:[%s10087_s2] sm:$0xff]   ;;  %1252 = vmatpush2.bf16.msra.mxu0 %v6580_v37 }
  0x86   : > { %v844_v16 = vrot.slane %v842_v1, 1  ;;  %v591_v29 = vor.u32 %v589_v9, %v588_v20  ;;  %v7499_v30 = vsel %vm7226_vm2, %v588_v20, 0  ;;  %v595_v55 = vrot.slane %v593_v38, 7  ;;  %1253 = vmatprep.subr.bf16.mxu0 %v10096_v0 }
  0x87   : > { %892 = vrot.lane.b32.xlu1 %v821_v61, %s7009_s16  ;;  %v833_v10 = vsel %vm677_vm3, %v828_v63, %v832_v44  ;;  %v839_v27 = vrot.slane %v837_v14, 1  ;;  %10288 = vst [vmem:[#allocation12_spill] sm:$0xff] %v7499_v30  ;;  %v854_v36 = vshll.u32 %v7499_v30, 16  ;;  %v938_v44 = vrot.slane %v7257_v33, 1  ;;  %v6587_v61 = vld [vmem:[%s7217_s19 + $0x78] sm:$0xff]   ;;  %s6940_s19 = scalar_lea.vmem %s6939_s26, 8192 }
  0x88   : > { %894 = vrot.lane.b32.xlu0 %v833_v10, %s7009_s16  ;;  %v7508_v42 = vsel %vm7226_vm2, 0, %v591_v29  ;;  %1472 = vmatpush1.bf16.msra.mxu1 %v6581_v25  ;;  %v939_v56 = vrot.slane %v7248_v26, 1  ;;  %vm983_vm5 = vcmask 523264   ;;  %v598_v63 = vor.u32 %v596_v39, %v595_v55  ;;  %v6586_v26 = vld [vmem:[%s10087_s2 + $0x58] sm:$0xff]   ;;  %v6588_v25 = vld [vmem:[%s10087_s2 + $0x50] sm:$0xff]  }
  0x89   : > { %v840_v32 = vor.u32 %v839_v27, %v835_v12  ;;  %v847_v45 = vshrl.u32 %v7508_v42, 16  ;;  %v849_v47 = vshll.u32 %v7508_v42, 16  ;;  %v856_v49 = vrot.slane %v854_v36, 1  ;;  %1473 = vmatprep.subr.bf16.mxu1 %v10096_v0  ;;  %1254 = vmatpush2.bf16.msra.mxu0 %v6582_v53  ;;  %v313_v53 = vld [vmem:[%s7210_s15 + $0x8] sm:$0xff]  }
  0x8a   : > { %v7528_v1 = vsel %vm7226_vm2, %v595_v55, 0  ;;  %v7531_v5 = vsel %vm934_vm4, %v938_v44, %v939_v56  ;;  %v600_v10 = vshrl.u32 %v6587_v61, 16  ;;  %v7541_v12 = vsel %vm7226_vm2, 0, %v598_v63  ;;  %1717 = vmatprep.subr.bf16.mxu0 %v10096_v0  ;;  %v315_v56 = vld [vmem:[%s7210_s15 + $0x10] sm:$0xff]  }
  0x8b   : > { %v845_v43 = vsel %vm677_vm3, %v840_v32, %v844_v16  ;;  %v851_v59 = vrot.slane %v849_v47, 1  ;;  %10289 = vst [vmem:[#allocation13_spill] sm:$0xff] %v7528_v1  ;;  %v866_v9 = vshll.u32 %v7528_v1, 16  ;;  %5682 = vmatprep.mubr.msk.bf16.mxu0 %vm983_vm5, %v7531_v5  ;;  %10290 = vst [vmem:[#allocation14_spill] sm:$0xff] %v7541_v12  ;;  %v603_v14 = vshll.u32 %v6587_v61, 16 }
  0x8c   : > { %896 = vrot.lane.b32.xlu1 %v845_v43, %s7009_s16  ;;  %1474 = vmatpush1.bf16.msra.mxu1 %v6584_v54  ;;  %v859_v19 = vshrl.u32 %v7541_v12, 16  ;;  %v861_v20 = vshll.u32 %v7541_v12, 16  ;;  %v602_v28 = vrot.slane %v600_v10, 7  ;;  %v935_v32 = vrot.slane %v7232_v3, 1 }
  0x8d   : > { %v852_v8 = vor.u32 %v851_v59, %v847_v45  ;;  %1483 = vmatprep.subr.bf16.mxu1 %v10096_v0  ;;  %v868_v27 = vrot.slane %v866_v9, 1  ;;  %v936_v38 = vrot.slane %v7236_v4, 1  ;;  %v6589_v4 = vld [vmem:[%s10087_s2 + $0x48] sm:$0xff]   ;;  %v317_v59 = vld [vmem:[%s7210_s15 + $0x18] sm:$0xff]   ;;  %v2040_v10 = vshll.u32 %v313_v53, 16 }
  0x8e   : > { %v863_v29 = vrot.slane %v861_v20, 1  ;;  %v605_v36 = vor.u32 %v603_v14, %v602_v28  ;;  %v7556_v37 = vsel %vm7226_vm2, %v602_v28, 0  ;;  %v2051_v20 = vshrl.u32 %v317_v59, 16 }
  0x8f   : > { %v857_v16 = vsel %vm677_vm3, %v852_v8, %v856_v49  ;;  %10291 = vst [vmem:[#allocation15_spill] sm:$0xff] %v7556_v37  ;;  %v1064_v43 = vshll.u32 %v7556_v37, 16  ;;  %v7565_v47 = vsel %vm934_vm4, %v935_v32, %v936_v38  ;;  %v311_v49 = vld [vmem:[%s7210_s15] sm:$0xff]   ;;  %v2047_v28 = vshll.u32 %v315_v56, 16 }
  0x90   : > { %898 = vrot.lane.b32.xlu0 %v857_v16, %s7009_s16  ;;  %1484 = vmatpush2.bf16.msra.mxu1 %v6586_v26  ;;  %v864_v39 = vor.u32 %v863_v29, %v859_v19  ;;  %v7562_v45 = vsel %vm7226_vm2, 0, %v605_v36  ;;  %v2030_v8 = vshrl.u32 %v311_v49, 16  ;;  %v2033_v9 = vshll.u32 %v311_v49, 16  ;;  %v6591_v16 = vld [vmem:[%s10087_s2 + $0x40] sm:$0xff]  }
  0x91   : > { %1485 = vmatprep.subr.bf16.mxu1 %v10096_v0  ;;  %10292 = vst [vmem:[#allocation16_spill] sm:$0xff] %v7562_v45  ;;  %v1057_v55 = vshrl.u32 %v7562_v45, 16  ;;  %v1059_v44 = vshll.u32 %v7562_v45, 16  ;;  %5710 = vmatprep.mubr.msk.bf16.mxu1 %vm983_vm5, %v7565_v47  ;;  %v1066_v63 = vrot.slane %v1064_v43, 1  ;;  %v2037_v26 = vshrl.u32 %v313_v53, 16  ;;  %v7594_v53 = vld [vmem:[%s10088_s3 + $0x58] sm:$0xff]  }
  0x92   : > { %v869_v54 = vsel %vm677_vm3, %v864_v39, %v868_v27  ;;  %v2044_v19 = vshrl.u32 %v315_v56, 16  ;;  %v2054_v36 = vshll.u32 %v317_v59, 16  ;;  %vm2524_vm6 = vcmask 261120  }
  0x93   : > { %900 = vrot.lane.b32.xlu1 %v869_v54, %s7009_s16  ;;  %v1061_v61 = vrot.slane %v1059_v44, 1  ;;  %v2039_v27 = vrot.slane %v2037_v26, 7  ;;  %vm2675_vm7 = vcmask 785408  }
  0x94   : > { %1486 = vmatpush2.bf16.msra.mxu1 %v6588_v25  ;;  %v2032_v25 = vrot.slane %v2030_v8, 7  ;;  %v2046_v32 = vrot.slane %v2044_v19, 7  ;;  %v319_v8 = vld [vmem:[%s7210_s15 + $0x20] sm:$0xff]  }
  0x95   : > { %1487 = vmatprep.subr.bf16.mxu1 %v10096_v0  ;;  %v1062_v14 = vor.u32 %v1061_v61, %v1057_v55  ;;  %v2042_v43 = vor.u32 %v2040_v10, %v2039_v27  ;;  %v2190_v49 = vsel %vm7226_vm2, %v2039_v27, 0  ;;  %v2058_v1 = vshrl.u32 %v319_v8, 16 }
  0x96   : > { %v2035_v38 = vor.u32 %v2033_v9, %v2032_v25  ;;  %v2189_v39 = vsel %vm7226_vm2, %v2032_v25, 0  ;;  %v2225_v55 = vshll.u32 %v2190_v49, 16  ;;  %v2451_v61 = vrot.slane %v2190_v49, 1 }
  0x97   : > { %v1067_v29 = vsel %vm677_vm3, %v1062_v14, %v1066_v63  ;;  %v2213_v54 = vshll.u32 %v2189_v39, 16  ;;  %v2448_v44 = vrot.slane %v2189_v39, 1  ;;  %v7602_v59 = vsel %vm7226_vm2, 0, %v2042_v43 }
  0x98   : > { %1488 = vmatpush2.bf16.msra.mxu1 %v6589_v4  ;;  %1068 = vrot.lane.b32.xlu0 %v1067_v29, %s7009_s16  ;;  %v2053_v4 = vrot.slane %v2051_v20, 7  ;;  %v7598_v56 = vsel %vm7226_vm2, 0, %v2035_v38  ;;  %10294 = vst [vmem:[#allocation18_spill] sm:$0xff] %v7602_v59  ;;  %v2049_v63 = vor.u32 %v2047_v28, %v2046_v32  ;;  %v2191_v14 = vsel %vm7226_vm2, %v2046_v32, 0 }
  0x99   : > { %1489 = vmatprep.subr.bf16.mxu1 %v10096_v0  ;;  %10293 = vst [vmem:[#allocation17_spill] sm:$0xff] %v7598_v56  ;;  %v2206_v9 = vshrl.u32 %v7598_v56, 16  ;;  %v2208_v26 = vshll.u32 %v7598_v56, 16  ;;  %v2215_v10 = vrot.slane %v2213_v54, 1  ;;  %v2220_v19 = vshll.u32 %v7602_v59, 16 }
  0x9a   : > { %v2227_v20 = vrot.slane %v2225_v55, 1  ;;  %v2447_v25 = vrot.slane %v7598_v56, 1  ;;  %v2450_v28 = vrot.slane %v7602_v59, 1  ;;  %v7616_v29 = vsel %vm7226_vm2, 0, %v2049_v63  ;;  %v323_v56 = vld [vmem:[%s7210_s15 + $0x30] sm:$0xff]  }
  0x9b   : > { %v2210_v27 = vrot.slane %v2208_v26, 1  ;;  %v2056_v38 = vor.u32 %v2054_v36, %v2053_v4  ;;  %v2222_v39 = vrot.slane %v2220_v19, 1  ;;  %v2237_v43 = vshll.u32 %v2191_v14, 16 }
  0x9c   : > { %1490 = vmatpush2.bf16.msra.mxu1 %v6591_v16  ;;  %v2218_v16 = vshrl.u32 %v7602_v59, 16  ;;  %v2230_v32 = vshrl.u32 %v7616_v29, 16  ;;  %v2232_v54 = vshll.u32 %v7616_v29, 16  ;;  %v2192_v0 = vsel %vm7226_vm2, %v2053_v4, 0 }
  0x9d   : > { %6147 = vmatprep.subr.bf16.mxu1 %v7594_v53  ;;  %v2211_v49 = vor.u32 %v2210_v27, %v2206_v9  ;;  %v7622_v55 = vsel %vm7226_vm2, 0, %v2056_v38  ;;  %v2249_v27 = vshll.u32 %v2192_v0, 16  ;;  %v2449_v38 = vsel %vm934_vm4, %v2447_v25, %v2448_v44 }
  0x9e   : > { %v2223_v26 = vor.u32 %v2222_v39, %v2218_v16  ;;  %v2242_v63 = vshrl.u32 %v7622_v55, 16  ;;  %v2244_v36 = vshll.u32 %v7622_v55, 16  ;;  %v2234_v19 = vrot.slane %v2232_v54, 1  ;;  %v321_v39 = vld [vmem:[%s7210_s15 + $0x28] sm:$0xff]  }
  0x9f   : > { %v2216_v9 = vsel %vm677_vm3, %v2211_v49, %v2215_v10  ;;  %v2452_v4 = vsel %vm934_vm4, %v2450_v28, %v2451_v61  ;;  %v2239_v45 = vrot.slane %v2237_v43, 1  ;;  %v2251_v10 = vrot.slane %v2249_v27, 1 }
  0xa0   : > { %2387 = vrot.lane.b32.xlu1 %v2216_v9, %s7010_s7  ;;  %v2228_v59 = vsel %vm677_vm3, %v2223_v26, %v2227_v20  ;;  %v2246_v16 = vrot.slane %v2244_v36, 1  ;;  %v2235_v37 = vor.u32 %v2234_v19, %v2230_v32  ;;  %v2453_v54 = vrot.slane %v7616_v29, 1  ;;  %v325_v9 = vld [vmem:[%s7210_s15 + $0x38] sm:$0xff]  }
  0xa1   : > { %2389 = vrot.lane.b32.xlu0 %v2228_v59, %s7010_s7  ;;  %v2061_v12 = vshll.u32 %v319_v8, 16  ;;  %v2454_v30 = vrot.slane %v2191_v14, 1  ;;  %v2456_v20 = vrot.slane %v7622_v55, 1  ;;  %v2457_v44 = vrot.slane %v2192_v0, 1 }
  0xa2   : > { %v2247_v49 = vor.u32 %v2246_v16, %v2242_v63  ;;  %v2060_v25 = vrot.slane %v2058_v1, 7  ;;  %v2240_v59 = vsel %vm677_vm3, %v2235_v37, %v2239_v45  ;;  %v2065_v28 = vshrl.u32 %v321_v39, 16 }
  0xa3   : > { %v2068_v43 = vshll.u32 %v321_v39, 16  ;;  %v2072_v26 = vshrl.u32 %v323_v56, 16  ;;  %v2075_v36 = vshll.u32 %v323_v56, 16  ;;  %v2455_v0 = vsel %vm934_vm4, %v2453_v54, %v2454_v30 }
  0xa4   : > { %2494 = vrot.lane.b32.xlu1 %v2449_v38, %s7009_s16  ;;  %v2252_v61 = vsel %vm677_vm3, %v2247_v49, %v2251_v10  ;;  %v2063_v32 = vor.u32 %v2061_v12, %v2060_v25  ;;  %v2193_v8 = vsel %vm7226_vm2, %v2060_v25, 0  ;;  %v2067_v63 = vrot.slane %v2065_v28, 7 }
  0xa5   : > { %2496 = vrot.lane.b32.xlu0 %v2452_v4, %s7009_s16  ;;  %v2261_v14 = vshll.u32 %v2193_v8, 16  ;;  %v2074_v37 = vrot.slane %v2072_v26, 7  ;;  %v2458_v12 = vsel %vm934_vm4, %v2456_v20, %v2457_v44  ;;  %v2079_v16 = vshrl.u32 %v325_v9, 16  ;;  %v329_v26 = vld [vmem:[%s7210_s15 + $0x48] sm:$0xff]  }
  0xa6   : > { %v7649_v1 = vsel %vm7226_vm2, 0, %v2063_v32  ;;  %v2070_v27 = vor.u32 %v2068_v43, %v2067_v63  ;;  %v2194_v56 = vsel %vm7226_vm2, %v2067_v63, 0  ;;  %v2460_v25 = vrot.slane %v2193_v8, 1 }
  0xa7   : > { %10295 = vst [vmem:[#allocation19_spill] sm:$0xff] %v7649_v1  ;;  %v2254_v45 = vshrl.u32 %v7649_v1, 16  ;;  %v2256_v19 = vshll.u32 %v7649_v1, 16  ;;  %v2077_v38 = vor.u32 %v2075_v36, %v2074_v37  ;;  %v7659_v30 = vsel %vm7226_vm2, %v2074_v37, 0 }
  0xa8   : > { %2391 = vrot.lane.b32.xlu1 %v2240_v59, %s7010_s7  ;;  %v2263_v4 = vrot.slane %v2261_v14, 1  ;;  %v7663_v10 = vsel %vm7226_vm2, 0, %v2070_v27  ;;  %v2273_v49 = vshll.u32 %v2194_v56, 16  ;;  %v2459_v44 = vrot.slane %v7649_v1, 1  ;;  %v327_v59 = vld [vmem:[%s7210_s15 + $0x40] sm:$0xff]  }
  0xa9   : > { %2393 = vrot.lane.b32.xlu0 %v2252_v61, %s7010_s7  ;;  %v2258_v39 = vrot.slane %v2256_v19, 1  ;;  %v2266_v54 = vshrl.u32 %v7663_v10, 16  ;;  %v2268_v20 = vshll.u32 %v7663_v10, 16  ;;  %v7673_v28 = vsel %vm7226_vm2, 0, %v2077_v38 }
  0xaa   : > { %v2285_v43 = vshll.u32 %v7659_v30, 16  ;;  %v2082_v32 = vshll.u32 %v325_v9, 16  ;;  %v2275_v63 = vrot.slane %v2273_v49, 1  ;;  %v2278_v36 = vshrl.u32 %v7673_v28, 16 }
  0xab   : > { %v2259_v61 = vor.u32 %v2258_v39, %v2254_v45  ;;  %v2270_v14 = vrot.slane %v2268_v20, 1  ;;  %v2462_v37 = vrot.slane %v7663_v10, 1  ;;  %v2081_v45 = vrot.slane %v2079_v16, 7 }
  0xac   : > { %2498 = vrot.lane.b32.xlu1 %v2455_v0, %s7009_s16  ;;  %v2280_v0 = vshll.u32 %v7673_v28, 16  ;;  %v2461_v27 = vsel %vm934_vm4, %v2459_v44, %v2460_v25  ;;  %v2287_v9 = vrot.slane %v2285_v43, 1  ;;  %v2086_v44 = vshrl.u32 %v327_v59, 16 }
  0xad   : > { %2500 = vrot.lane.b32.xlu0 %v2458_v12, %s7009_s16  ;;  %v2264_v8 = vsel %vm677_vm3, %v2259_v61, %v2263_v4  ;;  %v2463_v12 = vrot.slane %v2194_v56, 1  ;;  %v2271_v19 = vor.u32 %v2270_v14, %v2266_v54  ;;  %v2084_v39 = vor.u32 %v2082_v32, %v2081_v45 }
  0xae   : > { %v2282_v38 = vrot.slane %v2280_v0, 1  ;;  %v2196_v49 = vsel %vm7226_vm2, %v2081_v45, 0  ;;  %v2465_v54 = vrot.slane %v7673_v28, 1  ;;  %v2466_v43 = vrot.slane %v7659_v30, 1 }
  0xaf   : > { %v2276_v20 = vsel %vm677_vm3, %v2271_v19, %v2275_v63  ;;  %v2297_v4 = vshll.u32 %v2196_v49, 16  ;;  %v2464_v56 = vsel %vm934_vm4, %v2462_v37, %v2463_v12  ;;  %v7690_v16 = vsel %vm7226_vm2, 0, %v2084_v39 }
  0xb0   : > { %2395 = vrot.lane.b32.xlu1 %v2264_v8, %s7010_s7  ;;  %v2283_v1 = vor.u32 %v2282_v38, %v2278_v36  ;;  %10296 = vst [vmem:[#allocation20_spill] sm:$0xff] %v7690_v16  ;;  %v2290_v25 = vshrl.u32 %v7690_v16, 16  ;;  %v2292_v61 = vshll.u32 %v7690_v16, 16  ;;  %v2469_v32 = vrot.slane %v2196_v49, 1  ;;  %v331_v8 = vld [vmem:[%s7210_s15 + $0x50] sm:$0xff]  }
  0xb1   : > { %2397 = vrot.lane.b32.xlu0 %v2276_v20, %s7010_s7  ;;  %v2088_v63 = vrot.slane %v2086_v44, 7  ;;  %v2089_v36 = vshll.u32 %v327_v59, 16  ;;  %v2093_v0 = vshrl.u32 %v329_v26, 16  ;;  %v2299_v12 = vrot.slane %v2297_v4, 1 }
  0xb2   : > { %v2288_v14 = vsel %vm677_vm3, %v2283_v1, %v2287_v9  ;;  %v2294_v37 = vrot.slane %v2292_v61, 1  ;;  %v2468_v45 = vrot.slane %v7690_v16, 1  ;;  %v2096_v19 = vshll.u32 %v329_v26, 16 }
  0xb3   : > { %v2197_v38 = vsel %vm7226_vm2, %v2088_v63, 0  ;;  %v2095_v39 = vrot.slane %v2093_v0, 7  ;;  %v2467_v30 = vsel %vm934_vm4, %v2465_v54, %v2466_v43  ;;  %v333_v43 = vld [vmem:[%s7210_s15 + $0x58] sm:$0xff]  }
  0xb4   : > { %2502 = vrot.lane.b32.xlu1 %v2461_v27, %s7009_s16  ;;  %v2091_v27 = vor.u32 %v2089_v36, %v2088_v63  ;;  %v2295_v1 = vor.u32 %v2294_v37, %v2290_v25  ;;  %v2309_v59 = vshll.u32 %v2197_v38, 16  ;;  %v2470_v54 = vsel %vm934_vm4, %v2468_v45, %v2469_v32 }
  0xb5   : > { %2504 = vrot.lane.b32.xlu0 %v2464_v56, %s7009_s16  ;;  %v2098_v26 = vor.u32 %v2096_v19, %v2095_v39  ;;  %v2198_v49 = vsel %vm7226_vm2, %v2095_v39, 0  ;;  %v2472_v19 = vrot.slane %v2197_v38, 1  ;;  %v2103_v32 = vshll.u32 %v331_v8, 16 }
  0xb6   : > { %v7707_v9 = vsel %vm7226_vm2, 0, %v2091_v27  ;;  %v2300_v4 = vsel %vm677_vm3, %v2295_v1, %v2299_v12  ;;  %v2321_v61 = vshll.u32 %v2198_v49, 16  ;;  %v2311_v36 = vrot.slane %v2309_v59, 1 }
  0xb7   : > { %10297 = vst [vmem:[#allocation21_spill] sm:$0xff] %v7707_v9  ;;  %v2302_v56 = vshrl.u32 %v7707_v9, 16  ;;  %v2304_v44 = vshll.u32 %v7707_v9, 16  ;;  %v7719_v25 = vsel %vm7226_vm2, 0, %v2098_v26  ;;  %v2471_v12 = vrot.slane %v7707_v9, 1 }
  0xb8   : > { %2399 = vrot.lane.b32.xlu1 %v2288_v14, %s7010_s7  ;;  %10298 = vst [vmem:[#allocation22_spill] sm:$0xff] %v7719_v25  ;;  %v335_v14 = vld [vmem:[%s7210_s15 + $0x60] sm:$0xff]   ;;  %v2314_v0 = vshrl.u32 %v7719_v25, 16  ;;  %v2316_v37 = vshll.u32 %v7719_v25, 16  ;;  %v2100_v27 = vshrl.u32 %v331_v8, 16  ;;  %v2323_v1 = vrot.slane %v2321_v61, 1 }
  0xb9   : > { %2401 = vrot.lane.b32.xlu0 %v2300_v4, %s7010_s7  ;;  %v2306_v63 = vrot.slane %v2304_v44, 1  ;;  %v2474_v26 = vrot.slane %v7719_v25, 1  ;;  %v2107_v20 = vshrl.u32 %v333_v43, 16  ;;  %v2110_v16 = vshll.u32 %v333_v43, 16 }
  0xba   : > { %v2318_v39 = vrot.slane %v2316_v37, 1  ;;  %v2102_v4 = vrot.slane %v2100_v27, 7  ;;  %v942_v27 = vrot.slane %v7253_v31, 1 }
  0xbb   : > { %v2307_v45 = vor.u32 %v2306_v63, %v2302_v56  ;;  %v2114_v56 = vshrl.u32 %v335_v14, 16  ;;  %v2109_v37 = vrot.slane %v2107_v20, 7 }
  0xbc   : > { %2506 = vrot.lane.b32.xlu1 %v2467_v30, %s7009_s16  ;;  %v2475_v30 = vrot.slane %v2198_v49, 1  ;;  %v2319_v44 = vor.u32 %v2318_v39, %v2314_v0  ;;  %v2105_v38 = vor.u32 %v2103_v32, %v2102_v4  ;;  %v2199_v8 = vsel %vm7226_vm2, %v2102_v4, 0  ;;  %v337_v49 = vld [vmem:[%s7210_s15 + $0x68] sm:$0xff]  }
  0xbd   : > { %2508 = vrot.lane.b32.xlu0 %v2470_v54, %s7009_s16  ;;  %v2312_v59 = vsel %vm677_vm3, %v2307_v45, %v2311_v36  ;;  %v2473_v54 = vsel %vm934_vm4, %v2471_v12, %v2472_v19  ;;  %v2333_v63 = vshll.u32 %v2199_v8, 16  ;;  %v2116_v36 = vrot.slane %v2114_v56, 7 }
  0xbe   : > { %v2324_v61 = vsel %vm677_vm3, %v2319_v44, %v2323_v1  ;;  %v7740_v43 = vsel %vm7226_vm2, 0, %v2105_v38  ;;  %v2117_v0 = vshll.u32 %v335_v14, 16  ;;  %v2476_v32 = vsel %vm934_vm4, %v2474_v26, %v2475_v30 }
  0xbf   : > { %10299 = vst [vmem:[#allocation23_spill] sm:$0xff] %v7740_v43  ;;  %v2326_v45 = vshrl.u32 %v7740_v43, 16  ;;  %v2328_v39 = vshll.u32 %v7740_v43, 16  ;;  %v2112_v12 = vor.u32 %v2110_v16, %v2109_v37  ;;  %v2200_v31 = vsel %vm7226_vm2, %v2109_v37, 0 }
  0xc0   : > { %2403 = vrot.lane.b32.xlu1 %v2312_v59, %s7010_s7  ;;  %v2119_v20 = vor.u32 %v2117_v0, %v2116_v36  ;;  %v7750_v19 = vsel %vm7226_vm2, %v2116_v36, 0  ;;  %v2335_v14 = vrot.slane %v2333_v63, 1  ;;  %v2345_v30 = vshll.u32 %v2200_v31, 16  ;;  %v339_v63 = vld [vmem:[%s7210_s15 + $0x70] sm:$0xff]  }
  0xc1   : > { %2405 = vrot.lane.b32.xlu0 %v2324_v61, %s7010_s7  ;;  %v2330_v1 = vrot.slane %v2328_v39, 1  ;;  %v7754_v26 = vsel %vm7226_vm2, 0, %v2112_v12  ;;  %v2477_v59 = vrot.slane %v7740_v43, 1  ;;  %v2478_v44 = vrot.slane %v2199_v8, 1 }
  0xc2   : > { %v2338_v16 = vshrl.u32 %v7754_v26, 16  ;;  %v2340_v4 = vshll.u32 %v7754_v26, 16  ;;  %v2481_v56 = vrot.slane %v2200_v31, 1  ;;  %v7762_v61 = vsel %vm7226_vm2, 0, %v2119_v20  ;;  %v341_v31 = vld [vmem:[%s7210_s15 + $0x78] sm:$0xff]  }
  0xc3   : > { %v2331_v38 = vor.u32 %v2330_v1, %v2326_v45  ;;  %v2347_v36 = vrot.slane %v2345_v30, 1  ;;  %v2350_v0 = vshrl.u32 %v7762_v61, 16  ;;  %v2480_v12 = vrot.slane %v7754_v26, 1 }
  0xc4   : > { %2510 = vrot.lane.b32.xlu1 %v2473_v54, %s7009_s16  ;;  %v2357_v54 = vshll.u32 %v7750_v19, 16  ;;  %v2342_v37 = vrot.slane %v2340_v4, 1  ;;  %v2121_v8 = vshrl.u32 %v337_v49, 16  ;;  %v2124_v45 = vshll.u32 %v337_v49, 16 }
  0xc5   : > { %2512 = vrot.lane.b32.xlu0 %v2476_v32, %s7009_s16  ;;  %v2352_v32 = vshll.u32 %v7762_v61, 16  ;;  %v2336_v39 = vsel %vm677_vm3, %v2331_v38, %v2335_v14  ;;  %v2479_v30 = vsel %vm934_vm4, %v2477_v59, %v2478_v44  ;;  %v6585_v14 = vld [vmem:[%s10087_s2 + $0xf8] sm:$0xff]   ;;  %v10300_v38 = vrot.slane %v7264_v40, 1 }
  0xc6   : > { %v2343_v43 = vor.u32 %v2342_v37, %v2338_v16  ;;  %v2359_v25 = vrot.slane %v2357_v54, 1  ;;  %v2123_v9 = vrot.slane %v2121_v8, 7  ;;  %v2482_v16 = vsel %vm934_vm4, %v2480_v12, %v2481_v56 }
  0xc7   : > { %v2354_v4 = vrot.slane %v2352_v32, 1  ;;  %v7781_v49 = vsel %vm934_vm4, %v10300_v38, %v942_v27  ;;  %v2128_v44 = vshrl.u32 %v339_v63, 16  ;;  %v2483_v32 = vrot.slane %v7762_v61, 1 }
  0xc8   : > { %2407 = vrot.lane.b32.xlu1 %v2336_v39, %s7010_s7  ;;  %v2348_v1 = vsel %vm677_vm3, %v2343_v43, %v2347_v36  ;;  %v2126_v37 = vor.u32 %v2124_v45, %v2123_v9  ;;  %v2202_v59 = vsel %vm7226_vm2, %v2123_v9, 0  ;;  %v2484_v27 = vrot.slane %v7750_v19, 1  ;;  %v6590_v19 = vld [vmem:[%s10087_s2 + $0xf0] sm:$0xff]  }
  0xc9   : > { %v2355_v20 = vor.u32 %v2354_v4, %v2350_v0  ;;  %2409 = vrot.lane.b32.xlu0 %v2348_v1, %s7010_s7  ;;  %v2369_v54 = vshll.u32 %v2202_v59, 16  ;;  %v2131_v39 = vshll.u32 %v339_v63, 16  ;;  %v2130_v36 = vrot.slane %v2128_v44, 7 }
  0xca   : > { %v7793_v43 = vsel %vm7226_vm2, 0, %v2126_v37  ;;  %v2135_v56 = vshrl.u32 %v341_v31, 16  ;;  %v2138_v0 = vshll.u32 %v341_v31, 16  ;;  %v2487_v63 = vrot.slane %v2202_v59, 1 }
  0xcb   : > { %v2360_v12 = vsel %vm677_vm3, %v2355_v20, %v2359_v25  ;;  %v2362_v45 = vshrl.u32 %v7793_v43, 16  ;;  %v2364_v1 = vshll.u32 %v7793_v43, 16  ;;  %v2133_v31 = vor.u32 %v2131_v39, %v2130_v36 }
  0xcc   : > { %2514 = vrot.lane.b32.xlu1 %v2479_v30, %s7009_s16  ;;  %v2137_v4 = vrot.slane %v2135_v56, 7  ;;  %v2371_v20 = vrot.slane %v2369_v54, 1  ;;  %v2486_v30 = vrot.slane %v7793_v43, 1  ;;  %v10301_v44 = vmov 0  }
  0xcd   : > { %2516 = vrot.lane.b32.xlu0 %v2482_v16, %s7009_s16  ;;  %v2366_v25 = vrot.slane %v2364_v1, 1  ;;  %v7816_v16 = vsel %vm7226_vm2, 0, %v2133_v31 }
  0xce   : > { %v2140_v59 = vor.u32 %v2138_v0, %v2137_v4  ;;  %v2374_v54 = vshrl.u32 %v7816_v16, 16 }
  0xcf   : > { %v2367_v39 = vor.u32 %v2366_v25, %v2362_v45  ;;  %v6592_v45 = vld [vmem:[%s10087_s2 + $0xe8] sm:$0xff]   ;;  %v10302_v25 = vrot.slane %v7305_v11, 1 }
  0xd0   : > { %2411 = vrot.lane.b32.xlu1 %v2360_v12, %s7010_s7  ;;  %v7829_v1 = vsel %vm7226_vm2, 0, %v2140_v59 }
  0xd1   : > { %v2602_v31 = vshrl.u32 %v7829_v1, 16 }
  0xd9   : > { %v873_v8 = vpop.permute.xlu0 %872 }
  0xda   : > { %v7797_v9 = vsel %vm983_vm5, %v7257_v33, %v873_v8  ;;  %v2203_v33 = vsel %vm7226_vm2, %v2130_v36, 0  ;;  %v2485_v8 = vsel %vm934_vm4, %v2483_v32, %v2484_v27  ;;  %v2376_v36 = vshll.u32 %v7816_v16, 16 }
  0xdb   : > { %1256 = vmatmul.mubr.bf16.vlgmr.msra.gmra.mxu0 %v7797_v9  ;;  %v2381_v38 = vshll.u32 %v2203_v33, 16  ;;  %v2372_v32 = vsel %vm677_vm3, %v2367_v39, %v2371_v20  ;;  %2518 = vrot.lane.b32.xlu1 %v2485_v8, %s7009_s16  ;;  %v2488_v20 = vsel %vm934_vm4, %v2486_v30, %v2487_v63  ;;  %v2489_v39 = vrot.slane %v7816_v16, 1 }
  0xdc   : > { %1718 = vmatpush1.bf16.msra.mxu0 %v6585_v14  ;;  %5683 = vmatprep.mubr.msk.bf16.mxu0 %vm983_vm5, %v7781_v49  ;;  %v2204_v14 = vsel %vm7226_vm2, %v2137_v4, 0  ;;  %v2378_v27 = vrot.slane %v2376_v36, 1  ;;  %v2604_v4 = vshll.u32 %v7829_v1, 16  ;;  %v947_v30 = vrot.slane %v7331_v41, 1 }
  0xdd   : > { %v875_v37 = vpop.permute.xlu0 %874  ;;  %1719 = vmatprep.subr.bf16.mxu0 %v10301_v44  ;;  %v2383_v12 = vrot.slane %v2381_v38, 1  ;;  %v2609_v0 = vshll.u32 %v2204_v14, 16  ;;  %v10303_v38 = vrot.slane %v7315_v24, 1  ;;  %2413 = vrot.lane.b32.xlu0 %v2372_v32, %s7010_s7  ;;  %v6596_v32 = vld [vmem:[%s10087_s2 + $0xe0] sm:$0xff]  }
  0xde   : > { %v7825_v56 = vsel %vm983_vm5, %v7264_v40, %v875_v37  ;;  %v2379_v59 = vor.u32 %v2378_v27, %v2374_v54  ;;  %v2606_v36 = vrot.slane %v2604_v4, 1  ;;  %v948_v54 = vrot.slane %v7327_v35, 1 }
  0xdf   : > { %v7844_v37 = vsel %vm934_vm4, %v10303_v38, %v10302_v25  ;;  %v2611_v11 = vrot.slane %v2609_v0, 1  ;;  %v2617_v27 = vrot.slane %v7829_v1, 1  ;;  %v6600_v38 = vld [vmem:[%s10087_s2 + $0xd8] sm:$0xff]  }
  0xe0   : > { %1720 = vmatpush1.bf16.msra.mxu0 %v6590_v19  ;;  %v2490_v19 = vrot.slane %v2203_v33, 1  ;;  %v2384_v33 = vsel %vm677_vm3, %v2379_v59, %v2383_v12  ;;  %v2607_v8 = vor.u32 %v2606_v36, %v2602_v31  ;;  %v2618_v31 = vrot.slane %v2204_v14, 1  ;;  %v6614_v14 = vld [vmem:[%s10088_s3 + $0x50] sm:$0xff]  }
  0xe1   : > { %v7837_v40 = vpop.permute.xlu0 %880  ;;  %1721 = vmatprep.subr.bf16.mxu0 %v10301_v44  ;;  %2520 = vrot.lane.b32.xlu0 %v2488_v20, %s7009_s16  ;;  %v7873_v35 = vsel %vm934_vm4, %v947_v30, %v948_v54  ;;  %v950_v59 = vrot.slane %v7279_v51, 1  ;;  %v6603_v36 = vld [vmem:[%s10087_s2 + $0xd0] sm:$0xff]   ;;  %v956_v30 = vrot.slane %v7287_v57, 1  ;;  %v957_v54 = vrot.slane %v7274_v48, 1  ;;  %v6619_v48 = vld [vmem:[%s10087_s2 + $0x108] sm:$0xff]  }
  0xe2   : > { %2415 = vrot.lane.b32.xlu1 %v2384_v33, %s7010_s7  ;;  %v2491_v0 = vsel %vm934_vm4, %v2489_v39, %v2490_v19  ;;  %v2619_v19 = vsel %vm934_vm4, %v2617_v27, %v2618_v31  ;;  %v951_v39 = vrot.slane %v7270_v46, 1  ;;  %v6612_v33 = vld [vmem:[%s10087_s2 + $0xc0] sm:$0xff]   ;;  %v960_v31 = vrot.slane %v7366_v13, 1 }
  0xe3   : > { %1264 = vmatmul.mubr.bf16.gmra.mxu0 %v7825_v56  ;;  %v7971_v27 = vsel %vm934_vm4, %v956_v30, %v957_v54  ;;  %v10304_v54 = vld [vmem:[#allocation12_spill] sm:$0xff] }
  0xe4   : > { %5684 = vmatprep.mubr.msk.bf16.mxu0 %vm983_vm5, %v7844_v37  ;;  %1722 = vmatpush1.bf16.msra.mxu0 %v6592_v45  ;;  %v2612_v45 = vsel %vm677_vm3, %v2607_v8, %v2611_v11  ;;  %v7913_v11 = vsel %vm934_vm4, %v950_v59, %v951_v39  ;;  %v8021_v59 = vld [vmem:[%s10088_s3 + $0x28] sm:$0xff]   ;;  %v966_v39 = vrot.slane %v7409_v52, 1 }
  0xe5   : > { %v7858_v25 = vpop.permute.xlu0 %884  ;;  %v877_v63 = vpop.permute.xlu1 %876  ;;  %1723 = vmatprep.subr.bf16.mxu0 %v10301_v44  ;;  %2522 = vrot.lane.b32.xlu0 %v2491_v0, %s7009_s16  ;;  %v6617_v0 = vld [vmem:[%s10087_s2 + $0x110] sm:$0xff]  }
  0xe6   : > { %v7869_v12 = vsel %vm983_vm5, %v7315_v24, %v877_v63  ;;  %2613 = vrot.lane.b32.xlu1 %v2612_v45, %s7010_s7  ;;  %v6623_v63 = vld [vmem:[%s10088_s3 + $0x38] sm:$0xff]  }
  0xe8   : > { %1724 = vmatpush1.bf16.msra.mxu0 %v6596_v32  ;;  %v954_v32 = vrot.slane %v7341_v50, 1  ;;  %v6616_v50 = vld [vmem:[%s10087_s2 + $0x118] sm:$0xff]  }
  0xe9   : > { %v871_v4 = vpop.permute.xlu0 %870  ;;  %1725 = vmatprep.subr.bf16.mxu0 %v10301_v44  ;;  %v879_v20 = vpop.permute.xlu1 %878  ;;  %2620 = vrot.lane.b32.xlu0 %v2619_v19, %s7009_s16 }
  0xea   : > { %v7882_v24 = vsel %vm983_vm5, %v7232_v3, %v871_v4  ;;  %2385 = vrot.lane.b32.xlu1 %v7295_v62, %s7010_s7  ;;  %v7910_v46 = vsel %vm983_vm5, %v7331_v41, %v879_v20  ;;  %v6621_v62 = vld [vmem:[%s10088_s3 + $0x40] sm:$0xff]   ;;  %v953_v41 = vrot.slane %v7354_v60, 1 }
  0xeb   : > { %1272 = vmatmul.mubr.bf16.gmra.mxu0 %v7869_v12  ;;  %1492 = vmatmul.mubr.bf16.vlgmr.msra.gmra.mxu1 %v7882_v24  ;;  %v6620_v4 = vld [vmem:[%s10087_s2 + $0x100] sm:$0xff]  }
  0xec   : > { %5685 = vmatprep.mubr.msk.bf16.mxu0 %vm983_vm5, %v7873_v35  ;;  %5711 = vmatprep.mubr.msk.bf16.mxu1 %vm983_vm5, %v7531_v5  ;;  %v6618_v5 = vld [vmem:[%s10088_s3 + $0x48] sm:$0xff]   ;;  %v7942_v8 = vsel %vm934_vm4, %v953_v41, %v954_v32 }
  0xed   : > { %1726 = vmatpush1.bf16.msra.mxu0 %v6600_v38  ;;  %6148 = vmatpush3.bf16.msra.mxu1 %v7594_v53  ;;  %v6608_v53 = vld [vmem:[%s10087_s2 + $0xc8] sm:$0xff]  }
  0xee   : > { %1727 = vmatprep.subr.bf16.mxu0 %v10301_v44  ;;  %6149 = vmatprep.subr.bf16.mxu1 %v6614_v14  ;;  %v7992_v38 = vld [vmem:[%s10088_s3 + $0x88] sm:$0xff]  }
  0xef   : > { %2492 = vrot.lane.b32.xlu0 %v7565_v47, %s7009_s16 }
  0xf1   : > { %1728 = vmatpush1.bf16.msra.mxu0 %v6603_v36  ;;  %6150 = vmatpush3.bf16.msra.mxu1 %v6614_v14  ;;  %v7997_v14 = vsel %vm983_vm5, %v7287_v57, %v7858_v25  ;;  %v962_v57 = vrot.slane %v7384_v22, 1 }
  0xf2   : > { %1729 = vmatprep.subr.bf16.mxu0 %v10301_v44  ;;  %6151 = vmatprep.subr.bf16.mxu1 %v6618_v5 }
  0xf3   : > { %1280 = vmatmul.mubr.bf16.gmra.mxu0 %v7910_v46  ;;  %1500 = vmatmul.mubr.bf16.gmra.mxu1 %v7797_v9  ;;  %v7939_v9 = vsel %vm983_vm5, %v7279_v51, %v7837_v40  ;;  %v6624_v51 = vld [vmem:[%s10088_s3 + $0x30] sm:$0xff]   ;;  %v883_v40 = vpop.permute.xlu1 %882 }
  0xf4   : > { %5686 = vmatprep.mubr.msk.bf16.mxu0 %vm983_vm5, %v7913_v11  ;;  %5712 = vmatprep.mubr.msk.bf16.mxu1 %vm983_vm5, %v7781_v49  ;;  %v7968_v45 = vsel %vm983_vm5, %v7354_v60, %v883_v40  ;;  %v959_v60 = vrot.slane %v7380_v21, 1 }
  0xf5   : > { %1730 = vmatpush1.bf16.msra.mxu0 %v6608_v53  ;;  %6152 = vmatpush3.bf16.msra.mxu1 %v6618_v5  ;;  %v968_v53 = vrot.slane %v7436_v17, 1 }
  0xf6   : > { %1731 = vmatprep.subr.bf16.mxu0 %v10301_v44  ;;  %6153 = vmatprep.subr.bf16.mxu1 %v6621_v62  ;;  %v8000_v19 = vsel %vm934_vm4, %v959_v60, %v960_v31  ;;  %v891_v52 = vpop.permute.xlu0 %890 }
  0xf7   : > { %v887_v13 = vpop.permute.xlu1 %886 }
  0xf8   : > { %v8013_v25 = vsel %vm983_vm5, %v7380_v21, %v887_v13  ;;  %v965_v21 = vrot.slane %v7420_v6, 1  ;;  %v10305_v13 = vld [vmem:[#allocation14_spill] sm:$0xff] }
  0xf9   : > { %1732 = vmatpush1.bf16.msra.mxu0 %v6612_v33  ;;  %6154 = vmatpush3.bf16.msra.mxu1 %v6621_v62  ;;  %v969_v62 = vrot.slane %v7429_v15, 1  ;;  %v971_v15 = vrot.slane %v7453_v34, 1  ;;  %v972_v33 = vrot.slane %v7441_v23, 1  ;;  %v974_v23 = vrot.slane %v7481_v7, 1 }
  0xfa   : > { %1741 = vmatprep.subr.bf16.mxu0 %v10301_v44  ;;  %6155 = vmatprep.subr.bf16.mxu1 %v6623_v63  ;;  %v8037_v5 = vsel %vm934_vm4, %v965_v21, %v966_v39 }
  0xfb   : > { %1288 = vmatmul.mubr.bf16.gmra.mxu0 %v7939_v9  ;;  %1508 = vmatmul.mubr.bf16.gmra.mxu1 %v7825_v56  ;;  %v8052_v41 = vsel %vm934_vm4, %v968_v53, %v969_v62  ;;  %v10307_v62 = vld [vmem:[#allocation16_spill] sm:$0xff] }
  0xfc   : > { %5687 = vmatprep.mubr.msk.bf16.mxu0 %vm983_vm5, %v7942_v8  ;;  %5713 = vmatprep.mubr.msk.bf16.mxu1 %vm983_vm5, %v7844_v37 }
  0xfd   : > { %1742 = vmatpush2.bf16.msra.mxu0 %v6616_v50  ;;  %6156 = vmatpush3.bf16.msra.mxu1 %v6623_v63  ;;  %v8067_v50 = vsel %vm934_vm4, %v971_v15, %v972_v33  ;;  %v895_v63 = vpop.permute.xlu0 %894  ;;  %v10308_v15 = vld [vmem:[#allocation15_spill] sm:$0xff] }
  0xfe   : > { %1743 = vmatprep.subr.bf16.mxu0 %v10301_v44  ;;  %6157 = vmatprep.subr.bf16.mxu1 %v6624_v51 }
 0x101   : > { %1744 = vmatpush2.bf16.msra.mxu0 %v6617_v0  ;;  %6158 = vmatpush3.bf16.msra.mxu1 %v6624_v51  ;;  %v975_v51 = vrot.slane %v7470_v58, 1  ;;  %v977_v58 = vrot.slane %v7508_v42, 1  ;;  %v978_v0 = vrot.slane %v10304_v54, 1 }
 0x102   : > { %1745 = vmatprep.subr.bf16.mxu0 %v10301_v44  ;;  %6191 = vmatprep.subr.bf16.mxu1 %v8021_v59 }
 0x103   : > { %1296 = vmatmul.mubr.bf16.gmra.mxu0 %v7968_v45  ;;  %1516 = vmatmul.mubr.bf16.gmra.mxu1 %v7869_v12  ;;  %v8082_v40 = vsel %vm934_vm4, %v974_v23, %v975_v51  ;;  %v8097_v60 = vsel %vm934_vm4, %v977_v58, %v978_v0 }
 0x104   : > { %5688 = vmatprep.mubr.msk.bf16.mxu0 %vm983_vm5, %v7971_v27  ;;  %5714 = vmatprep.mubr.msk.bf16.mxu1 %vm983_vm5, %v7873_v35 }
 0x105   : > { %1746 = vmatpush2.bf16.msra.mxu0 %v6619_v48  ;;  %v899_v48 = vpop.permute.xlu0 %898 }
 0x106   : > { %1747 = vmatprep.subr.bf16.mxu0 %v10301_v44  ;;  %v963_v44 = vrot.slane %v7373_v18, 1  ;;  %v889_v18 = vpop.permute.xlu1 %888  ;;  %v8109_v21 = vsel %vm983_vm5, %v7508_v42, %v899_v48  ;;  %v1073_v42 = vrot.slane %v10308_v15, 1  ;;  %v6634_v15 = vld [vmem:[%s10088_s3 + $0x68] sm:$0xff]  }
 0x107   : > { %v8034_v36 = vsel %vm983_vm5, %v7384_v22, %v889_v18  ;;  %v8049_v22 = vsel %vm983_vm5, %v7420_v6, %v891_v52 }
 0x108   : > { %v8016_v20 = vsel %vm934_vm4, %v962_v57, %v963_v44  ;;  %v980_v57 = vrot.slane %v10305_v13, 1 }
 0x109   : > { %1748 = vmatpush2.bf16.msra.mxu0 %v6620_v4 }
 0x10a   : > { %6235 = vmatprep.subr.bf16.mxu0 %v7992_v38  ;;  %v893_v32 = vpop.permute.xlu1 %892  ;;  %v1069_v4 = vpop.permute.xlu0 %1068 }
 0x10b   : > { %1304 = vmatmul.mubr.bf16.gmra.mxu0 %v7997_v14  ;;  %1524 = vmatmul.mubr.bf16.gmra.mxu1 %v7910_v46  ;;  %v8064_v6 = vsel %vm983_vm5, %v7436_v17, %v893_v32  ;;  %v8079_v17 = vsel %vm983_vm5, %v7453_v34, %v895_v63  ;;  %v1072_v32 = vrot.slane %v10307_v62, 1  ;;  %v8137_v54 = vsel %vm983_vm5, %v10307_v62, %v1069_v4 }
 0x10c   : > { %5689 = vmatprep.mubr.msk.bf16.mxu0 %vm983_vm5, %v8000_v19  ;;  %5715 = vmatprep.mubr.msk.bf16.mxu1 %vm983_vm5, %v7913_v11 }
 0x10d   : > { %v8127_v23 = vsel %vm934_vm4, %v1072_v32, %v1073_v42 }
 0x10e   : > { %v897_v30 = vpop.permute.xlu1 %896 }
 0x10f   : > { %v8094_v34 = vsel %vm983_vm5, %v7481_v7, %v897_v30  ;;  %v10306_v7 = vld [vmem:[#allocation13_spill] sm:$0xff] }
 0x110   : > { %v981_v44 = vrot.slane %v10306_v7, 1 }
 0x112   : > { %v901_v31 = vpop.permute.xlu1 %900  ;;  %v8112_v52 = vsel %vm934_vm4, %v980_v57, %v981_v44  ;;  %v10309_v57 = vld [vmem:[#allocation17_spill] sm:$0xff] }
 0x113   : > { %1312 = vmatmul.mubr.bf16.gmra.mxu0 %v8013_v25  ;;  %1532 = vmatmul.mubr.bf16.gmra.mxu1 %v7939_v9  ;;  %v2390_v39 = vpop.permute.xlu0 %2389  ;;  %v8124_v63 = vsel %vm983_vm5, %v10305_v13, %v901_v31  ;;  %v6625_v13 = vld [vmem:[%s10088_s3 + $0x80] sm:$0xff]  }
 0x114   : > { %5690 = vmatprep.mubr.msk.bf16.mxu0 %vm983_vm5, %v8016_v20  ;;  %5716 = vmatprep.mubr.msk.bf16.mxu1 %vm983_vm5, %v7942_v8 }
 0x116   : > { %v2388_v18 = vpop.permute.xlu1 %2387 }
 0x117   : > { %v2497_v33 = vpop.permute.xlu0 %2496  ;;  %v2528_v7 = vsel %vm2524_vm6, %v10309_v57, %v2388_v18 }
 0x11a   : > { %v2495_v53 = vpop.permute.xlu1 %2494 }
 0x11b   : > { %1320 = vmatmul.mubr.bf16.gmra.mxu0 %v8034_v36  ;;  %1540 = vmatmul.mubr.bf16.gmra.mxu1 %v7968_v45  ;;  %v2394_v30 = vpop.permute.xlu0 %2393 }
 0x11c   : > { %5691 = vmatprep.mubr.msk.bf16.mxu0 %vm983_vm5, %v8037_v5  ;;  %5717 = vmatprep.mubr.msk.bf16.mxu1 %vm983_vm5, %v7971_v27 }
 0x11e   : > { %v2392_v51 = vpop.permute.xlu1 %2391 }
 0x11f   : > { %v2501_v0 = vpop.permute.xlu0 %2500  ;;  %v2532_v32 = vsel %vm2524_vm6, %v7616_v29, %v2392_v51  ;;  %v6635_v29 = vld [vmem:[%s10088_s3 + $0x60] sm:$0xff]  }
 0x122   : > { %v2499_v58 = vpop.permute.xlu1 %2498 }
 0x123   : > { %1328 = vmatmul.mubr.bf16.gmra.mxu0 %v8049_v22  ;;  %1548 = vmatmul.mubr.bf16.gmra.mxu1 %v7997_v14  ;;  %v2398_v31 = vpop.permute.xlu0 %2397 }
 0x124   : > { %5692 = vmatprep.mubr.msk.bf16.mxu0 %vm983_vm5, %v8052_v41  ;;  %5718 = vmatprep.mubr.msk.bf16.mxu1 %vm983_vm5, %v8000_v19 }
 0x126   : > { %v2396_v48 = vpop.permute.xlu1 %2395 }
 0x127   : > { %v2505_v44 = vpop.permute.xlu0 %2504 }
 0x12a   : > { %v2503_v4 = vpop.permute.xlu1 %2502 }
 0x12b   : > { %1336 = vmatmul.mubr.bf16.gmra.mxu0 %v8064_v6  ;;  %1556 = vmatmul.mubr.bf16.gmra.mxu1 %v8013_v25  ;;  %v2402_v18 = vpop.permute.xlu0 %2401 }
 0x12c   : > { %5693 = vmatprep.mubr.msk.bf16.mxu0 %vm983_vm5, %v8067_v50  ;;  %5719 = vmatprep.mubr.msk.bf16.mxu1 %vm983_vm5, %v8016_v20 }
 0x133   : > { %1344 = vmatmul.mubr.bf16.gmra.mxu0 %v8079_v17  ;;  %1564 = vmatmul.mubr.bf16.gmra.mxu1 %v8034_v36 }
 0x134   : > { %5694 = vmatprep.mubr.msk.bf16.mxu0 %vm983_vm5, %v8082_v40  ;;  %5720 = vmatprep.mubr.msk.bf16.mxu1 %vm983_vm5, %v8037_v5 }
 0x13b   : > { %1352 = vmatmul.mubr.bf16.gmra.mxu0 %v8094_v34  ;;  %1572 = vmatmul.mubr.bf16.gmra.mxu1 %v8049_v22 }
 0x13c   : > { %5695 = vmatprep.mubr.msk.bf16.mxu0 %vm983_vm5, %v8097_v60  ;;  %5721 = vmatprep.mubr.msk.bf16.mxu1 %vm983_vm5, %v8052_v41 }
 0x143   : > { %1360 = vmatmul.mubr.bf16.gmra.mxu0 %v8109_v21  ;;  %1580 = vmatmul.mubr.bf16.gmra.mxu1 %v8064_v6 }
 0x144   : > { %5696 = vmatprep.mubr.msk.bf16.mxu0 %vm983_vm5, %v8112_v52  ;;  %5722 = vmatprep.mubr.msk.bf16.mxu1 %vm983_vm5, %v8067_v50 }
 0x14b   : > { %1368 = vmatmul.mubr.bf16.gmra.mxu0 %v8124_v63  ;;  %1588 = vmatmul.mubr.bf16.gmra.mxu1 %v8079_v17 }
 0x14c   : > { %5697 = vmatprep.mubr.msk.bf16.mxu0 %vm983_vm5, %v8127_v23  ;;  %5723 = vmatprep.mubr.msk.bf16.mxu1 %vm983_vm5, %v8082_v40 }
 0x153   : > { %1376 = vmatmul.mubr.bf16.gmra.mxu0 %v8137_v54  ;;  %1596 = vmatmul.mubr.bf16.gmra.mxu1 %v8094_v34 }
 0x154   : > { %5724 = vmatprep.mubr.msk.bf16.mxu1 %vm983_vm5, %v8097_v60  ;;  %5762 = vmatprep.mubr.msk.bf16.mxu0 %vm983_vm5, %v7781_v49  ;;  %v6626_v49 = vld [vmem:[%s10088_s3 + $0x78] sm:$0xff]  }
 0x15b   : > { %1604 = vmatmul.mubr.bf16.gmra.mxu1 %v8109_v21  ;;  %1750 = vmatmul.mubr.bf16.vlgmr.msra.gmra.mxu0 %v7825_v56  ;;  %v8161_v56 = vsel %vm983_vm5, %v2528_v7, %v2495_v53  ;;  %v10310_v53 = vld [vmem:[#allocation18_spill] sm:$0xff] }
 0x15c   : > { %6236 = vmatpush3.bf16.msra.mxu0 %v7992_v38  ;;  %5725 = vmatprep.mubr.msk.bf16.mxu1 %vm983_vm5, %v8112_v52  ;;  %v2400_v38 = vpop.permute.xlu1 %2399  ;;  %v2530_v62 = vsel %vm2524_vm6, %v10310_v53, %v2390_v39  ;;  %v6628_v39 = vld [vmem:[%s10088_s3 + $0x20] sm:$0xff]  }
 0x15d   : > { %5763 = vmatprep.mubr.msk.bf16.mxu0 %vm983_vm5, %v7844_v37  ;;  %6237 = vmatprep.subr.bf16.mxu0 %v6625_v13  ;;  %v6629_v37 = vld [vmem:[%s10088_s3 + $0x70] sm:$0xff]   ;;  %v8180_v42 = vsel %vm983_vm5, %v2530_v62, %v2497_v33  ;;  %v2534_v33 = vsel %vm2524_vm6, %v7622_v55, %v2394_v30  ;;  %v2538_v30 = vsel %vm2524_vm6, %v7663_v10, %v2398_v31  ;;  %v6633_v10 = vld [vmem:[%s10088_s3] sm:$0xff]   ;;  %v10312_v31 = vld [vmem:[#allocation20_spill] sm:$0xff] }
 0x15e   : > { %v6631_v55 = vld [vmem:[%s10088_s3 + $0x10] sm:$0xff]  }
 0x160   : > { %6238 = vmatpush3.bf16.msra.mxu0 %v6625_v13  ;;  %v2509_v13 = vpop.permute.xlu0 %2508 }
 0x161   : > { %6239 = vmatprep.subr.bf16.mxu0 %v6626_v49 }
 0x163   : > { %1612 = vmatmul.mubr.bf16.gmra.mxu1 %v8124_v63  ;;  %1758 = vmatmul.mubr.bf16.gmra.mxu0 %v7869_v12  ;;  %v2507_v12 = vpop.permute.xlu1 %2506 }
 0x164   : > { %5764 = vmatprep.mubr.msk.bf16.mxu0 %vm983_vm5, %v7873_v35  ;;  %6159 = vmatprep.mubr.msk.bf16.mxu1 %vm2675_vm7, %v8161_v56  ;;  %v8183_v35 = vsel %vm983_vm5, %v2532_v32, %v2499_v58  ;;  %v10311_v58 = vld [vmem:[#allocation19_spill] sm:$0xff]  ;;  %v2406_v57 = vpop.permute.xlu0 %2405 }
 0x165   : > { %6240 = vmatpush3.bf16.msra.mxu0 %v6626_v49  ;;  %v2536_v49 = vsel %vm2524_vm6, %v10311_v58, %v2396_v48 }
 0x166   : > { %6241 = vmatprep.subr.bf16.mxu0 %v6629_v37  ;;  %v8210_v7 = vsel %vm983_vm5, %v2536_v49, %v2503_v4  ;;  %v8230_v4 = vsel %vm983_vm5, %v2538_v30, %v2505_v44  ;;  %v2542_v44 = vsel %vm2524_vm6, %v10312_v31, %v2402_v18  ;;  %v10314_v18 = vld [vmem:[#allocation22_spill] sm:$0xff] }
 0x167   : > { %v2404_v51 = vpop.permute.xlu1 %2403 }
 0x168   : > { %v2513_v48 = vpop.permute.xlu0 %2512 }
 0x169   : > { %6242 = vmatpush3.bf16.msra.mxu0 %v6629_v37 }
 0x16a   : > { %6243 = vmatprep.subr.bf16.mxu0 %v6634_v15 }
 0x16b   : > { %1766 = vmatmul.mubr.bf16.gmra.mxu0 %v7910_v46  ;;  %6160 = vmatmul.mubr.msk.bf16.vlgmr.msra.gmra.mxu1 %vm2675_vm7, %v8180_v42  ;;  %v6630_v46 = vld [vmem:[%s10088_s3 + $0x18] sm:$0xff]  }
 0x16c   : > { %5765 = vmatprep.mubr.msk.bf16.mxu0 %vm983_vm5, %v7913_v11  ;;  %6163 = vmatprep.mubr.msk.bf16.mxu1 %vm2675_vm7, %v8183_v35  ;;  %v8207_v11 = vsel %vm983_vm5, %v2534_v33, %v2501_v0  ;;  %v2540_v0 = vsel %vm2524_vm6, %v7673_v28, %v2400_v38  ;;  %v2410_v28 = vpop.permute.xlu0 %2409  ;;  %v10313_v38 = vld [vmem:[#allocation21_spill] sm:$0xff] }
 0x16d   : > { %6192 = vmatpush3.bf16.msra.mxu1 %v8021_v59  ;;  %6244 = vmatpush3.bf16.msra.mxu0 %v6634_v15  ;;  %v2511_v59 = vpop.permute.xlu1 %2510  ;;  %v2544_v53 = vsel %vm2524_vm6, %v10313_v38, %v2404_v51  ;;  %v2546_v15 = vsel %vm2524_vm6, %v10314_v18, %v2406_v57  ;;  %v2550_v51 = vsel %vm2524_vm6, %v7754_v26, %v2410_v28 }
 0x16e   : > { %6193 = vmatprep.subr.bf16.mxu1 %v6628_v39  ;;  %6245 = vmatprep.subr.bf16.mxu0 %v6635_v29  ;;  %v8253_v32 = vsel %vm983_vm5, %v2544_v53, %v2511_v59 }
 0x171   : > { %6194 = vmatpush3.bf16.msra.mxu1 %v6628_v39  ;;  %6246 = vmatpush3.bf16.msra.mxu0 %v6635_v29  ;;  %v2408_v37 = vpop.permute.xlu1 %2407  ;;  %v8267_v29 = vsel %vm983_vm5, %v2546_v15, %v2513_v48 }
 0x172   : > { %6195 = vmatprep.subr.bf16.mxu1 %v6630_v46 }
 0x173   : > { %1774 = vmatmul.mubr.bf16.gmra.mxu0 %v7939_v9  ;;  %6164 = vmatmul.mubr.msk.bf16.gmra.mxu1 %vm2675_vm7, %v8207_v11  ;;  %v6632_v9 = vld [vmem:[%s10088_s3 + $0x8] sm:$0xff]  }
 0x174   : > { %5766 = vmatprep.mubr.msk.bf16.mxu0 %vm983_vm5, %v7942_v8  ;;  %6167 = vmatprep.mubr.msk.bf16.mxu1 %vm2675_vm7, %v8210_v7  ;;  %v8233_v8 = vsel %vm983_vm5, %v2540_v0, %v2507_v12 }
 0x175   : > { %6196 = vmatpush3.bf16.msra.mxu1 %v6630_v46  ;;  %v2515_v62 = vpop.permute.xlu1 %2514 }
 0x176   : > { %6197 = vmatprep.subr.bf16.mxu1 %v6631_v55 }
 0x179   : > { %6198 = vmatpush3.bf16.msra.mxu1 %v6631_v55  ;;  %v2412_v12 = vpop.permute.xlu1 %2411 }
 0x17a   : > { %6199 = vmatprep.subr.bf16.mxu1 %v6632_v9  ;;  %v2552_v58 = vsel %vm2524_vm6, %v7762_v61, %v2412_v12 }
 0x17b   : > { %1782 = vmatmul.mubr.bf16.gmra.mxu0 %v7968_v45  ;;  %6168 = vmatmul.mubr.msk.bf16.gmra.mxu1 %vm2675_vm7, %v8230_v4  ;;  %v8250_v45 = vsel %vm983_vm5, %v2542_v44, %v2509_v13  ;;  %v10315_v13 = vld [vmem:[#allocation23_spill] sm:$0xff] }
 0x17c   : > { %5767 = vmatprep.mubr.msk.bf16.mxu0 %vm983_vm5, %v7971_v27  ;;  %6171 = vmatprep.mubr.msk.bf16.mxu1 %vm2675_vm7, %v8233_v8  ;;  %v2517_v27 = vpop.permute.xlu0 %2516  ;;  %v2548_v39 = vsel %vm2524_vm6, %v10315_v13, %v2408_v37 }
 0x17d   : > { %6200 = vmatpush3.bf16.msra.mxu1 %v6632_v9  ;;  %v8270_v33 = vsel %vm983_vm5, %v2548_v39, %v2515_v62  ;;  %v8284_v46 = vsel %vm983_vm5, %v2550_v51, %v2517_v27 }
 0x17e   : > { %6201 = vmatprep.subr.bf16.mxu1 %v6633_v10 }
 0x181   : > { %6202 = vmatpush3.bf16.msra.mxu1 %v6633_v10 }
 0x183   : > { %1790 = vmatmul.mubr.bf16.gmra.mxu0 %v7997_v14  ;;  %6172 = vmatmul.mubr.msk.bf16.gmra.mxu1 %vm2675_vm7, %v8250_v45  ;;  %v2414_v14 = vpop.permute.xlu0 %2413 }
 0x184   : > { %5768 = vmatprep.mubr.msk.bf16.mxu0 %vm983_vm5, %v8000_v19  ;;  %6175 = vmatprep.mubr.msk.bf16.mxu1 %vm2675_vm7, %v8253_v32  ;;  %v2519_v19 = vpop.permute.xlu1 %2518  ;;  %v2554_v61 = vsel %vm2524_vm6, %v7793_v43, %v2414_v14 }
 0x187   : > { %v2521_v49 = vpop.permute.xlu0 %2520 }
 0x188   : > { %v2416_v57 = vpop.permute.xlu1 %2415  ;;  %v8301_v59 = vsel %vm983_vm5, %v2554_v61, %v2521_v49 }
 0x18b   : > { %1798 = vmatmul.mubr.bf16.gmra.mxu0 %v8013_v25  ;;  %6176 = vmatmul.mubr.msk.bf16.gmra.mxu1 %vm2675_vm7, %v8267_v29  ;;  %v8287_v25 = vsel %vm983_vm5, %v2552_v58, %v2519_v19  ;;  %v2523_v26 = vpop.permute.xlu0 %2522 }
 0x18c   : > { %5769 = vmatprep.mubr.msk.bf16.mxu0 %vm983_vm5, %v8016_v20  ;;  %6179 = vmatprep.mubr.msk.bf16.mxu1 %vm2675_vm7, %v8270_v33  ;;  %v2556_v20 = vsel %vm2524_vm6, %v7816_v16, %v2416_v57  ;;  %v2614_v55 = vpop.permute.xlu1 %2613 }
 0x18d   : > { %v2623_v16 = vsel %vm2524_vm6, %v7829_v1, %v2614_v55 }
 0x18f   : > { %v2621_v30 = vpop.permute.xlu0 %2620 }
 0x193   : > { %1806 = vmatmul.mubr.bf16.gmra.mxu0 %v8034_v36  ;;  %6180 = vmatmul.mubr.msk.bf16.gmra.mxu1 %vm2675_vm7, %v8284_v46  ;;  %v8304_v36 = vsel %vm983_vm5, %v2556_v20, %v2523_v26  ;;  %v2493_v9 = vpop.permute.xlu0 %2492 }
 0x194   : > { %5770 = vmatprep.mubr.msk.bf16.mxu0 %vm983_vm5, %v8037_v5  ;;  %6183 = vmatprep.mubr.msk.bf16.mxu1 %vm2675_vm7, %v8287_v25  ;;  %v2386_v5 = vpop.permute.xlu1 %2385 }
 0x195   : > { %v2526_v48 = vsel %vm2524_vm6, %v7232_v3, %v2386_v5 }
 0x196   : > { %v8321_v28 = vsel %vm983_vm5, %v2526_v48, %v2493_v9 }
 0x197   : > { %10316 = vst [vmem:[#allocation12_spill] sm:$0xff] %v8321_v28 }
 0x19b   : > { %v1257_v0 = vpop.f32.mrf.mxu0  ;;  %1814 = vmatmul.mubr.bf16.gmra.mxu0 %v8049_v22  ;;  %6184 = vmatmul.mubr.msk.bf16.gmra.mxu1 %vm2675_vm7, %v8301_v59  ;;  %v8318_v22 = vsel %vm983_vm5, %v2623_v16, %v2621_v30 }
 0x19c   : > { %5771 = vmatprep.mubr.msk.bf16.mxu0 %vm983_vm5, %v8052_v41  ;;  %6187 = vmatprep.mubr.msk.bf16.mxu1 %vm2675_vm7, %v8304_v36 }
 0x19d   : > { %v1259_v43 = vpop.f32.mrf.mxu0 }
 0x19f   : > { %v1260_v37 = vpop.f32.mrf.mxu0 }
 0x1a1   : > { %v1262_v10 = vpop.f32.mrf.mxu0 }
 0x1a2   : > { %v8373_v10 = vld [vmem:[%s7210_s15 + $0x8] sm:$0xff]  }
 0x1a3   : > { %v1265_v41 = vpop.f32.mrf.mxu0  ;;  %1822 = vmatmul.mubr.bf16.gmra.mxu0 %v8064_v6  ;;  %6188 = vmatmul.mubr.msk.bf16.gmra.mxu1 %vm2675_vm7, %v8318_v22  ;;  %10317 = vst [vmem:[#allocation14_spill] sm:$0xff] %v8373_v10 }
 0x1a4   : > { %5772 = vmatprep.mubr.msk.bf16.mxu0 %vm983_vm5, %v8067_v50  ;;  %6203 = vmatprep.mubr.msk.bf16.mxu1 %vm2675_vm7, %v8321_v28 }
 0x1a5   : > { %v1267_v3 = vpop.f32.mrf.mxu0 }
 0x1a7   : > { %v1268_v1 = vpop.f32.mrf.mxu0 }
 0x1a9   : > { %v1270_v31 = vpop.f32.mrf.mxu0 }
 0x1ab   : > { %v1273_v44 = vpop.f32.mrf.mxu0  ;;  %v1493_v38 = vpop.f32.mrf.mxu1  ;;  %1830 = vmatmul.mubr.bf16.gmra.mxu0 %v8079_v17  ;;  %6204 = vmatmul.mubr.msk.bf16.vlgmr.msra.gmra.mxu1 %vm2675_vm7, %v8161_v56 }
 0x1ac   : > { %v8333_v6 = vadd.f32 %v1493_v38, %v1257_v0  ;;  %6207 = vmatprep.mubr.msk.bf16.mxu1 %vm2675_vm7, %v8180_v42  ;;  %5773 = vmatprep.mubr.msk.bf16.mxu0 %vm983_vm5, %v8082_v40 }
 0x1ad   : > { %v1275_v50 = vpop.f32.mrf.mxu0  ;;  %v1495_v53 = vpop.f32.mrf.mxu1 }
 0x1af   : > { %v1276_v62 = vpop.f32.mrf.mxu0  ;;  %v1496_v27 = vpop.f32.mrf.mxu1 }
 0x1b0   : > { %v8339_v18 = vadd.f32 %v1496_v27, %v1260_v37 }
 0x1b1   : > { %v1278_v15 = vpop.f32.mrf.mxu0  ;;  %v1498_v12 = vpop.f32.mrf.mxu1 }
 0x1b3   : > { %v1281_v17 = vpop.f32.mrf.mxu0  ;;  %v1501_v13 = vpop.f32.mrf.mxu1  ;;  %1838 = vmatmul.mubr.bf16.gmra.mxu0 %v8094_v34  ;;  %6208 = vmatmul.mubr.msk.bf16.gmra.mxu1 %vm2675_vm7, %v8183_v35 }
 0x1b4   : > { %v8344_v56 = vadd.f32 %v1501_v13, %v1265_v41  ;;  %6211 = vmatprep.mubr.msk.bf16.mxu1 %vm2675_vm7, %v8207_v11  ;;  %5774 = vmatprep.mubr.msk.bf16.mxu0 %vm983_vm5, %v8097_v60  ;;  %v10139_v41 = vunpack.c.h.bf16 %v8373_v10 }
 0x1b5   : > { %v1283_v40 = vpop.f32.mrf.mxu0  ;;  %v1503_v39 = vpop.f32.mrf.mxu1 }
 0x1b6   : > { %v8404_v40 = vld [vmem:[%s7210_s15 + $0x18] sm:$0xff]  }
 0x1b7   : > { %v1284_v14 = vpop.f32.mrf.mxu0  ;;  %v1504_v19 = vpop.f32.mrf.mxu1  ;;  %10319 = vst [vmem:[#allocation16_spill] sm:$0xff] %v8404_v40  ;;  %v10138_v39 = vunpack.c.l.bf16 %v8404_v40 }
 0x1b8   : > { %v8350_v51 = vadd.f32 %v1504_v19, %v1268_v1 }
 0x1b9   : > { %v1286_v58 = vpop.f32.mrf.mxu0  ;;  %v1506_v49 = vpop.f32.mrf.mxu1 }
 0x1bb   : > { %v1289_v34 = vpop.f32.mrf.mxu0  ;;  %v1509_v57 = vpop.f32.mrf.mxu1  ;;  %1846 = vmatmul.mubr.bf16.gmra.mxu0 %v8109_v21  ;;  %6212 = vmatmul.mubr.msk.bf16.gmra.mxu1 %vm2675_vm7, %v8210_v7 }
 0x1bc   : > { %v8355_v26 = vadd.f32 %v1509_v57, %v1273_v44  ;;  %6215 = vmatprep.mubr.msk.bf16.mxu1 %vm2675_vm7, %v8230_v4  ;;  %5775 = vmatprep.mubr.msk.bf16.mxu0 %vm983_vm5, %v8112_v52 }
 0x1bd   : > { %v1291_v60 = vpop.f32.mrf.mxu0  ;;  %v1511_v61 = vpop.f32.mrf.mxu1 }
 0x1bf   : > { %v1292_v20 = vpop.f32.mrf.mxu0  ;;  %v1512_v55 = vpop.f32.mrf.mxu1 }
 0x1c0   : > { %v8361_v30 = vadd.f32 %v1512_v55, %v1276_v62 }
 0x1c1   : > { %v1294_v0 = vpop.f32.mrf.mxu0  ;;  %v1514_v21 = vpop.f32.mrf.mxu1 }
 0x1c3   : > { %v1297_v5 = vpop.f32.mrf.mxu0  ;;  %v1517_v43 = vpop.f32.mrf.mxu1  ;;  %1854 = vmatmul.mubr.bf16.gmra.mxu0 %v8124_v63  ;;  %6216 = vmatmul.mubr.msk.bf16.gmra.mxu1 %vm2675_vm7, %v8233_v8  ;;  %v10143_v63 = vunpack.c.l.bf16 %v8373_v10 }
 0x1c4   : > { %v8366_v16 = vadd.f32 %v1517_v43, %v1281_v17  ;;  %6219 = vmatprep.mubr.msk.bf16.mxu1 %vm2675_vm7, %v8250_v45  ;;  %5776 = vmatprep.mubr.msk.bf16.mxu0 %vm983_vm5, %v8127_v23  ;;  %v8384_v23 = vld [vmem:[%s7210_s15] sm:$0xff]  }
 0x1c5   : > { %v1299_v52 = vpop.f32.mrf.mxu0  ;;  %v1519_v48 = vpop.f32.mrf.mxu1  ;;  %v6475_v44 = vpack.i.bf16 %v10139_v41, %v10143_v63  ;;  %10318 = vst [vmem:[#allocation13_spill] sm:$0xff] %v8384_v23  ;;  %v10142_v38 = vunpack.c.l.bf16 %v8384_v23  ;;  %v10137_v50 = vunpack.c.h.bf16 %v8384_v23 }
 0x1c6   : > { %v8435_v48 = vld [vmem:[%s7210_s15 + $0x28] sm:$0xff]  }
 0x1c7   : > { %v1300_v9 = vpop.f32.mrf.mxu0  ;;  %v1520_v37 = vpop.f32.mrf.mxu1  ;;  %v6470_v27 = vpack.i.bf16 %v10137_v50, %v10142_v38  ;;  %6476 = vrot.lane.b32.xlu0 %v6475_v44, %s7010_s7  ;;  %10321 = vst [vmem:[#allocation17_spill] sm:$0xff] %v8435_v48 }
 0x1c8   : > { %v8377_v3 = vadd.f32 %v1520_v37, %v1284_v14  ;;  %v10131_v14 = vunpack.c.h.bf16 %v8404_v40  ;;  %v10119_v37 = vunpack.c.h.bf16 %v8435_v48 }
 0x1c9   : > { %v1302_v1 = vpop.f32.mrf.mxu0  ;;  %v1522_v31 = vpop.f32.mrf.mxu1  ;;  %6471 = vrot.lane.b32.xlu1 %v6470_v27, %s7010_s7 }
 0x1cb   : > { %v1305_v53 = vpop.f32.mrf.mxu0  ;;  %v1525_v62 = vpop.f32.mrf.mxu1  ;;  %1862 = vmatmul.mubr.bf16.gmra.mxu0 %v8137_v54  ;;  %6220 = vmatmul.mubr.msk.bf16.gmra.mxu1 %vm2675_vm7, %v8253_v32 }
 0x1cc   : > { %v8395_v15 = vadd.f32 %v1525_v62, %v1289_v34  ;;  %6223 = vmatprep.mubr.msk.bf16.mxu1 %vm2675_vm7, %v8267_v29  ;;  %5777 = vmatprep.mubr.msk.bf16.mxu0 %vm983_vm5, %v7565_v47  ;;  %v6485_v47 = vpack.i.bf16 %v10131_v14, %v10138_v39  ;;  %v8415_v34 = vld [vmem:[%s7210_s15 + $0x10] sm:$0xff]   ;;  %v8446_v62 = vld [vmem:[%s7210_s15 + $0x20] sm:$0xff]  }
 0x1cd   : > { %v1307_v12 = vpop.f32.mrf.mxu0  ;;  %v1527_v17 = vpop.f32.mrf.mxu1  ;;  %10320 = vst [vmem:[#allocation15_spill] sm:$0xff] %v8415_v34  ;;  %v10132_v57 = vunpack.c.l.bf16 %v8415_v34  ;;  %v10125_v60 = vunpack.c.h.bf16 %v8415_v34  ;;  %10322 = vst [vmem:[#allocation18_spill] sm:$0xff] %v8446_v62  ;;  %v10120_v27 = vunpack.c.l.bf16 %v8446_v62 }
 0x1ce   : > { %6486 = vrot.lane.b32.xlu0 %v6485_v47, %s7010_s7  ;;  %v10113_v12 = vunpack.c.h.bf16 %v8446_v62 }
 0x1cf   : > { %v1308_v54 = vpop.f32.mrf.mxu0  ;;  %v1528_v13 = vpop.f32.mrf.mxu1 }
 0x1d0   : > { %v8408_v19 = vadd.f32 %v1528_v13, %v1292_v20  ;;  %v6480_v20 = vpack.i.bf16 %v10125_v60, %v10132_v57 }
 0x1d1   : > { %v1310_v58 = vpop.f32.mrf.mxu0  ;;  %v1530_v49 = vpop.f32.mrf.mxu1 }
 0x1d2   : > { %6481 = vrot.lane.b32.xlu1 %v6480_v20, %s7010_s7  ;;  %v8467_v20 = vld [vmem:[%s7210_s15 + $0x38] sm:$0xff]  }
 0x1d3   : > { %v1313_v61 = vpop.f32.mrf.mxu0  ;;  %v1533_v55 = vpop.f32.mrf.mxu1  ;;  %1870 = vmatmul.mubr.bf16.gmra.mxu0 %v7882_v24  ;;  %6224 = vmatmul.mubr.msk.bf16.gmra.mxu1 %vm2675_vm7, %v8270_v33  ;;  %10323 = vst [vmem:[#allocation19_spill] sm:$0xff] %v8467_v20 }
 0x1d4   : > { %v8426_v0 = vadd.f32 %v1533_v55, %v1297_v5  ;;  %6227 = vmatprep.mubr.msk.bf16.mxu1 %vm2675_vm7, %v8284_v46  ;;  %6247 = vmatprep.mubr.msk.bf16.mxu0 %vm2675_vm7, %v8180_v42  ;;  %v10126_v5 = vunpack.c.l.bf16 %v8435_v48 }
 0x1d5   : > { %v1315_v21 = vpop.f32.mrf.mxu0  ;;  %v1535_v43 = vpop.f32.mrf.mxu1 }
 0x1d6   : > { %v6495_v42 = vpack.i.bf16 %v10119_v37, %v10126_v5  ;;  %v10112_v21 = vunpack.c.h.bf16 %v8467_v20 }
 0x1d7   : > { %v1316_v24 = vpop.f32.mrf.mxu0  ;;  %v1536_v52 = vpop.f32.mrf.mxu1 }
 0x1d8   : > { %v8439_v1 = vadd.f32 %v1536_v52, %v1300_v9  ;;  %v6490_v9 = vpack.i.bf16 %v10113_v12, %v10120_v27  ;;  %6496 = vrot.lane.b32.xlu0 %v6495_v42, %s7010_s7 }
 0x1d9   : > { %v1318_v31 = vpop.f32.mrf.mxu0  ;;  %v1538_v44 = vpop.f32.mrf.mxu1 }
 0x1da   : > { %6491 = vrot.lane.b32.xlu1 %v6490_v9, %s7010_s7  ;;  %v8478_v44 = vld [vmem:[%s7210_s15 + $0x30] sm:$0xff]  }
 0x1db   : > { %v1321_v17 = vpop.f32.mrf.mxu0  ;;  %v1541_v13 = vpop.f32.mrf.mxu1  ;;  %6228 = vmatmul.mubr.msk.bf16.gmra.mxu1 %vm2675_vm7, %v8287_v25  ;;  %6248 = vmatmul.mubr.msk.bf16.vlgmr.msra.gmra.mxu0 %vm2675_vm7, %v8183_v35  ;;  %10324 = vst [vmem:[#allocation20_spill] sm:$0xff] %v8478_v44  ;;  %v10115_v42 = vunpack.c.l.bf16 %v8478_v44 }
 0x1dc   : > { %v8458_v58 = vadd.f32 %v1541_v13, %v1305_v53  ;;  %6231 = vmatprep.mubr.msk.bf16.mxu1 %vm2675_vm7, %v8301_v59  ;;  %6251 = vmatprep.mubr.msk.bf16.mxu0 %vm2675_vm7, %v8207_v11  ;;  %v10116_v53 = vunpack.c.l.bf16 %v8467_v20  ;;  %v10114_v13 = vunpack.c.h.bf16 %v8478_v44 }
 0x1dd   : > { %v1323_v49 = vpop.f32.mrf.mxu0  ;;  %v1543_v47 = vpop.f32.mrf.mxu1 }
 0x1de   : > { %v6505_v11 = vpack.i.bf16 %v10112_v21, %v10116_v53 }
 0x1df   : > { %v1324_v35 = vpop.f32.mrf.mxu0  ;;  %v1544_v55 = vpop.f32.mrf.mxu1 }
 0x1e0   : > { %v8471_v43 = vadd.f32 %v1544_v55, %v1308_v54  ;;  %v6500_v54 = vpack.i.bf16 %v10114_v13, %v10115_v42  ;;  %6506 = vrot.lane.b32.xlu0 %v6505_v11, %s7010_s7  ;;  %v8508_v11 = vld [vmem:[%s7210_s15 + $0x40] sm:$0xff]  }
 0x1e1   : > { %v1326_v52 = vpop.f32.mrf.mxu0  ;;  %v1546_v31 = vpop.f32.mrf.mxu1  ;;  %10326 = vst [vmem:[#allocation22_spill] sm:$0xff] %v8508_v11 }
 0x1e2   : > { %6501 = vrot.lane.b32.xlu1 %v6500_v54, %s7010_s7  ;;  %v10122_v54 = vunpack.c.l.bf16 %v8508_v11 }
 0x1e3   : > { %v1329_v9 = vpop.f32.mrf.mxu0  ;;  %v1549_v49 = vpop.f32.mrf.mxu1  ;;  %6232 = vmatmul.mubr.msk.bf16.gmra.mxu1 %vm2675_vm7, %v8304_v36  ;;  %6252 = vmatmul.mubr.msk.bf16.gmra.mxu0 %vm2675_vm7, %v8210_v7  ;;  %v8497_v7 = vld [vmem:[%s7210_s15 + $0x48] sm:$0xff]  }
 0x1e4   : > { %v8490_v47 = vadd.f32 %v1549_v49, %v1313_v61  ;;  %6255 = vmatprep.mubr.msk.bf16.mxu0 %vm2675_vm7, %v8230_v4  ;;  %10325 = vst [vmem:[#allocation21_spill] sm:$0xff] %v8497_v7  ;;  %v10118_v12 = vunpack.c.l.bf16 %v8497_v7  ;;  %v10117_v13 = vunpack.c.h.bf16 %v8497_v7 }
 0x1e5   : > { %v1331_v55 = vpop.f32.mrf.mxu0  ;;  %v1551_v52 = vpop.f32.mrf.mxu1 }
 0x1e6   : > { %v6515_v4 = vpack.i.bf16 %v10117_v13, %v10118_v12  ;;  %v10121_v55 = vunpack.c.h.bf16 %v8508_v11 }
 0x1e7   : > { %v1332_v31 = vpop.f32.mrf.mxu0  ;;  %v1552_v21 = vpop.f32.mrf.mxu1 }
 0x1e8   : > { %v8501_v42 = vadd.f32 %v1552_v21, %v1316_v24  ;;  %6516 = vrot.lane.b32.xlu0 %v6515_v4, %s7010_s7  ;;  %v6510_v24 = vpack.i.bf16 %v10121_v55, %v10122_v54 }
 0x1e9   : > { %v1334_v61 = vpop.f32.mrf.mxu0  ;;  %v1554_v49 = vpop.f32.mrf.mxu1 }
 0x1ea   : > { %6511 = vrot.lane.b32.xlu1 %v6510_v24, %s7010_s7 }
 0x1eb   : > { %v1337_v52 = vpop.f32.mrf.mxu0  ;;  %v1557_v53 = vpop.f32.mrf.mxu1  ;;  %6256 = vmatmul.mubr.msk.bf16.gmra.mxu0 %vm2675_vm7, %v8233_v8  ;;  %v8525_v8 = vld [vmem:[%s7210_s15 + $0x58] sm:$0xff]  }
 0x1ec   : > { %v8519_v21 = vadd.f32 %v1557_v53, %v1321_v17  ;;  %6259 = vmatprep.mubr.msk.bf16.mxu0 %vm2675_vm7, %v8250_v45  ;;  %10327 = vst [vmem:[#allocation23_spill] sm:$0xff] %v8525_v8  ;;  %v10124_v4 = vunpack.c.l.bf16 %v8525_v8  ;;  %v10123_v37 = vunpack.c.h.bf16 %v8525_v8  ;;  %v8536_v53 = vld [vmem:[%s7210_s15 + $0x50] sm:$0xff]  }
 0x1ed   : > { %v1339_v61 = vpop.f32.mrf.mxu0  ;;  %v1559_v49 = vpop.f32.mrf.mxu1  ;;  %10328 = vst [vmem:[#allocation24_spill] sm:$0xff] %v8536_v53  ;;  %v10128_v24 = vunpack.c.l.bf16 %v8536_v53 }
 0x1ee   : > { %v6525_v45 = vpack.i.bf16 %v10123_v37, %v10124_v4  ;;  %v10127_v61 = vunpack.c.h.bf16 %v8536_v53 }
 0x1ef   : > { %v1340_v13 = vpop.f32.mrf.mxu0  ;;  %v1560_v12 = vpop.f32.mrf.mxu1 }
 0x1f0   : > { %v8529_v27 = vadd.f32 %v1560_v12, %v1324_v35  ;;  %6526 = vrot.lane.b32.xlu0 %v6525_v45, %s7010_s7  ;;  %v6520_v12 = vpack.i.bf16 %v10127_v61, %v10128_v24 }
 0x1f1   : > { %v1342_v55 = vpop.f32.mrf.mxu0  ;;  %v1562_v17 = vpop.f32.mrf.mxu1 }
 0x1f2   : > { %6521 = vrot.lane.b32.xlu1 %v6520_v12, %s7010_s7 }
 0x1f3   : > { %v1345_v49 = vpop.f32.mrf.mxu0  ;;  %v1565_v54 = vpop.f32.mrf.mxu1  ;;  %6260 = vmatmul.mubr.msk.bf16.gmra.mxu0 %vm2675_vm7, %v8253_v32  ;;  %v8553_v32 = vld [vmem:[%s7210_s15 + $0x68] sm:$0xff]  }
 0x1f4   : > { %v8547_v35 = vadd.f32 %v1565_v54, %v1329_v9  ;;  %6263 = vmatprep.mubr.msk.bf16.mxu0 %vm2675_vm7, %v8267_v29  ;;  %10329 = vst [vmem:[#allocation25_spill] sm:$0xff] %v8553_v32  ;;  %v10130_v45 = vunpack.c.l.bf16 %v8553_v32  ;;  %v10129_v60 = vunpack.c.h.bf16 %v8553_v32  ;;  %v8564_v54 = vld [vmem:[%s7210_s15 + $0x60] sm:$0xff]  }
 0x1f5   : > { %v1347_v55 = vpop.f32.mrf.mxu0  ;;  %v1567_v17 = vpop.f32.mrf.mxu1  ;;  %10330 = vst [vmem:[#allocation26_spill] sm:$0xff] %v8564_v54  ;;  %v10134_v12 = vunpack.c.l.bf16 %v8564_v54 }
 0x1f6   : > { %v6535_v29 = vpack.i.bf16 %v10129_v60, %v10130_v45  ;;  %v10133_v55 = vunpack.c.h.bf16 %v8564_v54 }
 0x1f7   : > { %v1348_v37 = vpop.f32.mrf.mxu0  ;;  %v1568_v4 = vpop.f32.mrf.mxu1 }
 0x1f8   : > { %v8557_v5 = vadd.f32 %v1568_v4, %v1332_v31  ;;  %6536 = vrot.lane.b32.xlu0 %v6535_v29, %s7010_s7  ;;  %v6530_v31 = vpack.i.bf16 %v10133_v55, %v10134_v12 }
 0x1f9   : > { %v1350_v61 = vpop.f32.mrf.mxu0  ;;  %v1570_v9 = vpop.f32.mrf.mxu1 }
 0x1fa   : > { %6531 = vrot.lane.b32.xlu1 %v6530_v31, %s7010_s7 }
 0x1fb   : > { %v1353_v17 = vpop.f32.mrf.mxu0  ;;  %v1573_v24 = vpop.f32.mrf.mxu1  ;;  %6264 = vmatmul.mubr.msk.bf16.gmra.mxu0 %vm2675_vm7, %v8270_v33  ;;  %v8581_v33 = vld [vmem:[%s7210_s15 + $0x78] sm:$0xff]  }
 0x1fc   : > { %v8575_v4 = vadd.f32 %v1573_v24, %v1337_v52  ;;  %6267 = vmatprep.mubr.msk.bf16.mxu0 %vm2675_vm7, %v8284_v46  ;;  %10331 = vst [vmem:[#allocation27_spill] sm:$0xff] %v8581_v33  ;;  %v10136_v29 = vunpack.c.l.bf16 %v8581_v33  ;;  %v10135_v14 = vunpack.c.h.bf16 %v8581_v33  ;;  %v8592_v24 = vld [vmem:[%s7210_s15 + $0x70] sm:$0xff]   ;;  %s9847_s15 = scalar_lea.vmem [#allocation7], %s5629_s14 }
 0x1fd   : > { %v1355_v61 = vpop.f32.mrf.mxu0  ;;  %v1575_v9 = vpop.f32.mrf.mxu1  ;;  %10332 = vst [vmem:[#allocation28_spill] sm:$0xff] %v8592_v24  ;;  %v10141_v31 = vunpack.c.l.bf16 %v8592_v24  ;;  %s5521_s0 = sshll.u32 %s9847_s15, 4  ;;  %s10040_s0 = int_to_ptr.vmem [resolvable:$true] %s5521_s0 }
 0x1fe   : > { %v6545_v46 = vpack.i.bf16 %v10135_v14, %v10136_v29  ;;  %v10140_v61 = vunpack.c.h.bf16 %v8592_v24  ;;  %p6941_p10 = scmp.lt.s32.totalorder %s10040_s0, %s6939_s26 }
 0x1ff   : > { %v1356_v60 = vpop.f32.mrf.mxu0  ;;  %v1576_v45 = vpop.f32.mrf.mxu1 }
 0x200   : > { %v8585_v57 = vadd.f32 %v1576_v45, %v1340_v13  ;;  %6546 = vrot.lane.b32.xlu0 %v6545_v46, %s7010_s7  ;;  %v6540_v13 = vpack.i.bf16 %v10140_v61, %v10141_v31 }
 0x201   : > { %v1358_v55 = vpop.f32.mrf.mxu0  ;;  %v1578_v52 = vpop.f32.mrf.mxu1 }
 0x202   : > { %6541 = vrot.lane.b32.xlu1 %v6540_v13, %s7010_s7 }
 0x203   : > { %v1361_v9 = vpop.f32.mrf.mxu0  ;;  %v1581_v12 = vpop.f32.mrf.mxu1  ;;  %6268 = vmatmul.mubr.msk.bf16.gmra.mxu0 %vm2675_vm7, %v8287_v25 }
 0x204   : > { %v8603_v45 = vadd.f32 %v1581_v12, %v1345_v49  ;;  %6271 = vmatprep.mubr.msk.bf16.mxu0 %vm2675_vm7, %v8301_v59 }
 0x205   : > { %v1363_v55 = vpop.f32.mrf.mxu0  ;;  %v1583_v52 = vpop.f32.mrf.mxu1 }
 0x207   : > { %v1364_v14 = vpop.f32.mrf.mxu0  ;;  %v1584_v29 = vpop.f32.mrf.mxu1 }
 0x208   : > { %v8608_v50 = vadd.f32 %v1584_v29, %v1348_v37 }
 0x209   : > { %v1366_v25 = vpop.f32.mrf.mxu0  ;;  %v1586_v46 = vpop.f32.mrf.mxu1 }
 0x20b   : > { %v1369_v39 = vpop.f32.mrf.mxu0  ;;  %v1589_v41 = vpop.f32.mrf.mxu1  ;;  %6272 = vmatmul.mubr.msk.bf16.gmra.mxu0 %vm2675_vm7, %v8304_v36 }
 0x20c   : > { %v8612_v49 = vadd.f32 %v1589_v41, %v1353_v17  ;;  %6275 = vmatprep.mubr.msk.bf16.mxu0 %vm2675_vm7, %v8318_v22 }
 0x20d   : > { %v1371_v59 = vpop.f32.mrf.mxu0  ;;  %v1591_v12 = vpop.f32.mrf.mxu1 }
 0x20f   : > { %v1372_v55 = vpop.f32.mrf.mxu0  ;;  %v1592_v13 = vpop.f32.mrf.mxu1 }
 0x210   : > { %v8616_v52 = vadd.f32 %v1592_v13, %v1356_v60 }
 0x211   : > { %v1374_v37 = vpop.f32.mrf.mxu0  ;;  %v1594_v29 = vpop.f32.mrf.mxu1 }
 0x213   : > { %v1377_v25 = vpop.f32.mrf.mxu0  ;;  %v1597_v46 = vpop.f32.mrf.mxu1  ;;  %6276 = vmatmul.mubr.msk.bf16.gmra.mxu0 %vm2675_vm7, %v8321_v28 }
 0x214   : > { %v8620_v61 = vadd.f32 %v1597_v46, %v1361_v9  ;;  %6335 = vmatprep.mubr.msk.bf16.mxu0 %vm2675_vm7, %v8321_v28 }
 0x215   : > { %v1379_v36 = vpop.f32.mrf.mxu0  ;;  %v1599_v22 = vpop.f32.mrf.mxu1 }
 0x217   : > { %v1380_v41 = vpop.f32.mrf.mxu0  ;;  %v1600_v17 = vpop.f32.mrf.mxu1 }
 0x218   : > { %v8624_v59 = vadd.f32 %v1600_v17, %v1364_v14 }
 0x219   : > { %v1382_v60 = vpop.f32.mrf.mxu0  ;;  %v1602_v12 = vpop.f32.mrf.mxu1 }
 0x21b   : > { %v1605_v13 = vpop.f32.mrf.mxu1  ;;  %v1751_v37 = vpop.f32.mrf.mxu0 }
 0x21c   : > { %v8626_v29 = vadd.f32 %v1605_v13, %v1369_v39  ;;  %v8629_v31 = vadd.f32 %v1751_v37, %v8333_v6 }
 0x21d   : > { %v1607_v9 = vpop.f32.mrf.mxu1  ;;  %v1753_v46 = vpop.f32.mrf.mxu0 }
 0x21f   : > { %v1608_v38 = vpop.f32.mrf.mxu1  ;;  %v1754_v63 = vpop.f32.mrf.mxu0 }
 0x220   : > { %v8631_v33 = vadd.f32 %v1608_v38, %v1372_v55  ;;  %v8634_v36 = vadd.f32 %v1754_v63, %v8339_v18 }
 0x221   : > { %v1610_v14 = vpop.f32.mrf.mxu1  ;;  %v1756_v22 = vpop.f32.mrf.mxu0 }
 0x223   : > { %v1613_v17 = vpop.f32.mrf.mxu1  ;;  %v1759_v60 = vpop.f32.mrf.mxu0 }
 0x224   : > { %v8636_v12 = vadd.f32 %v1613_v17, %v1377_v25  ;;  %v8639_v39 = vadd.f32 %v1759_v60, %v8344_v56 }
 0x225   : > { %v1615_v6 = vpop.f32.mrf.mxu1  ;;  %v1761_v13 = vpop.f32.mrf.mxu0 }
 0x227   : > { %v1616_v37 = vpop.f32.mrf.mxu1  ;;  %v1762_v9 = vpop.f32.mrf.mxu0 }
 0x228   : > { %v8641_v46 = vadd.f32 %v1616_v37, %v1380_v41  ;;  %v8644_v38 = vadd.f32 %v1762_v9, %v8350_v51 }
 0x229   : > { %v1618_v18 = vpop.f32.mrf.mxu1  ;;  %v1764_v63 = vpop.f32.mrf.mxu0 }
 0x22b   : > { %v1767_v55 = vpop.f32.mrf.mxu0  ;;  %v8646_v14 = vpop.f32.mrf.mxu1 }
 0x22c   : > { %v8649_v25 = vadd.f32 %v1767_v55, %v8355_v26 }
 0x22d   : > { %v1769_v22 = vpop.f32.mrf.mxu0  ;;  %v8651_v56 = vpop.f32.mrf.mxu1 }
 0x22f   : > { %v1770_v17 = vpop.f32.mrf.mxu0  ;;  %v8653_v60 = vpop.f32.mrf.mxu1 }
 0x230   : > { %v8656_v41 = vadd.f32 %v1770_v17, %v8361_v30 }
 0x231   : > { %v1772_v6 = vpop.f32.mrf.mxu0  ;;  %v8658_v51 = vpop.f32.mrf.mxu1 }
 0x233   : > { %v1775_v13 = vpop.f32.mrf.mxu0  ;;  %v8660_v37 = vpop.f32.mrf.mxu1 }
 0x234   : > { %v8663_v9 = vadd.f32 %v1775_v13, %v8366_v16 }
 0x235   : > { %v1777_v26 = vpop.f32.mrf.mxu0  ;;  %v8665_v18 = vpop.f32.mrf.mxu1 }
 0x237   : > { %v1778_v63 = vpop.f32.mrf.mxu0  ;;  %v8667_v55 = vpop.f32.mrf.mxu1 }
 0x238   : > { %v8670_v22 = vadd.f32 %v1778_v63, %v8377_v3 }
 0x239   : > { %v1780_v30 = vpop.f32.mrf.mxu0  ;;  %v8672_v17 = vpop.f32.mrf.mxu1 }
 0x23b   : > { %v1783_v6 = vpop.f32.mrf.mxu0  ;;  %v8674_v24 = vpop.f32.mrf.mxu1 }
 0x23c   : > { %v8677_v54 = vadd.f32 %v1783_v6, %v8395_v15 }
 0x23d   : > { %v1785_v16 = vpop.f32.mrf.mxu0  ;;  %v8679_v13 = vpop.f32.mrf.mxu1 }
 0x23f   : > { %v1786_v26 = vpop.f32.mrf.mxu0  ;;  %v8681_v32 = vpop.f32.mrf.mxu1 }
 0x240   : > { %v8684_v53 = vadd.f32 %v1786_v26, %v8408_v19 }
 0x241   : > { %v1788_v3 = vpop.f32.mrf.mxu0  ;;  %v8686_v63 = vpop.f32.mrf.mxu1 }
 0x242   : > { %10333 = vst [vmem:[#allocation29_spill] sm:$0xff] %v8686_v63 }
 0x243   : > { %v1791_v30 = vpop.f32.mrf.mxu0  ;;  %v8688_v8 = vpop.f32.mrf.mxu1 }
 0x244   : > { %10334 = vst [vmem:[#allocation30_spill] sm:$0xff] %v8688_v8  ;;  %v8691_v11 = vadd.f32 %v1791_v30, %v8426_v0 }
 0x245   : > { %v1793_v15 = vpop.f32.mrf.mxu0  ;;  %v8693_v6 = vpop.f32.mrf.mxu1 }
 0x246   : > { %10335 = vst [vmem:[#allocation31_spill] sm:$0xff] %v8693_v6 }
 0x247   : > { %v1794_v16 = vpop.f32.mrf.mxu0  ;;  %v8695_v7 = vpop.f32.mrf.mxu1 }
 0x248   : > { %10336 = vst [vmem:[#allocation32_spill] sm:$0xff] %v8695_v7  ;;  %v8698_v44 = vadd.f32 %v1794_v16, %v8439_v1 }
 0x249   : > { %v1796_v19 = vpop.f32.mrf.mxu0  ;;  %v8700_v26 = vpop.f32.mrf.mxu1 }
 0x24a   : > { %10337 = vst [vmem:[#allocation33_spill] sm:$0xff] %v8700_v26 }
 0x24b   : > { %v1799_v3 = vpop.f32.mrf.mxu0  ;;  %v8702_v20 = vpop.f32.mrf.mxu1 }
 0x24c   : > { %10338 = vst [vmem:[#allocation34_spill] sm:$0xff] %v8702_v20  ;;  %v8705_v62 = vadd.f32 %v1799_v3, %v8458_v58 }
 0x24d   : > { %v1801_v0 = vpop.f32.mrf.mxu0  ;;  %v8707_v30 = vpop.f32.mrf.mxu1 }
 0x24e   : > { %10339 = vst [vmem:[#allocation35_spill] sm:$0xff] %v8707_v30 }
 0x24f   : > { %v1802_v15 = vpop.f32.mrf.mxu0  ;;  %v8709_v48 = vpop.f32.mrf.mxu1 }
 0x250   : > { %10340 = vst [vmem:[#allocation36_spill] sm:$0xff] %v8709_v48  ;;  %v8712_v34 = vadd.f32 %v1802_v15, %v8471_v43 }
 0x251   : > { %v1804_v1 = vpop.f32.mrf.mxu0  ;;  %v8714_v16 = vpop.f32.mrf.mxu1 }
 0x252   : > { %10341 = vst [vmem:[#allocation37_spill] sm:$0xff] %v8714_v16 }
 0x253   : > { %v1807_v19 = vpop.f32.mrf.mxu0  ;;  %v8716_v40 = vpop.f32.mrf.mxu1 }
 0x254   : > { %10342 = vst [vmem:[#allocation38_spill] sm:$0xff] %v8716_v40  ;;  %v8719_v23 = vadd.f32 %v1807_v19, %v8490_v47 }
 0x255   : > { %v1809_v58 = vpop.f32.mrf.mxu0  ;;  %v8721_v3 = vpop.f32.mrf.mxu1 }
 0x256   : > { %10343 = vst [vmem:[#allocation39_spill] sm:$0xff] %v8721_v3 }
 0x257   : > { %v1810_v0 = vpop.f32.mrf.mxu0  ;;  %v8723_v10 = vpop.f32.mrf.mxu1 }
 0x258   : > { %10344 = vst [vmem:[#allocation40_spill] sm:$0xff] %v8723_v10  ;;  %v8726_v28 = vadd.f32 %v1810_v0, %v8501_v42 }
 0x259   : > { %v1812_v43 = vpop.f32.mrf.mxu0  ;;  %v8728_v15 = vpop.f32.mrf.mxu1 }
 0x25a   : > { %10345 = vst [vmem:[#allocation41_spill] sm:$0xff] %v8728_v15 }
 0x25b   : > { %v1815_v1 = vpop.f32.mrf.mxu0  ;;  %v8730_v2 = vpop.f32.mrf.mxu1 }
 0x25c   : > { %10346 = vst [vmem:[#allocation42_spill] sm:$0xff] %v8730_v2  ;;  %v8733_v40 = vadd.f32 %v1815_v1, %v8519_v21 }
 0x25d   : > { %v1817_v47 = vpop.f32.mrf.mxu0  ;;  %v8735_v19 = vpop.f32.mrf.mxu1 }
 0x25e   : > { %10347 = vst [vmem:[#allocation43_spill] sm:$0xff] %v8735_v19 }
 0x25f   : > { %v1818_v58 = vpop.f32.mrf.mxu0  ;;  %v8737_v3 = vpop.f32.mrf.mxu1 }
 0x260   : > { %10348 = vst [vmem:[#allocation44_spill] sm:$0xff] %v8737_v3  ;;  %v8740_v10 = vadd.f32 %v1818_v58, %v8529_v27 }
 0x261   : > { %v1820_v42 = vpop.f32.mrf.mxu0  ;;  %v8742_v0 = vpop.f32.mrf.mxu1 }
 0x262   : > { %10349 = vst [vmem:[#allocation45_spill] sm:$0xff] %v8742_v0 }
 0x263   : > { %v1823_v43 = vpop.f32.mrf.mxu0  ;;  %v8744_v15 = vpop.f32.mrf.mxu1 }
 0x264   : > { %10350 = vst [vmem:[#allocation46_spill] sm:$0xff] %v8744_v15  ;;  %v8747_v2 = vadd.f32 %v1823_v43, %v8547_v35 }
 0x265   : > { %v1825_v21 = vpop.f32.mrf.mxu0  ;;  %v8749_v1 = vpop.f32.mrf.mxu1 }
 0x266   : > { %10351 = vst [vmem:[#allocation47_spill] sm:$0xff] %v8749_v1 }
 0x267   : > { %v1826_v47 = vpop.f32.mrf.mxu0  ;;  %v8751_v19 = vpop.f32.mrf.mxu1 }
 0x268   : > { %10352 = vst [vmem:[#allocation48_spill] sm:$0xff] %v8751_v19  ;;  %v8754_v3 = vadd.f32 %v1826_v47, %v8557_v5 }
 0x269   : > { %v1828_v27 = vpop.f32.mrf.mxu0  ;;  %v8756_v58 = vpop.f32.mrf.mxu1 }
 0x26a   : > { %10353 = vst [vmem:[#allocation49_spill] sm:$0xff] %v8756_v58 }
 0x26b   : > { %v1831_v42 = vpop.f32.mrf.mxu0  ;;  %v6205_v0 = vpop.f32.mrf.mxu1 }
 0x26c   : > { %v8759_v16 = vadd.f32 %v1831_v42, %v8575_v4 }
 0x26d   : > { %v1833_v15 = vpop.f32.mrf.mxu0  ;;  %v2941_v35 = vpop.f32.mrf.mxu1 }
 0x26f   : > { %v1834_v43 = vpop.f32.mrf.mxu0  ;;  %v8761_v21 = vpop.f32.mrf.mxu1 }
 0x270   : > { %v8764_v1 = vadd.f32 %v1834_v43, %v8585_v57 }
 0x271   : > { %v1836_v19 = vpop.f32.mrf.mxu0  ;;  %v8766_v48 = vpop.f32.mrf.mxu1 }
 0x273   : > { %v1839_v5 = vpop.f32.mrf.mxu0  ;;  %v8768_v47 = vpop.f32.mrf.mxu1 }
 0x274   : > { %v8771_v27 = vadd.f32 %v1839_v5, %v8603_v45 }
 0x275   : > { %v1841_v58 = vpop.f32.mrf.mxu0  ;;  %v8773_v4 = vpop.f32.mrf.mxu1 }
 0x276   : > { %10354 = vst [vmem:[#allocation50_spill] sm:$0xff] %v8771_v27 }
 0x277   : > { %v1842_v15 = vpop.f32.mrf.mxu0  ;;  %v8775_v42 = vpop.f32.mrf.mxu1 }
 0x278   : > { %v8778_v30 = vadd.f32 %v1842_v15, %v8608_v50 }
 0x279   : > { %v1844_v57 = vpop.f32.mrf.mxu0  ;;  %v8780_v43 = vpop.f32.mrf.mxu1 }
 0x27a   : > { %10355 = vst [vmem:[#allocation51_spill] sm:$0xff] %v8778_v30 }
 0x27b   : > { %v1847_v19 = vpop.f32.mrf.mxu0  ;;  %v8782_v20 = vpop.f32.mrf.mxu1 }
 0x27c   : > { %v8785_v26 = vadd.f32 %v1847_v19, %v8612_v49 }
 0x27d   : > { %v1849_v45 = vpop.f32.mrf.mxu0  ;;  %v8787_v5 = vpop.f32.mrf.mxu1 }
 0x27e   : > { %10356 = vst [vmem:[#allocation52_spill] sm:$0xff] %v8785_v26 }
 0x27f   : > { %v1850_v58 = vpop.f32.mrf.mxu0  ;;  %v8789_v7 = vpop.f32.mrf.mxu1 }
 0x280   : > { %v8792_v6 = vadd.f32 %v1850_v58, %v8616_v52 }
 0x281   : > { %v1852_v50 = vpop.f32.mrf.mxu0  ;;  %v8794_v15 = vpop.f32.mrf.mxu1 }
 0x282   : > { %10357 = vst [vmem:[#allocation53_spill] sm:$0xff] %v8794_v15 }
 0x283   : > { %v1855_v57 = vpop.f32.mrf.mxu0  ;;  %v8799_v63 = vpop.f32.mrf.mxu1 }
 0x284   : > { %v8797_v8 = vadd.f32 %v1855_v57, %v8620_v61 }
 0x285   : > { %v1857_v49 = vpop.f32.mrf.mxu0  ;;  %v8801_v45 = vpop.f32.mrf.mxu1 }
 0x286   : > { %10358 = vst [vmem:[#allocation54_spill] sm:$0xff] %v8797_v8  ;;  %10359 = vst [vmem:[#allocation55_spill] sm:$0xff] %v8801_v45 }
 0x287   : > { %v1858_v19 = vpop.f32.mrf.mxu0  ;;  %v8806_v52 = vpop.f32.mrf.mxu1 }
 0x288   : > { %v8804_v26 = vadd.f32 %v1858_v19, %v8624_v59 }
 0x289   : > { %v1860_v30 = vpop.f32.mrf.mxu0  ;;  %v8811_v61 = vpop.f32.mrf.mxu1 }
 0x28b   : > { %v1863_v27 = vpop.f32.mrf.mxu0  ;;  %v8816_v45 = vpop.f32.mrf.mxu1 }
 0x28c   : > { %v8809_v58 = vadd.f32 %v1863_v27, %v8626_v29  ;;  %v8824_v29 = vld [vmem:[%s10090_s5] ss:$0 sm:$0xff] }
 0x28d   : > { %v1865_v50 = vpop.f32.mrf.mxu0  ;;  %v8826_v27 = vpop.f32.mrf.mxu1 }
 0x28f   : > { %v1866_v15 = vpop.f32.mrf.mxu0 }
 0x290   : > { %v8814_v57 = vadd.f32 %v1866_v15, %v8631_v33  ;;  %v2950_v15 = vadd.f32 %v6205_v0, %v8646_v14  ;;  %v8850_v14 = vadd.f32 %v8824_v29, %v8644_v38  ;;  %v8854_v0 = vadd.f32 %v8824_v29, %v8649_v25 }
 0x291   : > { %v1868_v49 = vpop.f32.mrf.mxu0  ;;  %v8869_v38 = vadd.f32 %v8824_v29, %v8670_v22  ;;  %v8873_v25 = vadd.f32 %v8824_v29, %v8677_v54  ;;  %v8885_v22 = vadd.f32 %v8824_v29, %v8684_v53  ;;  %v8889_v54 = vadd.f32 %v8824_v29, %v8691_v11 }
 0x292   : > { %10360 = vst [vmem:[#allocation56_spill] sm:$0xff] %v8814_v57  ;;  %v8832_v49 = vpop.permute.xlu0 %6476  ;;  %v8834_v57 = vpop.permute.xlu1 %6471  ;;  %10365 = vst [vmem:[#allocation61_spill] sm:$0xff] %v8850_v14  ;;  %v8899_v53 = vadd.f32 %v8824_v29, %v8698_v44  ;;  %v2945_v11 = vadd.f32 %v8766_v48, %v8658_v51  ;;  %v8912_v44 = vadd.f32 %v8824_v29, %v8705_v62 }
 0x293   : > { %v1871_v8 = vpop.f32.mrf.mxu0  ;;  %10366 = vst [vmem:[#allocation62_spill] sm:$0xff] %v8854_v0  ;;  %10370 = vst [vmem:[#allocation66_spill] sm:$0xff] %v8869_v38  ;;  %v8924_v62 = vadd.f32 %v8824_v29, %v8712_v34  ;;  %v8936_v34 = vadd.f32 %v8824_v29, %v8719_v23  ;;  %v8949_v23 = vadd.f32 %v8824_v29, %v8733_v40 }
 0x294   : > { %v8819_v59 = vadd.f32 %v1871_v8, %v8636_v12  ;;  %v8838_v8 = vadd.f32 %v8824_v29, %v8629_v31  ;;  %v8842_v12 = vadd.f32 %v8824_v29, %v8634_v36  ;;  %v2942_v31 = vadd.f32 %v2941_v35, %v8651_v56  ;;  %10371 = vst [vmem:[#allocation67_spill] sm:$0xff] %v8873_v25 }
 0x295   : > { %v1873_v30 = vpop.f32.mrf.mxu0  ;;  %v8861_v36 = vadd.f32 %v8824_v29, %v8656_v41  ;;  %v2953_v35 = vadd.f32 %v8761_v21, %v8653_v60  ;;  %10372 = vst [vmem:[#allocation68_spill] sm:$0xff] %v8885_v22  ;;  %10373 = vst [vmem:[#allocation69_spill] sm:$0xff] %v8889_v54  ;;  %v2958_v21 = vadd.f32 %v8773_v4, %v8665_v18 }
 0x296   : > { %10361 = vst [vmem:[#allocation57_spill] sm:$0xff] %v8819_v59  ;;  %10363 = vst [vmem:[#allocation59_spill] sm:$0xff] %v8842_v12  ;;  %v8846_v30 = vadd.f32 %v8824_v29, %v8639_v39  ;;  %v8865_v39 = vadd.f32 %v8824_v29, %v8663_v9  ;;  %v8881_v9 = vpop.permute.xlu1 %6481  ;;  %v2969_v18 = vadd.f32 %v8775_v42, %v8667_v55 }
 0x297   : > { %v1874_v19 = vpop.f32.mrf.mxu0  ;;  %10368 = vst [vmem:[#allocation64_spill] sm:$0xff] %v8861_v36  ;;  %10374 = vst [vmem:[#allocation70_spill] sm:$0xff] %v8899_v53  ;;  %v8942_v60 = vadd.f32 %v8824_v29, %v8726_v28  ;;  %v2982_v28 = vadd.f32 %v8782_v20, %v8674_v24  ;;  %v8963_v40 = vadd.f32 %v8824_v29, %v8747_v2 }
 0x298   : > { %v8829_v50 = vadd.f32 %v1874_v19, %v8641_v46  ;;  %10364 = vst [vmem:[#allocation60_spill] sm:$0xff] %v8846_v30  ;;  %v8857_v19 = vpop.f32.mrf.mxu1  ;;  %10369 = vst [vmem:[#allocation65_spill] sm:$0xff] %v8865_v39  ;;  %v8976_v2 = vadd.f32 %v8824_v29, %v8759_v16  ;;  %v10387_v16 = vld [vmem:[#allocation51_spill] sm:$0xff] }
 0x299   : > { %v1876_v33 = vpop.f32.mrf.mxu0  ;;  %10367 = vst [vmem:[#allocation63_spill] sm:$0xff] %v8857_v19  ;;  %10375 = vst [vmem:[#allocation71_spill] sm:$0xff] %v8912_v44 }
 0x29a   : > { %10362 = vst [vmem:[#allocation58_spill] sm:$0xff] %v8829_v50  ;;  %v8879_v50 = vpop.permute.xlu0 %6486  ;;  %10376 = vst [vmem:[#allocation72_spill] sm:$0xff] %v8924_v62 }
 0x29b   : > { %v6249_v46 = vpop.f32.mrf.mxu0  ;;  %10377 = vst [vmem:[#allocation73_spill] sm:$0xff] %v8936_v34  ;;  %10378 = vst [vmem:[#allocation74_spill] sm:$0xff] %v8942_v60 }
 0x29c   : > { %v3280_v33 = vadd.f32 %v6249_v46, %v2950_v15  ;;  %10379 = vst [vmem:[#allocation75_spill] sm:$0xff] %v8949_v23  ;;  %10381 = vst [vmem:[#allocation77_spill] sm:$0xff] %v8963_v40 }
 0x29d   : > { %v3151_v56 = vpop.f32.mrf.mxu0  ;;  %10383 = vst [vmem:[#allocation79_spill] sm:$0xff] %v8976_v2 }
 0x29e   : > { %v3312_v15 = vadd.f32 %v3280_v33, %v8846_v30  ;;  %v3278_v41 = vadd.f32 %v3151_v56, %v2942_v31  ;;  %v8893_v31 = vpop.f32.mrf.mxu1 }
 0x29f   : > { %v6250_v59 = vpop.f32.mrf.mxu0 }
 0x2a0   : > { %v5887_v33 = vmul.f32 -1.442695, %v3312_v15  ;;  %v3310_v56 = vadd.f32 %v3278_v41, %v8838_v8  ;;  %v3281_v46 = vadd.f32 %v6250_v59, %v2953_v35  ;;  %v2966_v15 = vadd.f32 %v8768_v47, %v8660_v37  ;;  %v8908_v35 = vpop.permute.xlu0 %6496  ;;  %v8918_v37 = vpop.f32.mrf.mxu1 }
 0x2a1   : > { %v3154_v19 = vpop.f32.mrf.mxu0 }
 0x2a2   : > { %6670 = vpow2.f32 %v5887_v33  ;;  %v5885_v41 = vmul.f32 -1.442695, %v3310_v56  ;;  %v3313_v59 = vadd.f32 %v3281_v46, %v8850_v14  ;;  %v3279_v30 = vadd.f32 %v3154_v19, %v2945_v11  ;;  %v8920_v33 = vpop.permute.xlu1 %6491  ;;  %v8944_v55 = vpop.f32.mrf.mxu1  ;;  %v10394_v11 = vld [vmem:[#allocation30_spill] sm:$0xff] }
 0x2a3   : > { %v6253_v48 = vpop.f32.mrf.mxu0 }
 0x2a4   : > { %6672 = vpow2.f32 %v5885_v41  ;;  %v5888_v47 = vmul.f32 -1.442695, %v3313_v59  ;;  %v3284_v46 = vadd.f32 %v6253_v48, %v2966_v15  ;;  %v3311_v19 = vadd.f32 %v3279_v30, %v8842_v12  ;;  %v8932_v41 = vpop.permute.xlu0 %6506  ;;  %v8968_v20 = vpop.f32.mrf.mxu1 }
 0x2a5   : > { %v3167_v56 = vpop.f32.mrf.mxu0 }
 0x2a6   : > { %6674 = vpow2.f32 %v5888_v47  ;;  %v3316_v4 = vadd.f32 %v3284_v46, %v8865_v39  ;;  %v3282_v15 = vadd.f32 %v3167_v56, %v2958_v21  ;;  %v5886_v59 = vmul.f32 -1.442695, %v3311_v19 }
 0x2a7   : > { %v6254_v30 = vpop.f32.mrf.mxu0  ;;  %v2961_v46 = vadd.f32 %v8780_v43, %v8672_v17 }
 0x2a8   : > { %v5891_v42 = vmul.f32 -1.442695, %v3316_v4  ;;  %v3314_v21 = vadd.f32 %v3282_v15, %v8854_v0  ;;  %v3285_v47 = vadd.f32 %v6254_v30, %v2969_v18  ;;  %6676 = vpow2.f32 %v5886_v59  ;;  %v10393_v15 = vld [vmem:[#allocation53_spill] sm:$0xff] }
 0x2a9   : > { %v3170_v19 = vpop.f32.mrf.mxu0  ;;  %v8959_v18 = vadd.f32 %v8824_v29, %v8740_v10  ;;  %v2974_v59 = vadd.f32 %v8787_v5, %v8679_v13  ;;  %v8972_v10 = vadd.f32 %v8824_v29, %v8754_v3  ;;  %v2985_v5 = vadd.f32 %v8789_v7, %v8681_v32  ;;  %v8998_v7 = vpop.f32.mrf.mxu1 }
 0x2aa   : > { %6678 = vpow2.f32 %v5891_v42  ;;  %v5889_v48 = vmul.f32 -1.442695, %v3314_v21  ;;  %v3317_v4 = vadd.f32 %v3285_v47, %v8869_v38  ;;  %v3283_v17 = vadd.f32 %v3170_v19, %v2961_v46  ;;  %v10385_v46 = vld [vmem:[#allocation50_spill] sm:$0xff] }
 0x2ab   : > { %10380 = vst [vmem:[#allocation76_spill] sm:$0xff] %v8959_v18  ;;  %v6257_v43 = vpop.f32.mrf.mxu0  ;;  %10382 = vst [vmem:[#allocation78_spill] sm:$0xff] %v8972_v10  ;;  %v8980_v42 = vadd.f32 %v8824_v29, %v8764_v1  ;;  %v8988_v19 = vadd.f32 %v8824_v29, %v10385_v46  ;;  %v10389_v1 = vld [vmem:[#allocation52_spill] sm:$0xff]  ;;  %v9003_v46 = vadd.f32 %v8824_v29, %v8792_v6  ;;  %v10397_v6 = vld [vmem:[#allocation31_spill] sm:$0xff] }
 0x2ac   : > { %6680 = vpow2.f32 %v5889_v48  ;;  %v5892_v24 = vmul.f32 -1.442695, %v3317_v4  ;;  %v3288_v30 = vadd.f32 %v6257_v43, %v2982_v28  ;;  %v3315_v21 = vadd.f32 %v3283_v17, %v8861_v36  ;;  %v9016_v36 = vpop.f32.mrf.mxu1 }
 0x2ad   : > { %10384 = vst [vmem:[#allocation80_spill] sm:$0xff] %v8980_v42  ;;  %v3183_v13 = vpop.f32.mrf.mxu0  ;;  %10386 = vst [vmem:[#allocation50_spill] sm:$0xff] %v8988_v19  ;;  %v8992_v28 = vadd.f32 %v8824_v29, %v10387_v16  ;;  %v8996_v4 = vadd.f32 %v8824_v29, %v10389_v1  ;;  %v10392_v16 = vld [vmem:[#allocation29_spill] sm:$0xff]  ;;  %v2998_v1 = vadd.f32 %v8799_v63, %v10394_v11 }
 0x2ae   : > { %6682 = vpow2.f32 %v5892_v24  ;;  %v3320_v48 = vadd.f32 %v3288_v30, %v8889_v54  ;;  %v3286_v47 = vadd.f32 %v3183_v13, %v2974_v59  ;;  %v5890_v17 = vmul.f32 -1.442695, %v3315_v21  ;;  %10391 = vst [vmem:[#allocation81_spill] sm:$0xff] %v9003_v46 }
 0x2af   : > { %v6671_v3 = vpop.eup %6670  ;;  %10388 = vst [vmem:[#allocation51_spill] sm:$0xff] %v8992_v28  ;;  %10390 = vst [vmem:[#allocation52_spill] sm:$0xff] %v8996_v4  ;;  %v6258_v43 = vpop.f32.mrf.mxu0  ;;  %v2977_v56 = vadd.f32 %v10393_v15, %v10392_v16 }
 0x2b0   : > { %v3440_v32 = vadd.f32 1.0, %v6671_v3  ;;  %v5895_v24 = vmul.f32 -1.442695, %v3320_v48  ;;  %v3318_v59 = vadd.f32 %v3286_v47, %v8873_v25  ;;  %v3289_v30 = vadd.f32 %v6258_v43, %v2985_v5  ;;  %v10395_v5 = vld [vmem:[#allocation54_spill] sm:$0xff]  ;;  %v10398_v25 = vld [vmem:[#allocation55_spill] sm:$0xff] }
 0x2b1   : > { %v6673_v13 = vpop.eup %6672  ;;  %6684 = vpow2.f32 %v5890_v17  ;;  %v3186_v21 = vpop.f32.mrf.mxu0  ;;  %v9012_v43 = vadd.f32 %v8824_v29, %v10395_v5  ;;  %v2990_v54 = vadd.f32 %v10398_v25, %v10397_v6 }
 0x2b2   : > { %6686 = vrcp.f32 %v3440_v32  ;;  %v3438_v51 = vadd.f32 1.0, %v6673_v13  ;;  %v5893_v3 = vmul.f32 -1.442695, %v3318_v59  ;;  %v3321_v48 = vadd.f32 %v3289_v30, %v8899_v53  ;;  %v10400_v59 = vld [vmem:[#allocation32_spill] sm:$0xff] }
 0x2b3   : > { %v6675_v47 = vpop.eup %6674  ;;  %10396 = vst [vmem:[#allocation29_spill] sm:$0xff] %v9012_v43  ;;  %6688 = vpow2.f32 %v5895_v24  ;;  %v3287_v15 = vadd.f32 %v3186_v21, %v2977_v56  ;;  %v6261_v16 = vpop.f32.mrf.mxu0  ;;  %v9020_v32 = vadd.f32 %v8824_v29, %v8804_v26  ;;  %v3001_v30 = vadd.f32 %v8806_v52, %v10400_v59  ;;  %v10401_v56 = vld [vmem:[#allocation33_spill] sm:$0xff] }
 0x2b4   : > { %6690 = vrcp.f32 %v3438_v51  ;;  %v3441_v63 = vadd.f32 1.0, %v6675_v47  ;;  %v5896_v11 = vmul.f32 -1.442695, %v3321_v48  ;;  %v3292_v17 = vadd.f32 %v6261_v16, %v2998_v1  ;;  %v10402_v47 = vld [vmem:[#allocation34_spill] sm:$0xff] }
 0x2b5   : > { %10399 = vst [vmem:[#allocation53_spill] sm:$0xff] %v9020_v32  ;;  %6692 = vpow2.f32 %v5893_v3  ;;  %v3319_v13 = vadd.f32 %v3287_v15, %v8885_v22  ;;  %v3199_v25 = vpop.f32.mrf.mxu0  ;;  %v6677_v24 = vpop.eup %6676  ;;  %v2993_v21 = vadd.f32 %v8811_v61, %v10401_v56  ;;  %v3014_v26 = vadd.f32 %v8816_v45, %v10402_v47  ;;  %v10406_v56 = vld [vmem:[#allocation63_spill] sm:$0xff] }
 0x2b6   : > { %6694 = vrcp.f32 %v3441_v63  ;;  %v3324_v51 = vadd.f32 %v3292_v17, %v8936_v34  ;;  %v3290_v48 = vadd.f32 %v3199_v25, %v2990_v54  ;;  %v3439_v5 = vadd.f32 1.0, %v6677_v24  ;;  %v3037_v15 = vpop.f32.mrf.mxu1  ;;  %v10404_v17 = vld [vmem:[#allocation35_spill] sm:$0xff]  ;;  %v10405_v25 = vld [vmem:[#allocation36_spill] sm:$0xff] }
 0x2b7   : > { %v6679_v1 = vpop.eup %6678  ;;  %6696 = vpow2.f32 %v5896_v11  ;;  %v5894_v6 = vmul.f32 -1.442695, %v3319_v13  ;;  %v6262_v52 = vpop.f32.mrf.mxu0  ;;  %v9032_v3 = vadd.f32 %v8824_v29, %v8809_v58  ;;  %v3006_v54 = vadd.f32 %v8826_v27, %v10404_v17  ;;  %v10407_v24 = vld [vmem:[#allocation56_spill] sm:$0xff] }
 0x2b8   : > { %v3444_v16 = vadd.f32 1.0, %v6679_v1  ;;  %v3322_v61 = vadd.f32 %v3290_v48, %v8912_v44  ;;  %v3293_v63 = vadd.f32 %v6262_v52, %v3001_v30  ;;  %v3017_v45 = vadd.f32 %v10406_v56, %v10405_v25  ;;  %v10409_v30 = vld [vmem:[#allocation37_spill] sm:$0xff]  ;;  %v9046_v25 = vpop.f32.mrf.mxu1 }
 0x2b9   : > { %10403 = vst [vmem:[#allocation30_spill] sm:$0xff] %v9032_v3  ;;  %v6681_v59 = vpop.eup %6680  ;;  %6698 = vrcp.f32 %v3439_v5  ;;  %v5899_v11 = vmul.f32 -1.442695, %v3324_v51  ;;  %v3202_v13 = vpop.f32.mrf.mxu0  ;;  %v9041_v47 = vadd.f32 %v8824_v29, %v10407_v24  ;;  %v3009_v52 = vadd.f32 %v8893_v31, %v10409_v30  ;;  %v10410_v24 = vld [vmem:[#allocation57_spill] sm:$0xff] }
 0x2ba   : > { %6700 = vrcp.f32 %v3444_v16  ;;  %v3442_v58 = vadd.f32 1.0, %v6681_v59  ;;  %v3325_v1 = vadd.f32 %v3293_v63, %v8942_v60  ;;  %v5897_v27 = vmul.f32 -1.442695, %v3322_v61  ;;  %v10412_v59 = vld [vmem:[#allocation38_spill] sm:$0xff] }
 0x2bb   : > { %10408 = vst [vmem:[#allocation54_spill] sm:$0xff] %v9041_v47  ;;  %v6683_v48 = vpop.eup %6682  ;;  %6702 = vpow2.f32 %v5894_v6  ;;  %v3291_v17 = vadd.f32 %v3202_v13, %v2993_v21  ;;  %v6265_v44 = vpop.f32.mrf.mxu0  ;;  %v9050_v16 = vadd.f32 %v8824_v29, %v10410_v24  ;;  %v3030_v63 = vadd.f32 %v8918_v37, %v10412_v59  ;;  %v10413_v21 = vld [vmem:[#allocation39_spill] sm:$0xff] }
 0x2bc   : > { %6704 = vrcp.f32 %v3442_v58  ;;  %v3445_v51 = vadd.f32 1.0, %v6683_v48  ;;  %v5900_v5 = vmul.f32 -1.442695, %v3325_v1  ;;  %v3296_v56 = vadd.f32 %v6265_v44, %v3014_v26  ;;  %v10415_v26 = vld [vmem:[#allocation40_spill] sm:$0xff] }
 0x2bd   : > { %10411 = vst [vmem:[#allocation31_spill] sm:$0xff] %v9050_v16  ;;  %6706 = vpow2.f32 %v5899_v11  ;;  %v3323_v31 = vadd.f32 %v3291_v17, %v8924_v62  ;;  %v3215_v6 = vpop.f32.mrf.mxu0  ;;  %v3022_v13 = vadd.f32 %v8944_v55, %v10413_v21  ;;  %v3033_v48 = vadd.f32 %v8968_v20, %v10415_v26  ;;  %v10416_v17 = vld [vmem:[#allocation58_spill] sm:$0xff]  ;;  %v3040_v62 = vpop.f32.mrf.mxu1 }
 0x2be   : > { %v6685_v61 = vpop.eup %6684  ;;  %6708 = vrcp.f32 %v3445_v51  ;;  %v3328_v58 = vadd.f32 %v3296_v56, %v8963_v40  ;;  %v3294_v1 = vadd.f32 %v3215_v6, %v3006_v54  ;;  %v9064_v59 = vadd.f32 %v8824_v29, %v10416_v17  ;;  %v10419_v56 = vld [vmem:[#allocation41_spill] sm:$0xff]  ;;  %v10420_v21 = vld [vmem:[#allocation42_spill] sm:$0xff] }
 0x2bf   : > { %v9058_v44 = vpop.eup %6686  ;;  %v3443_v30 = vadd.f32 1.0, %v6685_v61  ;;  %6710 = vpow2.f32 %v5897_v27  ;;  %v5898_v37 = vmul.f32 -1.442695, %v3323_v31  ;;  %v6266_v11 = vpop.f32.mrf.mxu0  ;;  %v3025_v6 = vadd.f32 %v8998_v7, %v10419_v56 }
 0x2c0   : > { %10414 = vst [vmem:[#allocation55_spill] sm:$0xff] %v9058_v44  ;;  %v6689_v24 = vpop.eup %6688  ;;  %10417 = vst [vmem:[#allocation32_spill] sm:$0xff] %v9064_v59  ;;  %6712 = vpow2.f32 %v5900_v5  ;;  %v5903_v55 = vmul.f32 -1.442695, %v3328_v58  ;;  %v3326_v51 = vadd.f32 %v3294_v1, %v8949_v23  ;;  %v3297_v27 = vadd.f32 %v6266_v11, %v3017_v45  ;;  %v10422_v1 = vld [vmem:[#allocation43_spill] sm:$0xff]  ;;  %v6233_v11 = vpop.f32.mrf.mxu1 }
 0x2c1   : > { %v9067_v54 = vpop.eup %6690  ;;  %6714 = vrcp.f32 %v3443_v30  ;;  %v3448_v20 = vadd.f32 1.0, %v6689_v24  ;;  %v3218_v31 = vpop.f32.mrf.mxu0  ;;  %v9073_v26 = vadd.f32 %v9016_v36, %v10420_v21  ;;  %v9078_v17 = vadd.f32 %v3037_v15, %v10422_v1 }
 0x2c2   : > { %10418 = vst [vmem:[#allocation33_spill] sm:$0xff] %v9067_v54  ;;  %v6693_v61 = vpop.eup %6692  ;;  %6716 = vpow2.f32 %v5898_v37  ;;  %v5901_v29 = vmul.f32 -1.442695, %v3326_v51  ;;  %v3295_v5 = vadd.f32 %v3218_v31, %v3009_v52  ;;  %v3329_v7 = vadd.f32 %v3297_v27, %v8972_v10 }
 0x2c3   : > { %v9075_v58 = vpop.eup %6694  ;;  %6718 = vrcp.f32 %v3448_v20  ;;  %v3446_v23 = vadd.f32 1.0, %v6693_v61  ;;  %v6269_v30 = vpop.f32.mrf.mxu0  ;;  %v10423_v24 = vunpack.i.h.bf16 %v8832_v49  ;;  %v10424_v15 = vunpack.i.l.bf16 %v8832_v49 }
 0x2c4   : > { %10421 = vst [vmem:[#allocation34_spill] sm:$0xff] %v9075_v58  ;;  %v6697_v45 = vpop.eup %6696  ;;  %6720 = vpow2.f32 %v5903_v55  ;;  %v3327_v37 = vadd.f32 %v3295_v5, %v8959_v18  ;;  %v3300_v52 = vadd.f32 %v6269_v30, %v3030_v63  ;;  %v5904_v20 = vmul.f32 -1.442695, %v3329_v7 }
 0x2c5   : > { %v3665_v36 = vmul.f32 %v9075_v58, %v10423_v24  ;;  %6722 = vrcp.f32 %v3446_v23  ;;  %v3449_v51 = vadd.f32 1.0, %v6697_v45  ;;  %v3664_v56 = vmul.f32 %v9058_v44, %v10424_v15  ;;  %v3231_v31 = vpop.f32.mrf.mxu0  ;;  %v10429_v24 = vld [vmem:[#allocation44_spill] sm:$0xff] }
 0x2c6   : > { %v9088_v27 = vpop.eup %6698  ;;  %6724 = vpow2.f32 %v5901_v29  ;;  %v5902_v61 = vmul.f32 -1.442695, %v3327_v37  ;;  %v3332_v55 = vadd.f32 %v3300_v52, %v8988_v19  ;;  %v3298_v21 = vadd.f32 %v3231_v31, %v3022_v13  ;;  %v3053_v37 = vpop.f32.mrf.mxu1 }
 0x2c7   : > { %10425 = vst [vmem:[#allocation35_spill] sm:$0xff] %v9088_v27  ;;  %v9091_v1 = vpop.eup %6700  ;;  %6726 = vrcp.f32 %v3449_v51  ;;  %v10427_v63 = vunpack.i.h.bf16 %v8834_v57  ;;  %v10428_v49 = vunpack.i.l.bf16 %v8834_v57  ;;  %v6270_v7 = vpop.f32.mrf.mxu0  ;;  %v3695_v30 = vpack.c.bf16 %v3665_v36, %v3664_v56  ;;  %v10431_v56 = vld [vmem:[#allocation45_spill] sm:$0xff] }
 0x2c8   : > { %10426 = vst [vmem:[#allocation36_spill] sm:$0xff] %v9091_v1  ;;  %v6703_v45 = vpop.eup %6702  ;;  %v3049_v29 = vadd.f32 %v9046_v25, %v10429_v24  ;;  %6728 = vpow2.f32 %v5904_v20  ;;  %v5907_v13 = vmul.f32 -1.442695, %v3332_v55  ;;  %v3330_v52 = vadd.f32 %v3298_v21, %v8976_v2  ;;  %v10433_v55 = vld [vmem:[#allocation46_spill] sm:$0xff] }
 0x2c9   : > { %v3663_v23 = vmul.f32 %v9088_v27, %v10427_v63  ;;  %v3662_v5 = vmul.f32 %v9067_v54, %v10428_v49  ;;  %v9102_v51 = vpop.eup %6704  ;;  %v3447_v15 = vadd.f32 1.0, %v6703_v45  ;;  %6730 = vpow2.f32 %v5902_v61  ;;  %3728 = vrot.lane.b32.xlu0 %v3695_v30, %s7011_s8  ;;  %v3234_v57 = vpop.f32.mrf.mxu0 }
 0x2ca   : > { %10430 = vst [vmem:[#allocation63_spill] sm:$0xff] %v9102_v51  ;;  %v3301_v31 = vadd.f32 %v6270_v7, %v3033_v48  ;;  %v6707_v36 = vpop.eup %6706  ;;  %v3041_v49 = vadd.f32 %v3040_v62, %v10431_v56  ;;  %6732 = vpow2.f32 %v5907_v13  ;;  %v5905_v25 = vmul.f32 -1.442695, %v3330_v52  ;;  %v6234_v30 = vpop.f32.mrf.mxu1 }
 0x2cb   : > { %v3694_v63 = vpack.c.bf16 %v3663_v23, %v3662_v5  ;;  %v3299_v24 = vadd.f32 %v3234_v57, %v3025_v6  ;;  %v9106_v20 = vpop.eup %6708  ;;  %v3062_v21 = vadd.f32 %v6233_v11, %v10433_v55  ;;  %6734 = vrcp.f32 %v3447_v15  ;;  %v6273_v48 = vpop.f32.mrf.mxu0 }
 0x2cc   : > { %10432 = vst [vmem:[#allocation56_spill] sm:$0xff] %v9106_v20  ;;  %v3452_v27 = vadd.f32 1.0, %v6707_v36  ;;  %v3333_v61 = vadd.f32 %v3301_v31, %v8992_v28  ;;  %v6711_v7 = vpop.eup %6710  ;;  %v10434_v23 = vunpack.i.h.bf16 %v8879_v50  ;;  %6736 = vpow2.f32 %v5905_v25 }
 0x2cd   : > { %3726 = vrot.lane.b32.xlu1 %v3694_v63, %s7011_s8  ;;  %v3331_v6 = vadd.f32 %v3299_v24, %v8980_v42  ;;  %v3304_v5 = vadd.f32 %v6273_v48, %v9073_v26  ;;  %v6713_v45 = vpop.eup %6712  ;;  %v3450_v11 = vadd.f32 1.0, %v6711_v7  ;;  %v10435_v13 = vunpack.i.l.bf16 %v8879_v50  ;;  %v3247_v63 = vpop.f32.mrf.mxu0 }
 0x2ce   : > { %v3669_v62 = vmul.f32 %v9106_v20, %v10434_v23  ;;  %v5908_v15 = vmul.f32 -1.442695, %v3333_v61  ;;  %v10436_v31 = vunpack.i.l.bf16 %v8881_v9  ;;  %v9122_v36 = vpop.eup %6714  ;;  %6738 = vrcp.f32 %v3452_v27  ;;  %v3056_v20 = vpop.f32.mrf.mxu1 }
 0x2cf   : > { %v3668_v52 = vmul.f32 %v9091_v1, %v10435_v13  ;;  %10437 = vst [vmem:[#allocation37_spill] sm:$0xff] %v9122_v36  ;;  %v3453_v56 = vadd.f32 1.0, %v6713_v45  ;;  %v3336_v25 = vadd.f32 %v3304_v5, %v9012_v43  ;;  %v3302_v26 = vadd.f32 %v3247_v63, %v9078_v17  ;;  %v6717_v24 = vpop.eup %6716  ;;  %v6274_v48 = vpop.f32.mrf.mxu0  ;;  %v10440_v13 = vld [vmem:[#allocation47_spill] sm:$0xff] }
 0x2d0   : > { %v3666_v57 = vmul.f32 %v9102_v51, %v10436_v31  ;;  %6740 = vrcp.f32 %v3450_v11  ;;  %v10438_v50 = vunpack.i.h.bf16 %v8881_v9  ;;  %v5906_v61 = vmul.f32 -1.442695, %v3331_v6  ;;  %v9129_v23 = vpop.eup %6718 }
 0x2d1   : > { %v3697_v7 = vpack.c.bf16 %v3669_v62, %v3668_v52  ;;  %10439 = vst [vmem:[#allocation57_spill] sm:$0xff] %v9129_v23  ;;  %v3054_v31 = vadd.f32 %v3053_v37, %v10440_v13  ;;  %6742 = vrcp.f32 %v3453_v56  ;;  %v3451_v27 = vadd.f32 1.0, %v6717_v24  ;;  %v6721_v45 = vpop.eup %6720  ;;  %v3250_v9 = vpop.f32.mrf.mxu0  ;;  %v10442_v62 = vld [vmem:[#allocation48_spill] sm:$0xff]  ;;  %v10443_v56 = vld [vmem:[#allocation49_spill] sm:$0xff] }
 0x2d2   : > { %v3667_v55 = vmul.f32 %v9122_v36, %v10438_v50  ;;  %v3334_v5 = vadd.f32 %v3302_v26, %v8996_v4  ;;  %6744 = vpow2.f32 %v5908_v15  ;;  %v5911_v17 = vmul.f32 -1.442695, %v3336_v25  ;;  %v9134_v6 = vpop.eup %6722 }
 0x2d3   : > { %v3305_v11 = vadd.f32 %v6274_v48, %v3049_v29  ;;  %3732 = vrot.lane.b32.xlu0 %v3697_v7, %s7011_s8  ;;  %10441 = vst [vmem:[#allocation38_spill] sm:$0xff] %v9134_v6  ;;  %v3065_v52 = vadd.f32 %v6234_v30, %v10442_v62  ;;  %6746 = vrcp.f32 %v3451_v27  ;;  %v3456_v50 = vadd.f32 1.0, %v6721_v45  ;;  %v6725_v13 = vpop.eup %6724  ;;  %v6277_v29 = vpop.f32.mrf.mxu0 }
 0x2d4   : > { %v3696_v63 = vpack.c.bf16 %v3667_v55, %v3666_v57  ;;  %v3303_v37 = vadd.f32 %v3250_v9, %v3041_v49  ;;  %v3057_v24 = vadd.f32 %v3056_v20, %v10443_v56  ;;  %6748 = vpow2.f32 %v5906_v61  ;;  %v9140_v25 = vpop.eup %6726 }
 0x2d5   : > { %v5909_v26 = vmul.f32 -1.442695, %v3334_v5  ;;  %v3337_v15 = vadd.f32 %v3305_v11, %v9020_v32  ;;  %10444 = vst [vmem:[#allocation39_spill] sm:$0xff] %v9140_v25  ;;  %6750 = vrcp.f32 %v3456_v50  ;;  %v3454_v57 = vadd.f32 1.0, %v6725_v13  ;;  %v6729_v48 = vpop.eup %6728  ;;  %v3263_v45 = vpop.f32.mrf.mxu0 }
 0x2d6   : > { %3730 = vrot.lane.b32.xlu1 %v3696_v63, %s7011_s8  ;;  %v3335_v55 = vadd.f32 %v3303_v37, %v9003_v46  ;;  %v3308_v30 = vadd.f32 %v6277_v29, %v3062_v21  ;;  %6752 = vpow2.f32 %v5911_v17  ;;  %v10445_v49 = vunpack.i.l.bf16 %v8908_v35  ;;  %v6731_v11 = vpop.eup %6730 }
 0x2d7   : > { %v10446_v61 = vunpack.i.h.bf16 %v8908_v35  ;;  %v10447_v27 = vunpack.i.l.bf16 %v8920_v33  ;;  %6754 = vrcp.f32 %v3454_v57  ;;  %v3457_v9 = vadd.f32 1.0, %v6729_v48  ;;  %v6733_v17 = vpop.eup %6732  ;;  %v6278_v37 = vpop.f32.mrf.mxu0 }
 0x2d8   : > { %v3672_v20 = vmul.f32 %v9129_v23, %v10445_v49  ;;  %v5912_v63 = vmul.f32 -1.442695, %v3337_v15  ;;  %v3340_v21 = vadd.f32 %v3308_v30, %v9050_v16  ;;  %v3455_v62 = vadd.f32 1.0, %v6731_v11  ;;  %v9153_v35 = vpop.eup %6734 }
 0x2d9   : > { %v3673_v7 = vmul.f32 %v9140_v25, %v10446_v61  ;;  %v3670_v5 = vmul.f32 %v9134_v6, %v10447_v27  ;;  %6756 = vpow2.f32 %v5909_v26  ;;  %v3306_v50 = vadd.f32 %v3263_v45, %v3054_v31  ;;  %10448 = vst [vmem:[#allocation40_spill] sm:$0xff] %v9153_v35  ;;  %v6502_v61 = vpop.permute.xlu1 %6501  ;;  %v6737_v27 = vpop.eup %6736 }
 0x2da   : > { %6758 = vrcp.f32 %v3457_v9  ;;  %v3460_v56 = vadd.f32 1.0, %v6733_v17  ;;  %v5910_v29 = vmul.f32 -1.442695, %v3335_v55  ;;  %v3309_v49 = vadd.f32 %v6278_v37, %v3065_v52  ;;  %v3266_v31 = vpop.f32.mrf.mxu0 }
 0x2db   : > { %v3699_v13 = vpack.c.bf16 %v3673_v7, %v3672_v20  ;;  %6760 = vrcp.f32 %v3455_v62  ;;  %v10449_v57 = vunpack.i.h.bf16 %v8920_v33  ;;  %v5915_v30 = vmul.f32 -1.442695, %v3340_v21  ;;  %v9161_v55 = vpop.eup %6738 }
 0x2dc   : > { %v3338_v48 = vadd.f32 %v3306_v50, %v9032_v3  ;;  %6762 = vrcp.f32 %v3460_v56  ;;  %v3458_v26 = vadd.f32 1.0, %v6737_v27  ;;  %v3341_v20 = vadd.f32 %v3309_v49, %v9064_v59  ;;  %10450 = vst [vmem:[#allocation58_spill] sm:$0xff] %v9161_v55 }
 0x2dd   : > { %v3671_v15 = vmul.f32 %v9153_v35, %v10449_v57  ;;  %3736 = vrot.lane.b32.xlu0 %v3699_v13, %s7011_s8  ;;  %v3307_v7 = vadd.f32 %v3266_v31, %v3057_v24  ;;  %6764 = vpow2.f32 %v5912_v63  ;;  %v6503_v45 = vunpack.i.l.bf16 %v6502_v61  ;;  %v9163_v33 = vpop.eup %6740 }
 0x2de   : > { %v5913_v52 = vmul.f32 -1.442695, %v3338_v48  ;;  %10451 = vst [vmem:[#allocation41_spill] sm:$0xff] %v9163_v33  ;;  %6766 = vrcp.f32 %v3458_v26  ;;  %v5916_v9 = vmul.f32 -1.442695, %v3341_v20  ;;  %v6504_v21 = vunpack.i.h.bf16 %v6502_v61  ;;  %v9166_v62 = vpop.eup %6742  ;;  %v6517_v61 = vpop.permute.xlu0 %6516 }
 0x2df   : > { %v3698_v11 = vpack.c.bf16 %v3671_v15, %v3670_v5  ;;  %v3339_v17 = vadd.f32 %v3307_v7, %v9041_v47  ;;  %10452 = vst [vmem:[#allocation42_spill] sm:$0xff] %v9166_v62  ;;  %6768 = vpow2.f32 %v5910_v29  ;;  %v6745_v50 = vpop.eup %6744  ;;  %v10453_v24 = vunpack.i.l.bf16 %v8932_v41  ;;  %v6512_v15 = vpop.permute.xlu1 %6511 }
 0x2e0   : > { %6770 = vpow2.f32 %v5915_v30  ;;  %v10454_v5 = vunpack.i.h.bf16 %v8932_v41  ;;  %v9175_v56 = vpop.eup %6746  ;;  %v3461_v49 = vadd.f32 1.0, %v6745_v50  ;;  %v3674_v57 = vmul.f32 %v9163_v33, %v6503_v45 }
 0x2e1   : > { %3734 = vrot.lane.b32.xlu1 %v3698_v11, %s7011_s8  ;;  %v3676_v63 = vmul.f32 %v9161_v55, %v10453_v24  ;;  %v5914_v13 = vmul.f32 -1.442695, %v3339_v17  ;;  %10455 = vst [vmem:[#allocation43_spill] sm:$0xff] %v9175_v56  ;;  %6772 = vpow2.f32 %v5913_v52  ;;  %v6749_v27 = vpop.eup %6748  ;;  %v3675_v29 = vmul.f32 %v9175_v56, %v6504_v21 }
 0x2e2   : > { %v3677_v37 = vmul.f32 %v9166_v62, %v10454_v5  ;;  %6774 = vpow2.f32 %v5916_v9  ;;  %v9179_v48 = vpop.eup %6750  ;;  %v3459_v41 = vadd.f32 1.0, %v6749_v27  ;;  %v6519_v26 = vunpack.i.h.bf16 %v6517_v61  ;;  %v6527_v27 = vpop.permute.xlu0 %6526 }
 0x2e3   : > { %10456 = vst [vmem:[#allocation44_spill] sm:$0xff] %v9179_v48  ;;  %6776 = vrcp.f32 %v3461_v49  ;;  %v6753_v31 = vpop.eup %6752  ;;  %v6518_v20 = vunpack.i.l.bf16 %v6517_v61  ;;  %v3700_v7 = vpack.c.bf16 %v3675_v29, %v3674_v57  ;;  %v6514_v11 = vunpack.i.h.bf16 %v6512_v15 }
 0x2e4   : > { %v3701_v30 = vpack.c.bf16 %v3677_v37, %v3676_v63  ;;  %6778 = vpow2.f32 %v5914_v13  ;;  %v9182_v52 = vpop.eup %6754  ;;  %v6513_v9 = vunpack.i.l.bf16 %v6512_v15  ;;  %v3464_v17 = vadd.f32 1.0, %v6753_v31  ;;  %v6522_v31 = vpop.permute.xlu1 %6521 }
 0x2e5   : > { %10457 = vst [vmem:[#allocation45_spill] sm:$0xff] %v9182_v52  ;;  %6780 = vrcp.f32 %v3459_v41  ;;  %3738 = vrot.lane.b32.xlu1 %v3700_v7, %s7011_s8  ;;  %v3680_v63 = vmul.f32 %v9179_v48, %v6518_v20  ;;  %v6529_v7 = vunpack.i.h.bf16 %v6527_v27 }
 0x2e6   : > { %3740 = vrot.lane.b32.xlu0 %v3701_v30, %s7011_s8  ;;  %v6757_v21 = vpop.eup %6756  ;;  %v3678_v49 = vmul.f32 %v9182_v52, %v6513_v9  ;;  %6782 = vrcp.f32 %v3464_v17  ;;  %v6524_v17 = vunpack.i.h.bf16 %v6522_v31 }
 0x2e7   : > { %v9185_v45 = vpop.eup %6758  ;;  %v3462_v24 = vadd.f32 1.0, %v6757_v21 }
 0x2e8   : > { %10458 = vst [vmem:[#allocation46_spill] sm:$0xff] %v9185_v45  ;;  %v9187_v50 = vpop.eup %6760  ;;  %v3681_v5 = vmul.f32 %v9185_v45, %v6519_v26 }
 0x2e9   : > { %10459 = vst [vmem:[#allocation47_spill] sm:$0xff] %v9187_v50  ;;  %v9191_v37 = vpop.eup %6762  ;;  %v3679_v13 = vmul.f32 %v9187_v50, %v6514_v11  ;;  %6784 = vrcp.f32 %v3462_v24  ;;  %v6528_v11 = vunpack.i.l.bf16 %v6527_v27 }
 0x2ea   : > { %10460 = vst [vmem:[#allocation48_spill] sm:$0xff] %v9191_v37  ;;  %v6765_v61 = vpop.eup %6764  ;;  %v3703_v29 = vpack.c.bf16 %v3681_v5, %v3680_v63 }
 0x2eb   : > { %v9195_v57 = vpop.eup %6766  ;;  %v3465_v15 = vadd.f32 1.0, %v6765_v61  ;;  %v3702_v30 = vpack.c.bf16 %v3679_v13, %v3678_v49  ;;  %v6523_v61 = vunpack.i.l.bf16 %v6522_v31  ;;  %v6537_v31 = vpop.permute.xlu0 %6536 }
 0x2ec   : > { %10461 = vst [vmem:[#allocation49_spill] sm:$0xff] %v9195_v57  ;;  %v6769_v41 = vpop.eup %6768  ;;  %3744 = vrot.lane.b32.xlu0 %v3703_v29, %s7011_s8  ;;  %v3684_v29 = vmul.f32 %v9191_v37, %v6528_v11 }
 0x2ed   : > { %v6771_v26 = vpop.eup %6770  ;;  %6786 = vrcp.f32 %v3465_v15  ;;  %v3463_v20 = vadd.f32 1.0, %v6769_v41  ;;  %3742 = vrot.lane.b32.xlu1 %v3702_v30, %s7011_s8 }
 0x2ee   : > { %v6773_v9 = vpop.eup %6772  ;;  %v3468_v21 = vadd.f32 1.0, %v6771_v26  ;;  %v3682_v26 = vmul.f32 %v9195_v57, %v6523_v61 }
 0x2ef   : > { %v6775_v63 = vpop.eup %6774  ;;  %6788 = vrcp.f32 %v3463_v20  ;;  %v3466_v5 = vadd.f32 1.0, %v6773_v9 }
 0x2f0   : > { %v9199_v13 = vpop.eup %6776  ;;  %6790 = vrcp.f32 %v3468_v21  ;;  %v3469_v24 = vadd.f32 1.0, %v6775_v63  ;;  %v6532_v21 = vpop.permute.xlu1 %6531  ;;  %v6539_v63 = vunpack.i.h.bf16 %v6537_v31 }
 0x2f1   : > { %10462 = vst [vmem:[#allocation82_spill] sm:$0xff] %v9199_v13  ;;  %v6779_v49 = vpop.eup %6778  ;;  %6792 = vrcp.f32 %v3466_v5  ;;  %v3685_v15 = vmul.f32 %v9199_v13, %v6529_v7  ;;  %v6538_v5 = vunpack.i.l.bf16 %v6537_v31 }
 0x2f2   : > { %v9203_v27 = vpop.eup %6780  ;;  %6794 = vrcp.f32 %v3469_v24  ;;  %v3467_v30 = vadd.f32 1.0, %v6779_v49  ;;  %v6534_v24 = vunpack.i.h.bf16 %v6532_v21  ;;  %v6533_v49 = vunpack.i.l.bf16 %v6532_v21 }
 0x2f3   : > { %10463 = vst [vmem:[#allocation83_spill] sm:$0xff] %v9203_v27  ;;  %v3683_v41 = vmul.f32 %v9203_v27, %v6524_v17  ;;  %v3705_v20 = vpack.c.bf16 %v3685_v15, %v3684_v29  ;;  %v9209_v7 = vpop.eup %6782  ;;  %v6547_v17 = vpop.permute.xlu0 %6546 }
 0x2f4   : > { %6796 = vrcp.f32 %v3467_v30  ;;  %10464 = vst [vmem:[#allocation84_spill] sm:$0xff] %v9209_v7  ;;  %v3688_v61 = vmul.f32 %v9209_v7, %v6538_v5  ;;  %v6542_v15 = vpop.permute.xlu1 %6541 }
 0x2f5   : > { %3748 = vrot.lane.b32.xlu0 %v3705_v20, %s7011_s8  ;;  %v3704_v9 = vpack.c.bf16 %v3683_v41, %v3682_v26  ;;  %v6549_v41 = vunpack.i.h.bf16 %v6547_v17  ;;  %v6548_v26 = vunpack.i.l.bf16 %v6547_v17  ;;  %v6544_v57 = vunpack.i.h.bf16 %v6542_v15 }
 0x2f6   : > { %v9211_v11 = vpop.eup %6784  ;;  %v6543_v50 = vunpack.i.l.bf16 %v6542_v15  ;;  %v6637_v15 = vld [vmem:[%s10089_s4 + $0x50] sm:$0xff]  }
 0x2f7   : > { %3746 = vrot.lane.b32.xlu1 %v3704_v9, %s7011_s8  ;;  %10465 = vst [vmem:[#allocation85_spill] sm:$0xff] %v9211_v11  ;;  %v3686_v9 = vmul.f32 %v9211_v11, %v6533_v49 }
 0x2fa   : > { %v9213_v27 = vpop.eup %6786 }
 0x2fb   : > { %10466 = vst [vmem:[#allocation86_spill] sm:$0xff] %v9213_v27  ;;  %v3689_v29 = vmul.f32 %v9213_v27, %v6539_v63 }
 0x2fc   : > { %v9217_v30 = vpop.eup %6788 }
 0x2fd   : > { %10467 = vst [vmem:[#allocation87_spill] sm:$0xff] %v9217_v30  ;;  %v9219_v20 = vpop.eup %6790  ;;  %v3687_v31 = vmul.f32 %v9217_v30, %v6534_v24  ;;  %v3707_v13 = vpack.c.bf16 %v3689_v29, %v3688_v61 }
 0x2fe   : > { %10468 = vst [vmem:[#allocation88_spill] sm:$0xff] %v9219_v20  ;;  %v9223_v21 = vpop.eup %6792  ;;  %v3692_v5 = vmul.f32 %v9219_v20, %v6548_v26  ;;  %v6639_v26 = vld [vmem:[%s10089_s4 + $0x40] sm:$0xff]  }
 0x2ff   : > { %10469 = vst [vmem:[#allocation89_spill] sm:$0xff] %v9223_v21  ;;  %v9225_v37 = vpop.eup %6794  ;;  %3752 = vrot.lane.b32.xlu0 %v3707_v13, %s7011_s8  ;;  %v3706_v63 = vpack.c.bf16 %v3687_v31, %v3686_v9  ;;  %v3690_v49 = vmul.f32 %v9223_v21, %v6543_v50  ;;  %v6636_v13 = vld [vmem:[%s10089_s4 + $0x58] sm:$0xff]   ;;  %v6638_v50 = vld [vmem:[%s10089_s4 + $0x48] sm:$0xff]  }
 0x300   : > { %10470 = vst [vmem:[#allocation90_spill] sm:$0xff] %v9225_v37  ;;  %v3693_v17 = vmul.f32 %v9225_v37, %v6549_v41  ;;  %6279 = vmatprep.subr.bf16.mxu1 %v6636_v13  ;;  %v6642_v41 = vld [vmem:[%s10089_s4 + $0x20] sm:$0xff]   ;;  %v6643_v31 = vld [vmem:[%s10089_s4 + $0x18] sm:$0xff]  }
 0x301   : > { %v9230_v27 = vpop.eup %6796  ;;  %3750 = vrot.lane.b32.xlu1 %v3706_v63, %s7011_s8  ;;  %6280 = vmatpush3.bf16.msra.mxu1 %v6636_v13  ;;  %v6641_v9 = vld [vmem:[%s10089_s4 + $0x38] sm:$0xff]   ;;  %v6644_v63 = vld [vmem:[%s10089_s4 + $0x10] sm:$0xff]  }
 0x302   : > { %10471 = vst [vmem:[#allocation91_spill] sm:$0xff] %v9230_v27  ;;  %v3691_v24 = vmul.f32 %v9230_v27, %v6544_v57  ;;  %v3709_v61 = vpack.c.bf16 %v3693_v17, %v3692_v5  ;;  %v6640_v57 = vld [vmem:[%s10089_s4 + $0x28] sm:$0xff]   ;;  %6281 = vmatprep.subr.bf16.mxu1 %v6637_v15  ;;  %v6645_v5 = vld [vmem:[%s10089_s4 + $0x30] sm:$0xff]  }
 0x303   : > { %6323 = vmatprep.subr.bf16.mxu0 %v6640_v57  ;;  %v6646_v17 = vld [vmem:[%s10089_s4 + $0x8] sm:$0xff]  }
 0x304   : > { %3756 = vrot.lane.b32.xlu0 %v3709_v61, %s7011_s8  ;;  %v3708_v29 = vpack.c.bf16 %v3691_v24, %v3690_v49  ;;  %6324 = vmatpush3.bf16.msra.mxu0 %v6640_v57 }
 0x305   : > { %6282 = vmatpush3.bf16.msra.mxu1 %v6637_v15  ;;  %6325 = vmatprep.subr.bf16.mxu0 %v6642_v41 }
 0x306   : > { %3754 = vrot.lane.b32.xlu1 %v3708_v29, %s7011_s8  ;;  %6283 = vmatprep.subr.bf16.mxu1 %v6638_v50 }
 0x308   : > { %6326 = vmatpush3.bf16.msra.mxu0 %v6642_v41 }
 0x309   : > { %6284 = vmatpush3.bf16.msra.mxu1 %v6638_v50  ;;  %6327 = vmatprep.subr.bf16.mxu0 %v6643_v31  ;;  %v6647_v50 = vld [vmem:[%s10089_s4] sm:$0xff]  }
 0x30a   : > { %6285 = vmatprep.subr.bf16.mxu1 %v6639_v26 }
 0x30c   : > { %6328 = vmatpush3.bf16.msra.mxu0 %v6643_v31 }
 0x30d   : > { %6286 = vmatpush3.bf16.msra.mxu1 %v6639_v26  ;;  %6329 = vmatprep.subr.bf16.mxu0 %v6644_v63 }
 0x30e   : > { %6287 = vmatprep.subr.bf16.mxu1 %v6641_v9 }
 0x310   : > { %6330 = vmatpush3.bf16.msra.mxu0 %v6644_v63 }
 0x311   : > { %6288 = vmatpush3.bf16.msra.mxu1 %v6641_v9  ;;  %6331 = vmatprep.subr.bf16.mxu0 %v6646_v17 }
 0x312   : > { %6289 = vmatprep.subr.bf16.mxu1 %v6645_v5 }
 0x314   : > { %6332 = vmatpush3.bf16.msra.mxu0 %v6646_v17 }
 0x315   : > { %6290 = vmatpush3.bf16.msra.mxu1 %v6645_v5  ;;  %6333 = vmatprep.subr.bf16.mxu0 %v6647_v50 }
 0x318   : > { %6334 = vmatpush3.bf16.msra.mxu0 %v6647_v50 }
 0x33b   : > { %v3729_v24 = vpop.permute.xlu0 %3728 }
 0x33c   : > { %v3766_v49 = vshrl.u32 %v3729_v24, 16  ;;  %v3769_v13 = vshll.u32 %v3729_v24, 16 }
 0x33e   : > { %v3768_v29 = vrot.slane %v3766_v49, 7 }
 0x33f   : > { %v3727_v61 = vpop.permute.xlu1 %3726 }
 0x340   : > { %v3759_v15 = vshrl.u32 %v3727_v61, 16  ;;  %v3771_v57 = vor.u32 %v3769_v13, %v3768_v29  ;;  %v3919_v26 = vsel %vm7226_vm2, %v3768_v29, 0  ;;  %v3762_v9 = vshll.u32 %v3727_v61, 16  ;;  %v9285_v29 = vld [vmem:[%s10089_s4 + $0x88] sm:$0xff]  }
 0x341   : > { %v3954_v24 = vshll.u32 %v3919_v26, 16  ;;  %6367 = vmatprep.subr.bf16.mxu1 %v9285_v29 }
 0x342   : > { %v3761_v31 = vrot.slane %v3759_v15, 7  ;;  %v9277_v63 = vsel %vm7226_vm2, 0, %v3771_v57 }
 0x343   : > { %v3949_v37 = vshll.u32 %v9277_v63, 16  ;;  %v3947_v57 = vshrl.u32 %v9277_v63, 16  ;;  %v3956_v30 = vrot.slane %v3954_v24, 1 }
 0x344   : > { %v3764_v5 = vor.u32 %v3762_v9, %v3761_v31  ;;  %v3918_v17 = vsel %vm7226_vm2, %v3761_v31, 0 }
 0x345   : > { %v3733_v49 = vpop.permute.xlu0 %3732  ;;  %v3951_v9 = vrot.slane %v3949_v37, 1  ;;  %v3942_v50 = vshll.u32 %v3918_v17, 16 }
 0x346   : > { %v9289_v61 = vsel %vm7226_vm2, 0, %v3764_v5  ;;  %v3780_v13 = vshrl.u32 %v3733_v49, 16  ;;  %v3783_v20 = vshll.u32 %v3733_v49, 16  ;;  %v4177_v5 = vrot.slane %v9277_v63, 1 }
 0x347   : > { %v3937_v31 = vshll.u32 %v9289_v61, 16  ;;  %v3952_v11 = vor.u32 %v3951_v9, %v3947_v57  ;;  %v3935_v7 = vshrl.u32 %v9289_v61, 16  ;;  %v3944_v35 = vrot.slane %v3942_v50, 1 }
 0x348   : > { %v3731_v15 = vpop.permute.xlu1 %3730  ;;  %v3782_v27 = vrot.slane %v3780_v13, 7  ;;  %v4178_v13 = vrot.slane %v3919_v26, 1 }
 0x349   : > { %v3773_v21 = vshrl.u32 %v3731_v15, 16  ;;  %v3939_v45 = vrot.slane %v3937_v31, 1  ;;  %v3776_v48 = vshll.u32 %v3731_v15, 16  ;;  %v3957_v62 = vsel %vm677_vm3, %v3952_v11, %v3956_v30 }
 0x34a   : > { %v3785_v52 = vor.u32 %v3783_v20, %v3782_v27  ;;  %v3921_v56 = vsel %vm7226_vm2, %v3782_v27, 0  ;;  %4116 = vrot.lane.b32.xlu0 %v3957_v62, %s7010_s7  ;;  %v4174_v20 = vrot.slane %v9289_v61, 1  ;;  %v4175_v30 = vrot.slane %v3918_v17, 1 }
 0x34b   : > { %v3775_v37 = vrot.slane %v3773_v21, 7  ;;  %v3940_v33 = vor.u32 %v3939_v45, %v3935_v7  ;;  %v3978_v45 = vshll.u32 %v3921_v56, 16  ;;  %v4184_v50 = vrot.slane %v3921_v56, 1 }
 0x34c   : > { %v9301_v24 = vsel %vm7226_vm2, 0, %v3785_v52  ;;  %v4176_v31 = vsel %vm934_vm4, %v4174_v20, %v4175_v30 }
 0x34d   : > { %v3778_v49 = vor.u32 %v3776_v48, %v3775_v37  ;;  %v3920_v57 = vsel %vm7226_vm2, %v3775_v37, 0  ;;  %v3945_v21 = vsel %vm677_vm3, %v3940_v33, %v3944_v35  ;;  %v3973_v11 = vshll.u32 %v9301_v24, 16 }
 0x34e   : > { %4114 = vrot.lane.b32.xlu1 %v3945_v21, %s7010_s7  ;;  %v4179_v48 = vsel %vm934_vm4, %v4177_v5, %v4178_v13  ;;  %v3971_v62 = vshrl.u32 %v9301_v24, 16  ;;  %v3966_v9 = vshll.u32 %v3920_v57, 16  ;;  %v3980_v55 = vrot.slane %v3978_v45, 1 }
 0x34f   : > { %v3737_v27 = vpop.permute.xlu0 %3736  ;;  %v9311_v7 = vsel %vm7226_vm2, 0, %v3778_v49  ;;  %v3975_v26 = vrot.slane %v3973_v11, 1  ;;  %4221 = vrot.lane.b32.xlu0 %v4179_v48, %s7009_s16 }
 0x350   : > { %v3794_v52 = vshrl.u32 %v3737_v27, 16  ;;  %v3961_v15 = vshll.u32 %v9311_v7, 16  ;;  %v3797_v33 = vshll.u32 %v3737_v27, 16  ;;  %v3959_v21 = vshrl.u32 %v9311_v7, 16 }
 0x351   : > { %v3976_v49 = vor.u32 %v3975_v26, %v3971_v62  ;;  %v4183_v27 = vrot.slane %v9301_v24, 1  ;;  %v3968_v20 = vrot.slane %v3966_v9, 1  ;;  %v4180_v56 = vrot.slane %v9311_v7, 1 }
 0x352   : > { %v3796_v35 = vrot.slane %v3794_v52, 7  ;;  %v3963_v5 = vrot.slane %v3961_v15, 1  ;;  %4219 = vrot.lane.b32.xlu1 %v4176_v31, %s7009_s16  ;;  %v4181_v9 = vrot.slane %v3920_v57, 1 }
 0x353   : > { %v3735_v37 = vpop.permute.xlu1 %3734  ;;  %v3981_v52 = vsel %vm677_vm3, %v3976_v49, %v3980_v55  ;;  %v4185_v55 = vsel %vm934_vm4, %v4183_v27, %v4184_v50 }
 0x354   : > { %v3799_v17 = vor.u32 %v3797_v33, %v3796_v35  ;;  %v3923_v13 = vsel %vm7226_vm2, %v3796_v35, 0  ;;  %v3787_v11 = vshrl.u32 %v3735_v37, 16  ;;  %v3964_v48 = vor.u32 %v3963_v5, %v3959_v21  ;;  %4120 = vrot.lane.b32.xlu0 %v3981_v52, %s7010_s7 }
 0x355   : > { %v3790_v62 = vshll.u32 %v3735_v37, 16  ;;  %v4002_v26 = vshll.u32 %v3923_v13, 16  ;;  %v4182_v52 = vsel %vm934_vm4, %v4180_v56, %v4181_v9 }
 0x356   : > { %v9328_v45 = vsel %vm7226_vm2, 0, %v3799_v17  ;;  %v3789_v30 = vrot.slane %v3787_v11, 7  ;;  %v3969_v15 = vsel %vm677_vm3, %v3964_v48, %v3968_v20 }
 0x357   : > { %v3997_v35 = vshll.u32 %v9328_v45, 16  ;;  %4118 = vrot.lane.b32.xlu1 %v3969_v15, %s7010_s7  ;;  %v3995_v37 = vshrl.u32 %v9328_v45, 16  ;;  %v3739_v11 = vpop.permute.xlu1 %3738  ;;  %v4004_v48 = vrot.slane %v4002_v26, 1  ;;  %v4189_v50 = vrot.slane %v9328_v45, 1 }
 0x358   : > { %v3792_v33 = vor.u32 %v3790_v62, %v3789_v30  ;;  %v3741_v31 = vpop.permute.xlu0 %3740  ;;  %v3922_v49 = vsel %vm7226_vm2, %v3789_v30, 0  ;;  %4225 = vrot.lane.b32.xlu0 %v4185_v55, %s7009_s16  ;;  %v3801_v20 = vshrl.u32 %v3739_v11, 16  ;;  %v3804_v6 = vshll.u32 %v3739_v11, 16 }
 0x359   : > { %v3808_v21 = vshrl.u32 %v3741_v31, 16  ;;  %v3999_v5 = vrot.slane %v3997_v35, 1  ;;  %v3811_v27 = vshll.u32 %v3741_v31, 16  ;;  %v3990_v15 = vshll.u32 %v3922_v49, 16 }
 0x35a   : > { %v9340_v17 = vsel %vm7226_vm2, 0, %v3792_v33  ;;  %v4190_v35 = vrot.slane %v3923_v13, 1  ;;  %v3803_v25 = vrot.slane %v3801_v20, 7 }
 0x35b   : > { %v3810_v57 = vrot.slane %v3808_v21, 7  ;;  %v4000_v30 = vor.u32 %v3999_v5, %v3995_v37  ;;  %4223 = vrot.lane.b32.xlu1 %v4182_v52, %s7009_s16  ;;  %v3985_v62 = vshll.u32 %v9340_v17, 16  ;;  %v3983_v26 = vshrl.u32 %v9340_v17, 16 }
 0x35c   : > { %v3806_v21 = vor.u32 %v3804_v6, %v3803_v25  ;;  %v4191_v13 = vsel %vm934_vm4, %v4189_v50, %v4190_v35  ;;  %v3992_v11 = vrot.slane %v3990_v15, 1  ;;  %v4186_v52 = vrot.slane %v9340_v17, 1 }
 0x35d   : > { %v3813_v33 = vor.u32 %v3811_v27, %v3810_v57  ;;  %v4005_v55 = vsel %vm677_vm3, %v4000_v30, %v4004_v48  ;;  %v3925_v56 = vsel %vm7226_vm2, %v3810_v57, 0  ;;  %v3987_v31 = vrot.slane %v3985_v62, 1 }
 0x35e   : > { %4124 = vrot.lane.b32.xlu0 %v4005_v55, %s7010_s7  ;;  %v3745_v37 = vpop.permute.xlu0 %3744  ;;  %v9361_v57 = vsel %vm7226_vm2, 0, %v3806_v21  ;;  %v3924_v27 = vsel %vm7226_vm2, %v3803_v25, 0  ;;  %v4026_v62 = vshll.u32 %v3925_v56, 16 }
 0x35f   : > { %v9354_v9 = vsel %vm7226_vm2, 0, %v3813_v33  ;;  %v3988_v5 = vor.u32 %v3987_v31, %v3983_v26  ;;  %v3822_v20 = vshrl.u32 %v3745_v37, 16  ;;  %v3743_v30 = vpop.permute.xlu1 %3742  ;;  %v3825_v55 = vshll.u32 %v3745_v37, 16 }
 0x360   : > { %v4021_v48 = vshll.u32 %v9354_v9, 16  ;;  %v3815_v50 = vshrl.u32 %v3743_v30, 16  ;;  %v4019_v15 = vshrl.u32 %v9354_v9, 16  ;;  %v4187_v26 = vrot.slane %v3922_v49, 1 }
 0x361   : > { %v3993_v6 = vsel %vm677_vm3, %v3988_v5, %v3992_v11  ;;  %v3824_v33 = vrot.slane %v3822_v20, 7  ;;  %v4009_v31 = vshll.u32 %v9361_v57, 16  ;;  %v3818_v25 = vshll.u32 %v3743_v30, 16 }
 0x362   : > { %4229 = vrot.lane.b32.xlu0 %v4191_v13, %s7009_s16  ;;  %v4023_v35 = vrot.slane %v4021_v48, 1  ;;  %4122 = vrot.lane.b32.xlu1 %v3993_v6, %s7010_s7  ;;  %v3817_v21 = vrot.slane %v3815_v50, 7  ;;  %v4014_v23 = vshll.u32 %v3924_v27, 16  ;;  %v4028_v13 = vrot.slane %v4026_v62, 1 }
 0x363   : > { %v3827_v51 = vor.u32 %v3825_v55, %v3824_v33  ;;  %v9372_v5 = vsel %vm7226_vm2, %v3824_v33, 0  ;;  %v4011_v11 = vrot.slane %v4009_v31, 1  ;;  %v4188_v48 = vsel %vm934_vm4, %v4186_v52, %v4187_v26 }
 0x364   : > { %v4024_v36 = vor.u32 %v4023_v35, %v4019_v15  ;;  %v3820_v1 = vor.u32 %v3818_v25, %v3817_v21  ;;  %v4007_v37 = vshrl.u32 %v9361_v57, 16  ;;  %v9382_v20 = vsel %vm7226_vm2, %v3817_v21, 0 }
 0x365   : > { %v9378_v49 = vsel %vm7226_vm2, 0, %v3827_v51  ;;  %v4195_v62 = vrot.slane %v9354_v9, 1  ;;  %v4050_v6 = vshll.u32 %v9372_v5, 16  ;;  %v4016_v50 = vrot.slane %v4014_v23, 1 }
 0x366   : > { %4227 = vrot.lane.b32.xlu1 %v4188_v48, %s7009_s16  ;;  %v4029_v30 = vsel %vm677_vm3, %v4024_v36, %v4028_v13  ;;  %v9390_v52 = vsel %vm7226_vm2, 0, %v3820_v1  ;;  %v4012_v51 = vor.u32 %v4011_v11, %v4007_v37  ;;  %v4196_v15 = vrot.slane %v3925_v56, 1 }
 0x367   : > { %4128 = vrot.lane.b32.xlu0 %v4029_v30, %s7010_s7  ;;  %v3749_v35 = vpop.permute.xlu0 %3748  ;;  %v4192_v33 = vrot.slane %v9361_v57, 1  ;;  %v4045_v55 = vshll.u32 %v9378_v49, 16  ;;  %v4038_v36 = vshll.u32 %v9382_v20, 16  ;;  %v4193_v21 = vrot.slane %v3924_v27, 1 }
 0x368   : > { %v3836_v26 = vshrl.u32 %v3749_v35, 16  ;;  %v4017_v31 = vsel %vm677_vm3, %v4012_v51, %v4016_v50  ;;  %v4197_v25 = vsel %vm934_vm4, %v4195_v62, %v4196_v15  ;;  %v4043_v13 = vshrl.u32 %v9378_v49, 16 }
 0x369   : > { %v3747_v1 = vpop.permute.xlu1 %3746  ;;  %v4047_v23 = vrot.slane %v4045_v55, 1  ;;  %v4033_v56 = vshll.u32 %v9390_v52, 16  ;;  %v4052_v11 = vrot.slane %v4050_v6, 1  ;;  %v3839_v37 = vshll.u32 %v3749_v35, 16 }
 0x36a   : > { %4126 = vrot.lane.b32.xlu1 %v4017_v31, %s7010_s7  ;;  %v3838_v48 = vrot.slane %v3836_v26, 7  ;;  %v3829_v30 = vshrl.u32 %v3747_v1, 16  ;;  %v4194_v58 = vsel %vm934_vm4, %v4192_v33, %v4193_v21  ;;  %v4031_v27 = vshrl.u32 %v9390_v52, 16 }
 0x36b   : > { %4233 = vrot.lane.b32.xlu0 %v4197_v25, %s7009_s16  ;;  %v4048_v51 = vor.u32 %v4047_v23, %v4043_v13  ;;  %v4035_v50 = vrot.slane %v4033_v56, 1  ;;  %v3832_v55 = vshll.u32 %v3747_v1, 16  ;;  %v4040_v54 = vrot.slane %v4038_v36, 1 }
 0x36c   : > { %v3841_v31 = vor.u32 %v3839_v37, %v3838_v48  ;;  %v9406_v62 = vsel %vm7226_vm2, %v3838_v48, 0  ;;  %v3831_v15 = vrot.slane %v3829_v30, 7  ;;  %v4201_v26 = vrot.slane %v9378_v49, 1 }
 0x36d   : > { %v4053_v6 = vsel %vm677_vm3, %v4048_v51, %v4052_v11  ;;  %v4036_v35 = vor.u32 %v4035_v50, %v4031_v27  ;;  %v4202_v1 = vrot.slane %v9372_v5, 1  ;;  %v4074_v36 = vshll.u32 %v9406_v62, 16 }
 0x36e   : > { %4231 = vrot.lane.b32.xlu1 %v4194_v58, %s7009_s16  ;;  %v9413_v33 = vsel %vm7226_vm2, 0, %v3841_v31  ;;  %v3834_v21 = vor.u32 %v3832_v55, %v3831_v15  ;;  %v3928_v25 = vsel %vm7226_vm2, %v3831_v15, 0  ;;  %v4198_v13 = vrot.slane %v9390_v52, 1 }
 0x36f   : > { %4132 = vrot.lane.b32.xlu0 %v4053_v6, %s7010_s7  ;;  %v4041_v58 = vsel %vm677_vm3, %v4036_v35, %v4040_v54  ;;  %v4069_v56 = vshll.u32 %v9413_v33, 16  ;;  %v4199_v11 = vrot.slane %v9382_v20, 1  ;;  %v4062_v48 = vshll.u32 %v3928_v25, 16 }
 0x370   : > { %v9424_v23 = vsel %vm7226_vm2, 0, %v3834_v21  ;;  %v4203_v5 = vsel %vm934_vm4, %v4201_v26, %v4202_v1  ;;  %v4067_v54 = vshrl.u32 %v9413_v33, 16  ;;  %v4076_v50 = vrot.slane %v4074_v36, 1 }
 0x371   : > { %v3753_v37 = vpop.permute.xlu0 %3752  ;;  %v4057_v30 = vshll.u32 %v9424_v23, 16  ;;  %v4071_v27 = vrot.slane %v4069_v56, 1  ;;  %v4200_v15 = vsel %vm934_vm4, %v4198_v13, %v4199_v11  ;;  %v4055_v20 = vshrl.u32 %v9424_v23, 16 }
 0x372   : > { %4130 = vrot.lane.b32.xlu1 %v4041_v58, %s7010_s7  ;;  %v3850_v51 = vshrl.u32 %v3753_v37, 16  ;;  %v3853_v35 = vshll.u32 %v3753_v37, 16  ;;  %v4064_v26 = vrot.slane %v4062_v48, 1  ;;  %v4208_v13 = vrot.slane %v9406_v62, 1 }
 0x373   : > { %4237 = vrot.lane.b32.xlu0 %v4203_v5, %s7009_s16  ;;  %v3751_v31 = vpop.permute.xlu1 %3750  ;;  %v4059_v55 = vrot.slane %v4057_v30, 1  ;;  %v4072_v58 = vor.u32 %v4071_v27, %v4067_v54  ;;  %v4207_v5 = vrot.slane %v9413_v33, 1  ;;  %v4204_v27 = vrot.slane %v9424_v23, 1 }
 0x374   : > { %v3852_v6 = vrot.slane %v3850_v51, 7  ;;  %v3843_v21 = vshrl.u32 %v3751_v31, 16  ;;  %v3846_v56 = vshll.u32 %v3751_v31, 16 }
 0x375   : > { %v4060_v1 = vor.u32 %v4059_v55, %v4055_v20  ;;  %v4077_v36 = vsel %vm677_vm3, %v4072_v58, %v4076_v50  ;;  %v4205_v50 = vrot.slane %v3928_v25, 1 }
 0x376   : > { %4235 = vrot.lane.b32.xlu1 %v4200_v15, %s7009_s16  ;;  %v3855_v44 = vor.u32 %v3853_v35, %v3852_v6  ;;  %v3845_v59 = vrot.slane %v3843_v21, 7  ;;  %v3757_v47 = vpop.permute.xlu0 %3756  ;;  %v3931_v11 = vsel %vm7226_vm2, %v3852_v6, 0  ;;  %v4209_v6 = vsel %vm934_vm4, %v4207_v5, %v4208_v13 }
 0x377   : > { %4136 = vrot.lane.b32.xlu0 %v4077_v36, %s7010_s7  ;;  %v3864_v37 = vshrl.u32 %v3757_v47, 16  ;;  %v4065_v51 = vsel %vm677_vm3, %v4060_v1, %v4064_v26  ;;  %v3867_v15 = vshll.u32 %v3757_v47, 16  ;;  %v4098_v20 = vshll.u32 %v3931_v11, 16 }
 0x378   : > { %v9444_v48 = vsel %vm7226_vm2, 0, %v3855_v44  ;;  %v3848_v30 = vor.u32 %v3846_v56, %v3845_v59  ;;  %v3755_v54 = vpop.permute.xlu1 %3754  ;;  %v3930_v62 = vsel %vm7226_vm2, %v3845_v59, 0  ;;  %v4206_v47 = vsel %vm934_vm4, %v4204_v27, %v4205_v50 }
 0x379   : > { %v3866_v31 = vrot.slane %v3864_v37, 7  ;;  %v3857_v44 = vshrl.u32 %v3755_v54, 16  ;;  %v4093_v25 = vshll.u32 %v9444_v48, 16  ;;  %v4086_v21 = vshll.u32 %v3930_v62, 16 }
 0x37a   : > { %4134 = vrot.lane.b32.xlu1 %v4065_v51, %s7010_s7  ;;  %v9453_v55 = vsel %vm7226_vm2, 0, %v3848_v30  ;;  %v3860_v59 = vshll.u32 %v3755_v54, 16  ;;  %v4091_v26 = vshrl.u32 %v9444_v48, 16  ;;  %v4100_v36 = vrot.slane %v4098_v20, 1 }
 0x37b   : > { %v3869_v35 = vor.u32 %v3867_v15, %v3866_v31  ;;  %4241 = vrot.lane.b32.xlu0 %v4209_v6, %s7009_s16  ;;  %v3859_v58 = vrot.slane %v3857_v44, 7  ;;  %v4095_v1 = vrot.slane %v4093_v25, 1  ;;  %v4081_v56 = vshll.u32 %v9453_v55, 16 }
 0x37c   : > { %v4079_v5 = vshrl.u32 %v9453_v55, 16  ;;  %v4088_v27 = vrot.slane %v4086_v21, 1  ;;  %v4213_v6 = vrot.slane %v9444_v48, 1  ;;  %v4214_v25 = vrot.slane %v3931_v11, 1 }
 0x37d   : > { %v3862_v37 = vor.u32 %v3860_v59, %v3859_v58  ;;  %v9465_v13 = vsel %vm7226_vm2, 0, %v3869_v35  ;;  %v3932_v30 = vsel %vm7226_vm2, %v3859_v58, 0  ;;  %v4096_v51 = vor.u32 %v4095_v1, %v4091_v26 }
 0x37e   : > { %4239 = vrot.lane.b32.xlu1 %v4206_v47, %s7009_s16  ;;  %v4083_v54 = vrot.slane %v4081_v56, 1  ;;  %v4324_v35 = vshll.u32 %v9465_v13, 16  ;;  %v4110_v59 = vshll.u32 %v3932_v30, 16  ;;  %v4210_v47 = vrot.slane %v9453_v55, 1 }
 0x37f   : > { %v9471_v50 = vsel %vm7226_vm2, 0, %v3862_v37  ;;  %v4101_v20 = vsel %vm677_vm3, %v4096_v51, %v4100_v36  ;;  %v4211_v1 = vrot.slane %v3930_v62, 1  ;;  %v3933_v56 = vsel %vm7226_vm2, %v3866_v31, 0 }
 0x380   : > { %v4105_v15 = vshll.u32 %v9471_v50, 16  ;;  %v4084_v44 = vor.u32 %v4083_v54, %v4079_v5  ;;  %4140 = vrot.lane.b32.xlu0 %v4101_v20, %s7010_s7  ;;  %v4103_v58 = vshrl.u32 %v9471_v50, 16  ;;  %v4215_v11 = vsel %vm934_vm4, %v4213_v6, %v4214_v25 }
 0x381   : > { %v4216_v36 = vrot.slane %v9471_v50, 1  ;;  %v4112_v5 = vrot.slane %v4110_v59, 1  ;;  %v4217_v51 = vrot.slane %v3932_v30, 1  ;;  %v4212_v54 = vsel %vm934_vm4, %v4210_v47, %v4211_v1 }
 0x382   : > { %v4089_v21 = vsel %vm677_vm3, %v4084_v44, %v4088_v27  ;;  %v4107_v26 = vrot.slane %v4105_v15, 1  ;;  %v4326_v27 = vrot.slane %v4324_v35, 1  ;;  %v4329_v20 = vshll.u32 %v3933_v56, 16 }
 0x383   : > { %4138 = vrot.lane.b32.xlu1 %v4089_v21, %s7010_s7  ;;  %v4322_v62 = vshrl.u32 %v9465_v13, 16  ;;  %v4218_v41 = vsel %vm934_vm4, %v4216_v36, %v4217_v51  ;;  %v4337_v15 = vrot.slane %v9465_v13, 1  ;;  %v4338_v44 = vrot.slane %v3933_v56, 1 }
 0x384   : > { %v4108_v37 = vor.u32 %v4107_v26, %v4103_v58  ;;  %4245 = vrot.lane.b32.xlu0 %v4215_v11, %s7009_s16  ;;  %v4331_v30 = vrot.slane %v4329_v20, 1  ;;  %v6649_v11 = vld [vmem:[%s10089_s4 + $0x80] sm:$0xff]  }
 0x385   : > { %v4327_v6 = vor.u32 %v4326_v27, %v4322_v62  ;;  %v4339_v25 = vsel %vm934_vm4, %v4337_v15, %v4338_v44 }
 0x386   : > { %v4113_v31 = vsel %vm677_vm3, %v4108_v37, %v4112_v5 }
 0x387   : > { %4243 = vrot.lane.b32.xlu1 %v4212_v54, %s7009_s16  ;;  %v4332_v35 = vsel %vm677_vm3, %v4327_v6, %v4331_v30  ;;  %v6653_v6 = vld [vmem:[%s10089_s4 + $0x60] sm:$0xff]  }
 0x388   : > { %4247 = vrot.lane.b32.xlu0 %v4218_v41, %s7009_s16 }
 0x38b   : > { %4142 = vrot.lane.b32.xlu1 %v4113_v31, %s7010_s7 }
 0x38c   : > { %4340 = vrot.lane.b32.xlu0 %v4339_v25, %s7009_s16 }
 0x38f   : > { %4333 = vrot.lane.b32.xlu1 %v4332_v35, %s7010_s7  ;;  %s6934_s7 = scalar_lea.vmem %s10040_s0, 4096 }
 0x390   : > { %p6935_p13 = scmp.ne.s32.totalorder %s10040_s0, %s6934_s7  ;;  %p6942_p0 = scmp.lt.s32.totalorder %s6940_s19, %s6934_s7 }
 0x392   : > { %p6936_p12 = pnand %p6935_p13, %p10585_p1  ;;  %p6943_p2 = por %p6942_p0, %p6941_p10 }
 0x394   : > { %p6937_p7 = pneg %p6936_p12 }
 0x396   : > { %p6944_p4 = pnand %p6943_p2, %p6937_p7 }
 0x3bc   : > { %v4117_v59 = vpop.permute.xlu0 %4116 }
 0x3bd   : > { %v4252_v1 = vsel %vm2524_vm6, %v9277_v63, %v4117_v59 }
 0x3c0   : > { %v4115_v58 = vpop.permute.xlu1 %4114 }
 0x3c1   : > { %v4222_v21 = vpop.permute.xlu0 %4221  ;;  %v4250_v47 = vsel %vm2524_vm6, %v9289_v61, %v4115_v58  ;;  %v6650_v61 = vld [vmem:[%s10089_s4 + $0x78] sm:$0xff]  }
 0x3c2   : > { %v9508_v36 = vsel %vm983_vm5, %v4252_v1, %v4222_v21 }
 0x3c4   : > { %v4220_v26 = vpop.permute.xlu1 %4219 }
 0x3c5   : > { %v4280_v56 = vsel %vm983_vm5, %v4250_v47, %v4220_v26 }
 0x3c6   : > { %v4121_v37 = vpop.permute.xlu0 %4120  ;;  %6291 = vmatprep.mubr.msk.bf16.mxu1 %vm2675_vm7, %v4280_v56  ;;  %6336 = vmatmul.mubr.msk.bf16.vlgmr.msra.gmra.mxu0 %vm2675_vm7, %v4280_v56 }
 0x3c7   : > { %6292 = vmatmul.mubr.msk.bf16.vlgmr.msra.gmra.mxu1 %vm2675_vm7, %v9508_v36  ;;  %6339 = vmatprep.mubr.msk.bf16.mxu0 %vm2675_vm7, %v9508_v36  ;;  %v4256_v27 = vsel %vm2524_vm6, %v9301_v24, %v4121_v37  ;;  %v6652_v24 = vld [vmem:[%s10089_s4 + $0x68] sm:$0xff]  }
 0x3c8   : > { %6368 = vmatpush3.bf16.msra.mxu1 %v9285_v29  ;;  %v6651_v29 = vld [vmem:[%s10089_s4 + $0x70] sm:$0xff]  }
 0x3c9   : > { %v4119_v63 = vpop.permute.xlu1 %4118  ;;  %6369 = vmatprep.subr.bf16.mxu1 %v6649_v11 }
 0x3ca   : > { %v4226_v5 = vpop.permute.xlu0 %4225  ;;  %v4254_v51 = vsel %vm2524_vm6, %v9311_v7, %v4119_v63 }
 0x3cb   : > { %v9531_v62 = vsel %vm983_vm5, %v4256_v27, %v4226_v5 }
 0x3cc   : > { %6370 = vmatpush3.bf16.msra.mxu1 %v6649_v11 }
 0x3cd   : > { %v4224_v54 = vpop.permute.xlu1 %4223  ;;  %6371 = vmatprep.subr.bf16.mxu1 %v6650_v61 }
 0x3ce   : > { %v9525_v20 = vsel %vm983_vm5, %v4254_v51, %v4224_v54 }
 0x3cf   : > { %6295 = vmatprep.mubr.msk.bf16.mxu1 %vm2675_vm7, %v9525_v20  ;;  %6340 = vmatmul.mubr.msk.bf16.gmra.mxu0 %vm2675_vm7, %v9525_v20 }
 0x3d0   : > { %v4125_v41 = vpop.permute.xlu0 %4124  ;;  %6296 = vmatmul.mubr.msk.bf16.gmra.mxu1 %vm2675_vm7, %v9531_v62  ;;  %6343 = vmatprep.mubr.msk.bf16.mxu0 %vm2675_vm7, %v9531_v62 }
 0x3d1   : > { %6372 = vmatpush3.bf16.msra.mxu1 %v6650_v61  ;;  %v4260_v30 = vsel %vm2524_vm6, %v9328_v45, %v4125_v41 }
 0x3d2   : > { %6373 = vmatprep.subr.bf16.mxu1 %v6651_v29 }
 0x3d4   : > { %v4230_v7 = vpop.permute.xlu0 %4229  ;;  %v4123_v31 = vpop.permute.xlu1 %4122 }
 0x3d5   : > { %6374 = vmatpush3.bf16.msra.mxu1 %v6651_v29  ;;  %v4258_v15 = vsel %vm2524_vm6, %v9340_v17, %v4123_v31  ;;  %v9555_v59 = vsel %vm983_vm5, %v4260_v30, %v4230_v7 }
 0x3d6   : > { %6375 = vmatprep.subr.bf16.mxu1 %v6652_v24 }
 0x3d8   : > { %v4228_v44 = vpop.permute.xlu1 %4227 }
 0x3d9   : > { %v9552_v25 = vsel %vm983_vm5, %v4258_v15, %v4228_v44  ;;  %v4129_v35 = vpop.permute.xlu0 %4128  ;;  %6376 = vmatpush3.bf16.msra.mxu1 %v6652_v24 }
 0x3da   : > { %6299 = vmatprep.mubr.msk.bf16.mxu1 %vm2675_vm7, %v9552_v25  ;;  %6344 = vmatmul.mubr.msk.bf16.gmra.mxu0 %vm2675_vm7, %v9552_v25  ;;  %v4264_v47 = vsel %vm2524_vm6, %v9354_v9, %v4129_v35 }
 0x3db   : > { %6300 = vmatmul.mubr.msk.bf16.gmra.mxu1 %vm2675_vm7, %v9555_v59  ;;  %6347 = vmatprep.mubr.msk.bf16.mxu0 %vm2675_vm7, %v9555_v59 }
 0x3dc   : > { %v4127_v45 = vpop.permute.xlu1 %4126  ;;  %6377 = vmatprep.subr.bf16.mxu1 %v6653_v6 }
 0x3dd   : > { %v4234_v17 = vpop.permute.xlu0 %4233  ;;  %6378 = vmatpush3.bf16.msra.mxu1 %v6653_v6  ;;  %v4262_v58 = vsel %vm2524_vm6, %v9361_v57, %v4127_v45 }
 0x3de   : > { %v4294_v56 = vsel %vm983_vm5, %v4264_v47, %v4234_v17 }
 0x3e0   : > { %v4232_v21 = vpop.permute.xlu1 %4231 }
 0x3e1   : > { %v4292_v26 = vsel %vm983_vm5, %v4262_v58, %v4232_v21  ;;  %v4133_v1 = vpop.permute.xlu0 %4132 }
 0x3e2   : > { %6303 = vmatprep.mubr.msk.bf16.mxu1 %vm2675_vm7, %v4292_v26  ;;  %6348 = vmatmul.mubr.msk.bf16.gmra.mxu0 %vm2675_vm7, %v4292_v26  ;;  %v4268_v9 = vsel %vm2524_vm6, %v9378_v49, %v4133_v1 }
 0x3e3   : > { %6304 = vmatmul.mubr.msk.bf16.gmra.mxu1 %vm2675_vm7, %v4294_v56  ;;  %6351 = vmatprep.mubr.msk.bf16.mxu0 %vm2675_vm7, %v4294_v56 }
 0x3e4   : > { %v4131_v11 = vpop.permute.xlu1 %4130 }
 0x3e5   : > { %v4238_v37 = vpop.permute.xlu0 %4237  ;;  %v4266_v57 = vsel %vm2524_vm6, %v9390_v52, %v4131_v11 }
 0x3e6   : > { %v4298_v5 = vsel %vm983_vm5, %v4268_v9, %v4238_v37 }
 0x3e8   : > { %v4236_v63 = vpop.permute.xlu1 %4235 }
 0x3e9   : > { %v4296_v61 = vsel %vm983_vm5, %v4266_v57, %v4236_v63  ;;  %v4137_v51 = vpop.permute.xlu0 %4136 }
 0x3ea   : > { %6307 = vmatprep.mubr.msk.bf16.mxu1 %vm2675_vm7, %v4296_v61  ;;  %6352 = vmatmul.mubr.msk.bf16.gmra.mxu0 %vm2675_vm7, %v4296_v61  ;;  %v4272_v49 = vsel %vm2524_vm6, %v9413_v33, %v4137_v51 }
 0x3eb   : > { %6308 = vmatmul.mubr.msk.bf16.gmra.mxu1 %vm2675_vm7, %v4298_v5  ;;  %6355 = vmatprep.mubr.msk.bf16.mxu0 %vm2675_vm7, %v4298_v5 }
 0x3ec   : > { %v4135_v54 = vpop.permute.xlu1 %4134 }
 0x3ed   : > { %v4242_v27 = vpop.permute.xlu0 %4241  ;;  %v4270_v52 = vsel %vm2524_vm6, %v9424_v23, %v4135_v54 }
 0x3ee   : > { %v4302_v24 = vsel %vm983_vm5, %v4272_v49, %v4242_v27 }
 0x3f0   : > { %v4240_v29 = vpop.permute.xlu1 %4239 }
 0x3f1   : > { %v4300_v41 = vsel %vm983_vm5, %v4270_v52, %v4240_v29 }
 0x3f2   : > { %6311 = vmatprep.mubr.msk.bf16.mxu1 %vm2675_vm7, %v4300_v41  ;;  %6356 = vmatmul.mubr.msk.bf16.gmra.mxu0 %vm2675_vm7, %v4300_v41  ;;  %v4141_v7 = vpop.permute.xlu0 %4140 }
 0x3f3   : > { %6312 = vmatmul.mubr.msk.bf16.gmra.mxu1 %vm2675_vm7, %v4302_v24  ;;  %6359 = vmatprep.mubr.msk.bf16.mxu0 %vm2675_vm7, %v4302_v24  ;;  %v4276_v33 = vsel %vm2524_vm6, %v9444_v48, %v4141_v7 }
 0x3f5   : > { %v4139_v31 = vpop.permute.xlu1 %4138 }
 0x3f6   : > { %v4246_v15 = vpop.permute.xlu0 %4245  ;;  %v4274_v23 = vsel %vm2524_vm6, %v9453_v55, %v4139_v31 }
 0x3f7   : > { %v4306_v30 = vsel %vm983_vm5, %v4276_v33, %v4246_v15 }
 0x3f9   : > { %v4244_v44 = vpop.permute.xlu1 %4243 }
 0x3fa   : > { %v4304_v6 = vsel %vm983_vm5, %v4274_v23, %v4244_v44  ;;  %v4248_v35 = vpop.permute.xlu0 %4247 }
 0x3fb   : > { %6315 = vmatprep.mubr.msk.bf16.mxu1 %vm2675_vm7, %v4304_v6  ;;  %6360 = vmatmul.mubr.msk.bf16.gmra.mxu0 %vm2675_vm7, %v4304_v6 }
 0x3fc   : > { %6316 = vmatmul.mubr.msk.bf16.gmra.mxu1 %vm2675_vm7, %v4306_v30  ;;  %6363 = vmatprep.mubr.msk.bf16.mxu0 %vm2675_vm7, %v4306_v30 }
 0x3fd   : > { %v4143_v45 = vpop.permute.xlu1 %4142 }
 0x3fe   : > { %v4278_v55 = vsel %vm2524_vm6, %v9471_v50, %v4143_v45  ;;  %v4341_v58 = vpop.permute.xlu0 %4340 }
 0x3ff   : > { %v4308_v17 = vsel %vm983_vm5, %v4278_v55, %v4248_v35 }
 0x400   : > { %6319 = vmatprep.mubr.msk.bf16.mxu1 %vm2675_vm7, %v4308_v17 }
 0x401   : > { %v4334_v48 = vpop.permute.xlu1 %4333 }
 0x402   : > { %v4343_v21 = vsel %vm2524_vm6, %v9465_v13, %v4334_v48  ;;  %v10473_v13 = vld [vmem:[#allocation12_spill] sm:$0xff] }
 0x403   : > { %v4345_v47 = vsel %vm983_vm5, %v4343_v21, %v4341_v58  ;;  %6364 = vmatmul.mubr.msk.bf16.gmra.mxu0 %vm2675_vm7, %v4308_v17 }
 0x404   : > { %6320 = vmatmul.mubr.msk.bf16.gmra.mxu1 %vm2675_vm7, %v4345_v47 }
 0x405   : > { %6379 = vmatprep.mubr.msk.bf16.mxu1 %vm2675_vm7, %v9508_v36 }
 0x40c   : > { %6380 = vmatmul.mubr.msk.bf16.vlgmr.msra.gmra.mxu1 %vm2675_vm7, %v9525_v20 }
 0x40d   : > { %6383 = vmatprep.mubr.msk.bf16.mxu1 %vm2675_vm7, %v9531_v62 }
 0x414   : > { %6384 = vmatmul.mubr.msk.bf16.gmra.mxu1 %vm2675_vm7, %v9552_v25 }
 0x415   : > { %6387 = vmatprep.mubr.msk.bf16.mxu1 %vm2675_vm7, %v9555_v59 }
 0x41c   : > { %6388 = vmatmul.mubr.msk.bf16.gmra.mxu1 %vm2675_vm7, %v4292_v26 }
 0x41d   : > { %6391 = vmatprep.mubr.msk.bf16.mxu1 %vm2675_vm7, %v4294_v56 }
 0x424   : > { %6392 = vmatmul.mubr.msk.bf16.gmra.mxu1 %vm2675_vm7, %v4296_v61 }
 0x425   : > { %6395 = vmatprep.mubr.msk.bf16.mxu1 %vm2675_vm7, %v4298_v5 }
 0x42c   : > { %6396 = vmatmul.mubr.msk.bf16.gmra.mxu1 %vm2675_vm7, %v4300_v41 }
 0x42d   : > { %6399 = vmatprep.mubr.msk.bf16.mxu1 %vm2675_vm7, %v4302_v24 }
 0x434   : > { %6400 = vmatmul.mubr.msk.bf16.gmra.mxu1 %vm2675_vm7, %v4304_v6 }
 0x435   : > { %6403 = vmatprep.mubr.msk.bf16.mxu1 %vm2675_vm7, %v4306_v30 }
 0x43c   : > { %6404 = vmatmul.mubr.msk.bf16.gmra.mxu1 %vm2675_vm7, %v4308_v17 }
 0x43d   : > { %6407 = vmatprep.mubr.msk.bf16.mxu1 %vm2675_vm7, %v4345_v47 }
 0x444   : > { %6408 = vmatmul.mubr.msk.bf16.gmra.mxu1 %vm2675_vm7, %v10473_v13 }
 0x486   : > { %v6337_v20 = vpop.f32.mrf.mxu0 }
 0x487   : > { %v6293_v50 = vpop.f32.mrf.mxu1 }
 0x488   : > { %v4658_v59 = vpop.f32.mrf.mxu0  ;;  %v4667_v2 = vadd.f32 %v6337_v20, %v6293_v50 }
 0x489   : > { %v4461_v36 = vpop.f32.mrf.mxu1 }
 0x48a   : > { %v6338_v56 = vpop.f32.mrf.mxu0  ;;  %v4659_v60 = vadd.f32 %v4658_v59, %v4461_v36 }
 0x48b   : > { %v6294_v62 = vpop.f32.mrf.mxu1 }
 0x48c   : > { %v4661_v57 = vpop.f32.mrf.mxu0  ;;  %v4670_v34 = vadd.f32 %v6338_v56, %v6294_v62 }
 0x48d   : > { %v4464_v25 = vpop.f32.mrf.mxu1 }
 0x48e   : > { %v4662_v12 = vadd.f32 %v4661_v57, %v4464_v25 }
 0x48f   : > { %v6341_v9 = vpop.f32.mrf.mxu0 }
 0x490   : > { %v6297_v26 = vpop.f32.mrf.mxu1 }
 0x491   : > { %v4674_v51 = vpop.f32.mrf.mxu0  ;;  %v4683_v14 = vadd.f32 %v6341_v9, %v6297_v26 }
 0x492   : > { %v9636_v1 = vpop.f32.mrf.mxu1 }
 0x493   : > { %v6342_v52 = vpop.f32.mrf.mxu0 }
 0x494   : > { %v9638_v11 = vpop.f32.mrf.mxu1 }
 0x495   : > { %v4677_v41 = vpop.f32.mrf.mxu0 }
 0x496   : > { %v9640_v37 = vpop.f32.mrf.mxu1 }
 0x49a   : > { %v6345_v31 = vpop.f32.mrf.mxu0 }
 0x49b   : > { %v9642_v63 = vpop.f32.mrf.mxu1 }
 0x49c   : > { %v4690_v44 = vpop.f32.mrf.mxu0 }
 0x49d   : > { %v9644_v61 = vpop.f32.mrf.mxu1 }
 0x49e   : > { %v6346_v30 = vpop.f32.mrf.mxu0 }
 0x49f   : > { %v9646_v5 = vpop.f32.mrf.mxu1 }
 0x4a0   : > { %v9672_v55 = vpop.f32.mrf.mxu0  ;;  %v4702_v56 = vadd.f32 %v6346_v30, %v9646_v5 }
 0x4a1   : > { %v9648_v54 = vpop.f32.mrf.mxu1 }
 0x4a2   : > { %v9676_v48 = vpop.f32.mrf.mxu0 }
 0x4a3   : > { %v9650_v27 = vpop.f32.mrf.mxu1 }
 0x4a4   : > { %v9680_v21 = vpop.f32.mrf.mxu0 }
 0x4a5   : > { %v9652_v29 = vpop.f32.mrf.mxu1 }
 0x4a6   : > { %v9686_v16 = vpop.f32.mrf.mxu0  ;;  %v4707_v30 = vadd.f32 %v9680_v21, %v9652_v29 }
 0x4a7   : > { %v9654_v49 = vpop.f32.mrf.mxu1 }
 0x4a8   : > { %v9692_v32 = vpop.f32.mrf.mxu0 }
 0x4a9   : > { %v9656_v24 = vpop.f32.mrf.mxu1 }
 0x4aa   : > { %v9698_v42 = vpop.f32.mrf.mxu0 }
 0x4ab   : > { %v9658_v7 = vpop.f32.mrf.mxu1 }
 0x4ac   : > { %v9702_v10 = vpop.f32.mrf.mxu0 }
 0x4ad   : > { %v9660_v15 = vpop.f32.mrf.mxu1 }
 0x4ae   : > { %v9705_v0 = vpop.f32.mrf.mxu0 }
 0x4af   : > { %v9662_v23 = vpop.f32.mrf.mxu1 }
 0x4b0   : > { %v9709_v20 = vpop.f32.mrf.mxu0 }
 0x4b1   : > { %v9664_v33 = vpop.f32.mrf.mxu1 }
 0x4b3   : > { %v9666_v6 = vpop.f32.mrf.mxu1 }
 0x4b5   : > { %v9668_v35 = vpop.f32.mrf.mxu1 }
 0x4b7   : > { %v9670_v45 = vpop.f32.mrf.mxu1 }
 0x4b9   : > { %v9674_v17 = vpop.f32.mrf.mxu1 }
 0x4bc   : > { %v9678_v58 = vpop.f32.mrf.mxu1 }
 0x4be   : > { %v9682_v47 = vpop.f32.mrf.mxu1 }
 0x4c0   : > { %v9684_v13 = vpop.f32.mrf.mxu1 }
 0x4c2   : > { %v9688_v3 = vpop.f32.mrf.mxu1 }
 0x4c4   : > { %v9690_v46 = vpop.f32.mrf.mxu1 }
 0x4c6   : > { %v9694_v4 = vpop.f32.mrf.mxu1 }
 0x4c8   : > { %v9696_v43 = vpop.f32.mrf.mxu1 }
 0x4ca   : > { %v9700_v28 = vpop.f32.mrf.mxu1 }
 0x4cc   : > { %v6381_v19 = vpop.f32.mrf.mxu1 }
 0x4cd   : > { %v4997_v18 = vadd.f32 %v6381_v19, %v4667_v2 }
 0x4ce   : > { %v4868_v40 = vpop.f32.mrf.mxu1 }
 0x4cf   : > { %5063 = vrot.lane.b32.xlu1 %v4997_v18, %s7009_s16  ;;  %v4995_v53 = vadd.f32 %v4868_v40, %v4659_v60  ;;  %v4675_v18 = vadd.f32 %v4674_v51, %v9636_v1  ;;  %v4686_v60 = vadd.f32 %v6342_v52, %v9638_v11  ;;  %v4691_v1 = vadd.f32 %v4690_v44, %v9644_v61 }
 0x4d0   : > { %v6382_v22 = vpop.f32.mrf.mxu1  ;;  %v4694_v51 = vadd.f32 %v9672_v55, %v9648_v54  ;;  %v4715_v52 = vadd.f32 %v9676_v48, %v9650_v27 }
 0x4d1   : > { %v4998_v38 = vadd.f32 %v6382_v22, %v4670_v34 }
 0x4d2   : > { %v4871_v39 = vpop.f32.mrf.mxu1 }
 0x4d3   : > { %5059 = vrot.lane.b32.xlu1 %v4995_v53, %s7009_s16  ;;  %5065 = vrot.lane.b32.xlu0 %v4998_v38, %s7009_s16  ;;  %v4996_v19 = vadd.f32 %v4871_v39, %v4662_v12  ;;  %v6357_v53 = vpop.f32.mrf.mxu0  ;;  %v4678_v38 = vadd.f32 %v4677_v41, %v9640_v37  ;;  %v4699_v12 = vadd.f32 %v6345_v31, %v9642_v63 }
 0x4d4   : > { %v6385_v2 = vpop.f32.mrf.mxu1 }
 0x4d5   : > { %v5001_v50 = vadd.f32 %v6385_v2, %v4683_v14  ;;  %v4738_v59 = vpop.f32.mrf.mxu0  ;;  %v4718_v2 = vadd.f32 %v9686_v16, %v9654_v49 }
 0x4d6   : > { %v4884_v36 = vpop.f32.mrf.mxu1 }
 0x4d7   : > { %5061 = vrot.lane.b32.xlu0 %v4996_v19, %s7009_s16  ;;  %5071 = vrot.lane.b32.xlu1 %v5001_v50, %s7009_s16  ;;  %v4999_v34 = vadd.f32 %v4884_v36, %v4675_v18  ;;  %v6358_v63 = vpop.f32.mrf.mxu0  ;;  %v4710_v50 = vadd.f32 %v9692_v32, %v9656_v24  ;;  %v4731_v36 = vadd.f32 %v9698_v42, %v9658_v7 }
 0x4d8   : > { %v6386_v22 = vpop.f32.mrf.mxu1 }
 0x4d9   : > { %v5002_v40 = vadd.f32 %v6386_v22, %v4686_v60  ;;  %v4741_v31 = vpop.f32.mrf.mxu0  ;;  %v4723_v60 = vadd.f32 %v9702_v10, %v9660_v15  ;;  %v4734_v22 = vadd.f32 %v9705_v0, %v9662_v23 }
 0x4da   : > { %v4887_v62 = vpop.f32.mrf.mxu1 }
 0x4db   : > { %5067 = vrot.lane.b32.xlu1 %v4999_v34, %s7009_s16  ;;  %5073 = vrot.lane.b32.xlu0 %v5002_v40, %s7009_s16  ;;  %v5000_v39 = vadd.f32 %v4887_v62, %v4678_v38  ;;  %v6361_v48 = vpop.f32.mrf.mxu0  ;;  %v4726_v40 = vadd.f32 %v9709_v20, %v9664_v33  ;;  %v4747_v62 = vadd.f32 %v6357_v53, %v9666_v6 }
 0x4dc   : > { %v6389_v14 = vpop.f32.mrf.mxu1 }
 0x4dd   : > { %v5005_v25 = vadd.f32 %v6389_v14, %v4699_v12  ;;  %v4754_v21 = vpop.f32.mrf.mxu0  ;;  %v4739_v12 = vadd.f32 %v4738_v59, %v9668_v35  ;;  %v4750_v14 = vadd.f32 %v6358_v63, %v9670_v45 }
 0x4de   : > { %v4900_v26 = vpop.f32.mrf.mxu1 }
 0x4df   : > { %5069 = vrot.lane.b32.xlu0 %v5000_v39, %s7009_s16  ;;  %5079 = vrot.lane.b32.xlu1 %v5005_v25, %s7009_s16  ;;  %v5003_v37 = vadd.f32 %v4900_v26, %v4691_v1  ;;  %v6362_v7 = vpop.f32.mrf.mxu0  ;;  %v4742_v25 = vadd.f32 %v4741_v31, %v9674_v17  ;;  %v4763_v26 = vadd.f32 %v6361_v48, %v9678_v58  ;;  %v10474_v48 = vld [vmem:[#allocation60_spill] sm:$0xff] }
 0x4e0   : > { %v6390_v11 = vpop.f32.mrf.mxu1 }
 0x4e1   : > { %v5006_v57 = vadd.f32 %v6390_v11, %v4702_v56  ;;  %v4757_v23 = vpop.f32.mrf.mxu0  ;;  %v4755_v11 = vadd.f32 %v4754_v21, %v9682_v47 }
 0x4e2   : > { %v4903_v9 = vpop.f32.mrf.mxu1 }
 0x4e3   : > { %5075 = vrot.lane.b32.xlu1 %v5003_v37, %s7009_s16  ;;  %5081 = vrot.lane.b32.xlu0 %v5006_v57, %s7009_s16  ;;  %v5004_v5 = vadd.f32 %v4903_v9, %v4694_v51  ;;  %v6365_v53 = vpop.f32.mrf.mxu0  ;;  %v4766_v37 = vadd.f32 %v6362_v7, %v9684_v13  ;;  %v4758_v51 = vadd.f32 %v4757_v23, %v9688_v3  ;;  %v10479_v7 = vld [vmem:[#allocation66_spill] sm:$0xff] }
 0x4e4   : > { %v6393_v61 = vpop.f32.mrf.mxu1 }
 0x4e5   : > { %v5009_v41 = vadd.f32 %v6393_v61, %v4715_v52  ;;  %v4770_v1 = vpop.f32.mrf.mxu0 }
 0x4e6   : > { %v4916_v44 = vpop.f32.mrf.mxu1  ;;  %v4771_v47 = vadd.f32 %v4770_v1, %v9694_v4 }
 0x4e7   : > { %5077 = vrot.lane.b32.xlu0 %v5004_v5, %s7009_s16  ;;  %5087 = vrot.lane.b32.xlu1 %v5009_v41, %s7009_s16  ;;  %v5007_v27 = vadd.f32 %v4916_v44, %v4707_v30  ;;  %v6366_v63 = vpop.f32.mrf.mxu0  ;;  %v4779_v44 = vadd.f32 %v6365_v53, %v9690_v46  ;;  %v10483_v53 = vld [vmem:[#allocation70_spill] sm:$0xff] }
 0x4e8   : > { %v6394_v54 = vpop.f32.mrf.mxu1 }
 0x4e9   : > { %v5010_v55 = vadd.f32 %v6394_v54, %v4718_v2  ;;  %v4773_v13 = vpop.f32.mrf.mxu0 }
 0x4ea   : > { %v4919_v19 = vpop.f32.mrf.mxu1  ;;  %v4774_v30 = vadd.f32 %v4773_v13, %v9700_v28 }
 0x4eb   : > { %5083 = vrot.lane.b32.xlu1 %v5007_v27, %s7009_s16  ;;  %5089 = vrot.lane.b32.xlu0 %v5010_v55, %s7009_s16  ;;  %v5008_v29 = vadd.f32 %v4919_v19, %v4710_v50  ;;  %v4782_v27 = vadd.f32 %v6366_v63, %v9696_v43  ;;  %v10486_v63 = vld [vmem:[#allocation71_spill] sm:$0xff] }
 0x4ec   : > { %v6397_v16 = vpop.f32.mrf.mxu1 }
 0x4ed   : > { %v5013_v49 = vadd.f32 %v6397_v16, %v4731_v36  ;;  %v10475_v36 = vld [vmem:[#allocation61_spill] sm:$0xff] }
 0x4ee   : > { %v4932_v18 = vpop.f32.mrf.mxu1 }
 0x4ef   : > { %5085 = vrot.lane.b32.xlu0 %v5008_v29, %s7009_s16  ;;  %5095 = vrot.lane.b32.xlu1 %v5013_v49, %s7009_s16  ;;  %v5011_v32 = vadd.f32 %v4932_v18, %v4723_v60  ;;  %v10476_v49 = vld [vmem:[#allocation59_spill] sm:$0xff]  ;;  %v10477_v18 = vld [vmem:[#allocation65_spill] sm:$0xff] }
 0x4f0   : > { %v6398_v42 = vpop.f32.mrf.mxu1 }
 0x4f1   : > { %v5014_v24 = vadd.f32 %v6398_v42, %v4734_v22 }
 0x4f2   : > { %v4935_v34 = vpop.f32.mrf.mxu1 }
 0x4f3   : > { %5091 = vrot.lane.b32.xlu1 %v5011_v32, %s7009_s16  ;;  %5097 = vrot.lane.b32.xlu0 %v5014_v24, %s7009_s16  ;;  %v5012_v0 = vadd.f32 %v4935_v34, %v4726_v40  ;;  %v10478_v32 = vld [vmem:[#allocation62_spill] sm:$0xff] }
 0x4f4   : > { %v6401_v10 = vpop.f32.mrf.mxu1 }
 0x4f5   : > { %v5017_v15 = vadd.f32 %v6401_v10, %v4747_v62  ;;  %v10480_v10 = vld [vmem:[#allocation64_spill] sm:$0xff] }
 0x4f6   : > { %v4948_v38 = vpop.f32.mrf.mxu1 }
 0x4f7   : > { %5093 = vrot.lane.b32.xlu0 %v5012_v0, %s7009_s16  ;;  %5103 = vrot.lane.b32.xlu1 %v5017_v15, %s7009_s16  ;;  %v5015_v20 = vadd.f32 %v4948_v38, %v4739_v12  ;;  %v10481_v15 = vld [vmem:[#allocation69_spill] sm:$0xff] }
 0x4f8   : > { %v6402_v33 = vpop.f32.mrf.mxu1 }
 0x4f9   : > { %v5018_v6 = vadd.f32 %v6402_v33, %v4750_v14 }
 0x4fa   : > { %v4951_v39 = vpop.f32.mrf.mxu1 }
 0x4fb   : > { %5099 = vrot.lane.b32.xlu1 %v5015_v20, %s7009_s16  ;;  %5105 = vrot.lane.b32.xlu0 %v5018_v6, %s7009_s16  ;;  %v5016_v59 = vadd.f32 %v4951_v39, %v4742_v25  ;;  %v10482_v20 = vld [vmem:[#allocation67_spill] sm:$0xff] }
 0x4fc   : > { %v6405_v35 = vpop.f32.mrf.mxu1 }
 0x4fd   : > { %v5021_v45 = vadd.f32 %v6405_v35, %v4763_v26 }
 0x4fe   : > { %v4964_v56 = vpop.f32.mrf.mxu1 }
 0x4ff   : > { %5101 = vrot.lane.b32.xlu0 %v5016_v59, %s7009_s16  ;;  %5111 = vrot.lane.b32.xlu1 %v5021_v45, %s7009_s16  ;;  %v5019_v57 = vadd.f32 %v4964_v56, %v4755_v11  ;;  %v10484_v45 = vld [vmem:[#allocation68_spill] sm:$0xff]  ;;  %v10485_v56 = vld [vmem:[#allocation73_spill] sm:$0xff] }
 0x500   : > { %v6406_v17 = vpop.f32.mrf.mxu1 }
 0x501   : > { %v5022_v58 = vadd.f32 %v6406_v17, %v4766_v37 }
 0x502   : > { %v4967_v9 = vpop.f32.mrf.mxu1 }
 0x503   : > { %5107 = vrot.lane.b32.xlu1 %v5019_v57, %s7009_s16  ;;  %5113 = vrot.lane.b32.xlu0 %v5022_v58, %s7009_s16  ;;  %v5020_v61 = vadd.f32 %v4967_v9, %v4758_v51  ;;  %v10487_v51 = vld [vmem:[#allocation74_spill] sm:$0xff] }
 0x504   : > { %v6409_v52 = vpop.f32.mrf.mxu1 }
 0x505   : > { %v5025_v2 = vadd.f32 %v6409_v52, %v4779_v44  ;;  %v10489_v44 = vld [vmem:[#allocation77_spill] sm:$0xff] }
 0x506   : > { %v4980_v5 = vpop.f32.mrf.mxu1 }
 0x507   : > { %v5023_v41 = vadd.f32 %v4980_v5, %v4771_v47  ;;  %5109 = vrot.lane.b32.xlu0 %v5020_v61, %s7009_s16 }
 0x508   : > { %v6410_v31 = vpop.f32.mrf.mxu1 }
 0x509   : > { %5115 = vrot.lane.b32.xlu1 %v5023_v41, %s7009_s16  ;;  %v5026_v4 = vadd.f32 %v6410_v31, %v4782_v27  ;;  %v10488_v41 = vld [vmem:[#allocation72_spill] sm:$0xff] }
 0x50a   : > { %v4983_v3 = vpop.f32.mrf.mxu1 }
 0x50b   : > { %v5024_v54 = vadd.f32 %v4983_v3, %v4774_v30 }
 0x50d   : > { %5119 = vrot.lane.b32.xlu1 %v5025_v2, %s7009_s16  ;;  %5117 = vrot.lane.b32.xlu0 %v5024_v54, %s7009_s16 }
 0x511   : > { %5121 = vrot.lane.b32.xlu0 %v5026_v4, %s7009_s16  ;;  %v10490_v4 = vld [vmem:[#allocation75_spill] sm:$0xff] }
 0x541   : > { %v5064_v55 = vpop.permute.xlu1 %5063 }
 0x542   : > { %v5157_v19 = vadd.f32 %v5064_v55, %v10474_v48  ;;  %v10491_v48 = vld [vmem:[#allocation78_spill] sm:$0xff] }
 0x544   : > { %6798 = vtanh.f32 %v5157_v19 }
 0x545   : > { %v5060_v46 = vpop.permute.xlu1 %5059  ;;  %v5066_v28 = vpop.permute.xlu0 %5065 }
 0x546   : > { %v5155_v50 = vadd.f32 %v5060_v46, %v8838_v8  ;;  %v5158_v16 = vadd.f32 %v5066_v28, %v10475_v36 }
 0x548   : > { %6800 = vtanh.f32 %v5155_v50 }
 0x549   : > { %6802 = vtanh.f32 %v5158_v16  ;;  %v5062_v43 = vpop.permute.xlu0 %5061  ;;  %v5072_v29 = vpop.permute.xlu1 %5071  ;;  %v10492_v16 = vld [vmem:[#allocation76_spill] sm:$0xff] }
 0x54a   : > { %v5156_v21 = vadd.f32 %v5062_v43, %v10476_v49  ;;  %v5161_v60 = vadd.f32 %v5072_v29, %v10477_v18  ;;  %v10493_v29 = vld [vmem:[#allocation50_spill] sm:$0xff] }
 0x54c   : > { %6804 = vtanh.f32 %v5156_v21 }
 0x54d   : > { %6806 = vtanh.f32 %v5161_v60  ;;  %v5068_v22 = vpop.permute.xlu1 %5067  ;;  %v5074_v42 = vpop.permute.xlu0 %5073 }
 0x54e   : > { %v5159_v24 = vadd.f32 %v5068_v22, %v10478_v32  ;;  %v5162_v34 = vadd.f32 %v5074_v42, %v10479_v7  ;;  %v10494_v42 = vld [vmem:[#allocation79_spill] sm:$0xff] }
 0x550   : > { %6808 = vtanh.f32 %v5159_v24  ;;  %v10495_v24 = vld [vmem:[#allocation51_spill] sm:$0xff] }
 0x551   : > { %v6799_v8 = vpop.eup %6798  ;;  %6810 = vtanh.f32 %v5162_v34  ;;  %v5070_v40 = vpop.permute.xlu0 %5069 }
 0x552   : > { %v5080_v62 = vpop.permute.xlu1 %5079  ;;  %v5160_v0 = vadd.f32 %v5070_v40, %v10480_v10  ;;  %5319 = vrot.lane.b32.xlu1 %v6799_v8, %s7009_s16  ;;  %v10496_v10 = vld [vmem:[#allocation80_spill] sm:$0xff] }
 0x553   : > { %v5165_v23 = vadd.f32 %v5080_v62, %v10481_v15  ;;  %v10497_v15 = vld [vmem:[#allocation29_spill] sm:$0xff] }
 0x554   : > { %6812 = vtanh.f32 %v5160_v0 }
 0x555   : > { %v6801_v38 = vpop.eup %6800  ;;  %6814 = vtanh.f32 %v5165_v23  ;;  %v5082_v14 = vpop.permute.xlu0 %5081 }
 0x556   : > { %v5076_v12 = vpop.permute.xlu1 %5075  ;;  %v6803_v33 = vpop.eup %6802  ;;  %v5166_v39 = vadd.f32 %v5082_v14, %v10483_v53  ;;  %5315 = vrot.lane.b32.xlu1 %v6801_v38, %s7009_s16  ;;  %v10499_v53 = vld [vmem:[#allocation53_spill] sm:$0xff] }
 0x557   : > { %v5163_v6 = vadd.f32 %v5076_v12, %v10482_v20  ;;  %5321 = vrot.lane.b32.xlu0 %v6803_v33, %s7009_s16  ;;  %v10498_v20 = vld [vmem:[#allocation52_spill] sm:$0xff] }
 0x559   : > { %6816 = vtanh.f32 %v5163_v6  ;;  %v6805_v25 = vpop.eup %6804  ;;  %v5078_v26 = vpop.permute.xlu0 %5077 }
 0x55a   : > { %6818 = vtanh.f32 %v5166_v39  ;;  %v5088_v35 = vpop.permute.xlu1 %5087  ;;  %v6807_v59 = vpop.eup %6806  ;;  %v5164_v1 = vadd.f32 %v5078_v26, %v10484_v45 }
 0x55b   : > { %v5169_v11 = vadd.f32 %v5088_v35, %v10485_v56  ;;  %5327 = vrot.lane.b32.xlu1 %v6807_v59, %s7009_s16  ;;  %5317 = vrot.lane.b32.xlu0 %v6805_v25, %s7009_s16  ;;  %v10500_v59 = vld [vmem:[#allocation81_spill] sm:$0xff]  ;;  %v10501_v56 = vld [vmem:[#allocation30_spill] sm:$0xff] }
 0x55c   : > { %6820 = vtanh.f32 %v5164_v1 }
 0x55d   : > { %v6809_v37 = vpop.eup %6808  ;;  %6822 = vtanh.f32 %v5169_v11  ;;  %v5090_v57 = vpop.permute.xlu0 %5089 }
 0x55e   : > { %v5084_v17 = vpop.permute.xlu1 %5083  ;;  %v6811_v58 = vpop.eup %6810  ;;  %v5170_v52 = vadd.f32 %v5090_v57, %v10487_v51  ;;  %v10503_v51 = vld [vmem:[#allocation54_spill] sm:$0xff] }
 0x55f   : > { %v5167_v9 = vadd.f32 %v5084_v17, %v10486_v63  ;;  %5323 = vrot.lane.b32.xlu1 %v6809_v37, %s7009_s16  ;;  %5329 = vrot.lane.b32.xlu0 %v6811_v58, %s7009_s16  ;;  %v10502_v63 = vld [vmem:[#allocation31_spill] sm:$0xff] }
 0x561   : > { %6824 = vtanh.f32 %v5167_v9  ;;  %v6813_v47 = vpop.eup %6812  ;;  %v5086_v61 = vpop.permute.xlu0 %5085 }
 0x562   : > { %6826 = vtanh.f32 %v5170_v52  ;;  %v5096_v13 = vpop.permute.xlu1 %5095  ;;  %v6815_v5 = vpop.eup %6814  ;;  %v5168_v31 = vadd.f32 %v5086_v61, %v10488_v41 }
 0x563   : > { %v5173_v30 = vadd.f32 %v5096_v13, %v10489_v44  ;;  %5335 = vrot.lane.b32.xlu1 %v6815_v5, %s7009_s16  ;;  %5325 = vrot.lane.b32.xlu0 %v6813_v47, %s7009_s16  ;;  %v10504_v5 = vld [vmem:[#allocation32_spill] sm:$0xff] }
 0x564   : > { %6828 = vtanh.f32 %v5168_v31 }
 0x565   : > { %6830 = vtanh.f32 %v5173_v30  ;;  %v5098_v54 = vpop.permute.xlu0 %5097 }
 0x566   : > { %v6817_v3 = vpop.eup %6816  ;;  %v5092_v2 = vpop.permute.xlu1 %5091  ;;  %v5174_v19 = vadd.f32 %v5098_v54, %v10491_v48 }
 0x567   : > { %v6819_v27 = vpop.eup %6818  ;;  %v5171_v55 = vadd.f32 %v5092_v2, %v10490_v4  ;;  %5331 = vrot.lane.b32.xlu1 %v6817_v3, %s7009_s16  ;;  %v10505_v4 = vld [vmem:[#allocation55_spill] sm:$0xff] }
 0x568   : > { %5337 = vrot.lane.b32.xlu0 %v6819_v27, %s7009_s16 }
 0x569   : > { %6832 = vtanh.f32 %v5171_v55  ;;  %v6821_v46 = vpop.eup %6820  ;;  %v5094_v28 = vpop.permute.xlu0 %5093  ;;  %v5221_v55 = vsub.f32 1.0, %v10505_v4 }
 0x56a   : > { %6834 = vtanh.f32 %v5174_v19  ;;  %v5104_v50 = vpop.permute.xlu1 %5103  ;;  %v6823_v36 = vpop.eup %6822  ;;  %v5172_v43 = vadd.f32 %v5094_v28, %v10492_v16  ;;  %v10506_v19 = vld [vmem:[#allocation14_spill] sm:$0xff] }
 0x56b   : > { %v5177_v49 = vadd.f32 %v5104_v50, %v10493_v29  ;;  %5343 = vrot.lane.b32.xlu1 %v6823_v36, %s7009_s16  ;;  %v10508_v36 = vld [vmem:[#allocation33_spill] sm:$0xff] }
 0x56c   : > { %5333 = vrot.lane.b32.xlu0 %v6821_v46, %s7009_s16  ;;  %6836 = vtanh.f32 %v5172_v43  ;;  %v10507_v46 = vunpack.c.l.bf16 %v10506_v19  ;;  %v5219_v16 = vsub.f32 1.0, %v10508_v36  ;;  %v10509_v43 = vld [vmem:[#allocation34_spill] sm:$0xff] }
 0x56d   : > { %6838 = vtanh.f32 %v5177_v49  ;;  %v5106_v60 = vpop.permute.xlu0 %5105  ;;  %v5222_v29 = vsub.f32 1.0, %v10509_v43 }
 0x56e   : > { %v6825_v21 = vpop.eup %6824  ;;  %v5100_v18 = vpop.permute.xlu1 %5099  ;;  %v5178_v7 = vadd.f32 %v5106_v60, %v10495_v24  ;;  %v5253_v28 = vmul.f32 %v5221_v55, %v10507_v46  ;;  %v10512_v24 = vld [vmem:[#allocation36_spill] sm:$0xff] }
 0x56f   : > { %v6827_v22 = vpop.eup %6826  ;;  %v5175_v32 = vadd.f32 %v5100_v18, %v10494_v42  ;;  %5339 = vrot.lane.b32.xlu1 %v6825_v21, %s7009_s16  ;;  %v10510_v18 = vld [vmem:[#allocation13_spill] sm:$0xff] }
 0x570   : > { %5345 = vrot.lane.b32.xlu0 %v6827_v22, %s7009_s16  ;;  %v10511_v60 = vunpack.c.l.bf16 %v10510_v18 }
 0x571   : > { %6840 = vtanh.f32 %v5175_v32  ;;  %v6829_v34 = vpop.eup %6828  ;;  %v5102_v8 = vpop.permute.xlu0 %5101 }
 0x572   : > { %6842 = vtanh.f32 %v5178_v7  ;;  %v5112_v40 = vpop.permute.xlu1 %5111  ;;  %v6831_v62 = vpop.eup %6830  ;;  %v5176_v0 = vadd.f32 %v5102_v8, %v10496_v10  ;;  %v5251_v22 = vmul.f32 %v5219_v16, %v10511_v60  ;;  %v5225_v7 = vsub.f32 1.0, %v10512_v24  ;;  %v10530_v16 = vld [vmem:[#allocation18_spill] sm:$0xff] }
 0x573   : > { %v5181_v23 = vadd.f32 %v5112_v40, %v10497_v15  ;;  %5351 = vrot.lane.b32.xlu1 %v6831_v62, %s7009_s16  ;;  %v10514_v62 = vld [vmem:[#allocation35_spill] sm:$0xff] }
 0x574   : > { %5341 = vrot.lane.b32.xlu0 %v6829_v34, %s7009_s16  ;;  %6844 = vtanh.f32 %v5176_v0  ;;  %v10513_v34 = vunpack.c.h.bf16 %v10506_v19  ;;  %v5220_v10 = vsub.f32 1.0, %v10514_v62 }
 0x575   : > { %6846 = vtanh.f32 %v5181_v23  ;;  %v5114_v14 = vpop.permute.xlu0 %5113  ;;  %v10515_v23 = vld [vmem:[#allocation16_spill] sm:$0xff] }
 0x576   : > { %v6833_v38 = vpop.eup %6832  ;;  %v5108_v12 = vpop.permute.xlu1 %5107  ;;  %v5182_v39 = vadd.f32 %v5114_v14, %v10499_v53  ;;  %v5254_v8 = vmul.f32 %v5222_v29, %v10513_v34 }
 0x577   : > { %v6835_v33 = vpop.eup %6834  ;;  %v5179_v6 = vadd.f32 %v5108_v12, %v10498_v20  ;;  %5347 = vrot.lane.b32.xlu1 %v6833_v38, %s7009_s16  ;;  %v10516_v38 = vunpack.c.l.bf16 %v10515_v23  ;;  %v10517_v20 = vld [vmem:[#allocation63_spill] sm:$0xff] }
 0x578   : > { %5353 = vrot.lane.b32.xlu0 %v6835_v33, %s7009_s16 }
 0x579   : > { %6848 = vtanh.f32 %v5179_v6  ;;  %v6837_v25 = vpop.eup %6836  ;;  %v5110_v26 = vpop.permute.xlu0 %5109  ;;  %v5257_v12 = vmul.f32 %v5225_v7, %v10516_v38  ;;  %v5223_v6 = vsub.f32 1.0, %v10517_v20  ;;  %v10534_v7 = vld [vmem:[#allocation40_spill] sm:$0xff] }
 0x57a   : > { %6850 = vtanh.f32 %v5182_v39  ;;  %v6839_v35 = vpop.eup %6838  ;;  %v5180_v45 = vadd.f32 %v5110_v26, %v10500_v59  ;;  %v10518_v39 = vunpack.c.h.bf16 %v10510_v18  ;;  %v5228_v34 = vsub.f32 1.0, %v10534_v7 }
 0x57b   : > { %5359 = vrot.lane.b32.xlu1 %v6839_v35, %s7009_s16  ;;  %v5116_v1 = vpop.permute.xlu1 %5115  ;;  %v10519_v35 = vld [vmem:[#allocation56_spill] sm:$0xff] }
 0x57c   : > { %5349 = vrot.lane.b32.xlu0 %v6837_v25, %s7009_s16  ;;  %6852 = vtanh.f32 %v5180_v45  ;;  %v5183_v11 = vadd.f32 %v5116_v1, %v10501_v56  ;;  %v5252_v25 = vmul.f32 %v5220_v10, %v10518_v39  ;;  %v5226_v59 = vsub.f32 1.0, %v10519_v35  ;;  %v10520_v56 = vld [vmem:[#allocation15_spill] sm:$0xff] }
 0x57d   : > { %v10529_v19 = vunpack.c.h.bf16 %v10520_v56 }
 0x57e   : > { %v6841_v37 = vpop.eup %6840  ;;  %6854 = vtanh.f32 %v5183_v11  ;;  %v10521_v11 = vunpack.c.l.bf16 %v10520_v56 }
 0x57f   : > { %v6843_v17 = vpop.eup %6842  ;;  %5355 = vrot.lane.b32.xlu1 %v6841_v37, %s7009_s16  ;;  %v5120_v57 = vpop.permute.xlu1 %5119 }
 0x580   : > { %5361 = vrot.lane.b32.xlu0 %v6843_v17, %s7009_s16  ;;  %v5118_v58 = vpop.permute.xlu0 %5117  ;;  %v5185_v9 = vadd.f32 %v5120_v57, %v10502_v63  ;;  %v5255_v37 = vmul.f32 %v5223_v6, %v10521_v11  ;;  %v10539_v6 = vunpack.c.h.bf16 %v10530_v16  ;;  %v10542_v11 = vld [vmem:[#allocation44_spill] sm:$0xff] }
 0x581   : > { %v5184_v52 = vadd.f32 %v5118_v58, %v10503_v51  ;;  %v6845_v47 = vpop.eup %6844  ;;  %v10522_v58 = vld [vmem:[#allocation57_spill] sm:$0xff]  ;;  %v10523_v51 = vunpack.c.h.bf16 %v10515_v23  ;;  %v10536_v23 = vld [vmem:[#allocation42_spill] sm:$0xff] }
 0x582   : > { %v6847_v61 = vpop.eup %6846  ;;  %6856 = vtanh.f32 %v5185_v9  ;;  %v5229_v63 = vsub.f32 1.0, %v10522_v58  ;;  %v5234_v38 = vsub.f32 1.0, %v10536_v23 }
 0x583   : > { %6858 = vtanh.f32 %v5184_v52  ;;  %5367 = vrot.lane.b32.xlu1 %v6847_v61, %s7009_s16  ;;  %v5258_v52 = vmul.f32 %v5226_v59, %v10523_v51  ;;  %v10524_v61 = vld [vmem:[#allocation37_spill] sm:$0xff] }
 0x584   : > { %5357 = vrot.lane.b32.xlu0 %v6845_v47, %s7009_s16  ;;  %v5122_v13 = vpop.permute.xlu0 %5121 }
 0x585   : > { %v5186_v41 = vadd.f32 %v5122_v13, %v10504_v5  ;;  %v5224_v13 = vsub.f32 1.0, %v10524_v61 }
 0x586   : > { %v6849_v31 = vpop.eup %6848 }
 0x587   : > { %v6851_v44 = vpop.eup %6850  ;;  %6860 = vtanh.f32 %v5186_v41  ;;  %5363 = vrot.lane.b32.xlu1 %v6849_v31, %s7009_s16  ;;  %v5256_v46 = vmul.f32 %v5224_v13, %v10529_v19 }
 0x588   : > { %5369 = vrot.lane.b32.xlu0 %v6851_v44, %s7009_s16 }
 0x589   : > { %v6853_v30 = vpop.eup %6852 }
 0x58b   : > { %v6855_v3 = vpop.eup %6854 }
 0x58c   : > { %5365 = vrot.lane.b32.xlu0 %v6853_v30, %s7009_s16  ;;  %5371 = vrot.lane.b32.xlu1 %v6855_v3, %s7009_s16  ;;  %v10525_v30 = vld [vmem:[#allocation38_spill] sm:$0xff] }
 0x58d   : > { %v5227_v3 = vsub.f32 1.0, %v10525_v30 }
 0x58f   : > { %v6857_v2 = vpop.eup %6856 }
 0x590   : > { %v6859_v54 = vpop.eup %6858  ;;  %5375 = vrot.lane.b32.xlu1 %v6857_v2, %s7009_s16  ;;  %v10526_v2 = vld [vmem:[#allocation39_spill] sm:$0xff] }
 0x591   : > { %5373 = vrot.lane.b32.xlu0 %v6859_v54, %s7009_s16  ;;  %v5230_v54 = vsub.f32 1.0, %v10526_v2 }
 0x594   : > { %v6861_v27 = vpop.eup %6860 }
 0x595   : > { %5377 = vrot.lane.b32.xlu0 %v6861_v27, %s7009_s16  ;;  %v10527_v27 = vld [vmem:[#allocation17_spill] sm:$0xff]  ;;  %s6014_s16 = sshll.u32 %s7071_s25, 12  ;;  %s5508_s25 = scalar_lea.sflag [#allocation4], %s7206_s20 }
 0x596   : > { %s10038_s17 = scalar_lea.hbm %s10091_s6, %s6014_s16 }
 0x5c4   : > { %v5320_v48 = vpop.permute.xlu1 %5319 }
 0x5c5   : > { %v5413_v50 = vmul.f32 %v10505_v4, %v5320_v48  ;;  %v10528_v4 = vunpack.c.l.bf16 %v10527_v27 }
 0x5c7   : > { %v5445_v49 = vadd.f32 %v5413_v50, %v5253_v28  ;;  %v5261_v55 = vmul.f32 %v5229_v63, %v10528_v4  ;;  %v10549_v4 = vld [vmem:[#allocation46_spill] sm:$0xff] }
 0x5c8   : > { %v5316_v21 = vpop.permute.xlu1 %5315 }
 0x5c9   : > { %5477 = vst.msk [vmem:[%s9847_s15 + $0x10] sm:$0xff] %vm2524_vm6, %v5445_v49  ;;  %v5411_v42 = vmul.f32 %v10508_v36, %v5316_v21  ;;  %v5322_v32 = vpop.permute.xlu0 %5321  ;;  %v10532_v21 = vunpack.c.h.bf16 %v10527_v27 }
 0x5ca   : > { %v5414_v40 = vmul.f32 %v10509_v43, %v5322_v32  ;;  %v10531_v43 = vunpack.c.l.bf16 %v10530_v16  ;;  %v10533_v32 = vld [vmem:[#allocation58_spill] sm:$0xff] }
 0x5cb   : > { %v5443_v0 = vadd.f32 %v5411_v42, %v5251_v22  ;;  %v5262_v18 = vmul.f32 %v5230_v54, %v10532_v21 }
 0x5cc   : > { %v5446_v15 = vadd.f32 %v5414_v40, %v5254_v8  ;;  %v5259_v29 = vmul.f32 %v5227_v3, %v10531_v43  ;;  %v10552_v43 = vld [vmem:[#allocation48_spill] sm:$0xff] }
 0x5cd   : > { %5475 = vst.msk [vmem:[%s9847_s15] sm:$0xff] %vm2524_vm6, %v5443_v0  ;;  %v5328_v14 = vpop.permute.xlu1 %5327  ;;  %v5318_v33 = vpop.permute.xlu0 %5317  ;;  %v10535_v0 = vld [vmem:[#allocation41_spill] sm:$0xff] }
 0x5ce   : > { %5478 = vst.msk [vmem:[%s9847_s15 + $0x18] sm:$0xff] %vm2524_vm6, %v5446_v15  ;;  %v5417_v53 = vmul.f32 %v10512_v24, %v5328_v14  ;;  %v5412_v26 = vmul.f32 %v10514_v62, %v5318_v33  ;;  %v5233_v24 = vsub.f32 1.0, %v10533_v32  ;;  %v5231_v15 = vsub.f32 1.0, %v10535_v0 }
 0x5d0   : > { %v5449_v45 = vadd.f32 %v5417_v53, %v5257_v12  ;;  %v5444_v1 = vadd.f32 %v5412_v26, %v5252_v25  ;;  %v10537_v12 = vld [vmem:[#allocation19_spill] sm:$0xff]  ;;  %v5260_v53 = vmul.f32 %v5228_v34, %v10539_v6 }
 0x5d1   : > { %v5324_v17 = vpop.permute.xlu1 %5323  ;;  %v5330_v57 = vpop.permute.xlu0 %5329  ;;  %v10538_v14 = vunpack.c.l.bf16 %v10537_v12 }
 0x5d2   : > { %5481 = vst.msk [vmem:[%s9847_s15 + $0x30] sm:$0xff] %vm2524_vm6, %v5449_v45  ;;  %5476 = vst.msk [vmem:[%s9847_s15 + $0x8] sm:$0xff] %vm2524_vm6, %v5444_v1  ;;  %v5415_v9 = vmul.f32 %v10517_v20, %v5324_v17  ;;  %v5418_v47 = vmul.f32 %v10519_v35, %v5330_v57  ;;  %v10540_v35 = vld [vmem:[#allocation20_spill] sm:$0xff]  ;;  %v10543_v57 = vunpack.c.h.bf16 %v10537_v12 }
 0x5d3   : > { %v5265_v33 = vmul.f32 %v5233_v24, %v10538_v14  ;;  %v10541_v59 = vunpack.c.l.bf16 %v10540_v35  ;;  %v10559_v14 = vld [vmem:[#allocation82_spill] sm:$0xff] }
 0x5d4   : > { %v5447_v5 = vadd.f32 %v5415_v9, %v5255_v37  ;;  %v5450_v41 = vadd.f32 %v5418_v47, %v5258_v52  ;;  %v5237_v37 = vsub.f32 1.0, %v10542_v11  ;;  %v10544_v9 = vld [vmem:[#allocation43_spill] sm:$0xff] }
 0x5d5   : > { %v5336_v31 = vpop.permute.xlu1 %5335  ;;  %v5326_v44 = vpop.permute.xlu0 %5325  ;;  %v5263_v45 = vmul.f32 %v5231_v15, %v10541_v59  ;;  %v5232_v51 = vsub.f32 1.0, %v10544_v9  ;;  %v10562_v59 = vld [vmem:[#allocation83_spill] sm:$0xff] }
 0x5d6   : > { %5479 = vst.msk [vmem:[%s9847_s15 + $0x20] sm:$0xff] %vm2524_vm6, %v5447_v5  ;;  %5482 = vst.msk [vmem:[%s9847_s15 + $0x38] sm:$0xff] %vm2524_vm6, %v5450_v41  ;;  %v5421_v48 = vmul.f32 %v10522_v58, %v5336_v31  ;;  %v5416_v28 = vmul.f32 %v10524_v61, %v5326_v44  ;;  %v5266_v58 = vmul.f32 %v5234_v38, %v10543_v57  ;;  %v10545_v61 = vld [vmem:[#allocation21_spill] sm:$0xff] }
 0x5d7   : > { %v10546_v13 = vunpack.c.l.bf16 %v10545_v61  ;;  %v10547_v44 = vld [vmem:[#allocation45_spill] sm:$0xff]  ;;  %v10553_v21 = vunpack.c.h.bf16 %v10545_v61 }
 0x5d8   : > { %v5453_v50 = vadd.f32 %v5421_v48, %v5261_v55  ;;  %v5448_v36 = vadd.f32 %v5416_v28, %v5256_v46  ;;  %v5238_v55 = vsub.f32 1.0, %v10549_v4  ;;  %v10550_v46 = vld [vmem:[#allocation22_spill] sm:$0xff]  ;;  %v10566_v61 = vld [vmem:[#allocation85_spill] sm:$0xff] }
 0x5d9   : > { %v5332_v49 = vpop.permute.xlu1 %5331  ;;  %v5269_v5 = vmul.f32 %v5237_v37, %v10546_v13  ;;  %v10551_v28 = vunpack.c.l.bf16 %v10550_v46  ;;  %v5243_v13 = vsub.f32 1.0, %v10566_v61 }
 0x5da   : > { %v5338_v60 = vpop.permute.xlu0 %5337  ;;  %5485 = vst.msk [vmem:[%s9847_s15 + $0x50] sm:$0xff] %vm2524_vm6, %v5453_v50  ;;  %5480 = vst.msk [vmem:[%s9847_s15 + $0x28] sm:$0xff] %vm2524_vm6, %v5448_v36  ;;  %v5419_v22 = vmul.f32 %v10525_v30, %v5332_v49  ;;  %v5235_v30 = vsub.f32 1.0, %v10547_v44 }
 0x5db   : > { %v5422_v42 = vmul.f32 %v10526_v2, %v5338_v60  ;;  %v10548_v2 = vunpack.c.h.bf16 %v10540_v35 }
 0x5dc   : > { %v5451_v8 = vadd.f32 %v5419_v22, %v5259_v29  ;;  %v5267_v50 = vmul.f32 %v5235_v30, %v10551_v28  ;;  %v5241_v29 = vsub.f32 1.0, %v10552_v43  ;;  %v10554_v22 = vld [vmem:[#allocation47_spill] sm:$0xff] }
 0x5dd   : > { %v5454_v40 = vadd.f32 %v5422_v42, %v5262_v18  ;;  %v5344_v62 = vpop.permute.xlu1 %5343  ;;  %v5264_v54 = vmul.f32 %v5232_v51, %v10548_v2  ;;  %v5270_v18 = vmul.f32 %v5238_v55, %v10553_v21  ;;  %v5236_v42 = vsub.f32 1.0, %v10554_v22 }
 0x5de   : > { %v5334_v10 = vpop.permute.xlu0 %5333  ;;  %5483 = vst.msk [vmem:[%s9847_s15 + $0x40] sm:$0xff] %vm2524_vm6, %v5451_v8  ;;  %v5425_v20 = vmul.f32 %v10533_v32, %v5344_v62 }
 0x5df   : > { %5486 = vst.msk [vmem:[%s9847_s15 + $0x58] sm:$0xff] %vm2524_vm6, %v5454_v40  ;;  %v5420_v39 = vmul.f32 %v10534_v7, %v5334_v10  ;;  %v10555_v7 = vld [vmem:[#allocation23_spill] sm:$0xff]  ;;  %v10557_v10 = vld [vmem:[#allocation49_spill] sm:$0xff] }
 0x5e0   : > { %v5457_v25 = vadd.f32 %v5425_v20, %v5265_v33  ;;  %v10556_v34 = vunpack.c.l.bf16 %v10555_v7  ;;  %v5242_v33 = vsub.f32 1.0, %v10559_v14 }
 0x5e1   : > { %v5452_v26 = vadd.f32 %v5420_v39, %v5260_v53  ;;  %v5340_v1 = vpop.permute.xlu1 %5339  ;;  %v10560_v53 = vld [vmem:[#allocation24_spill] sm:$0xff] }
 0x5e2   : > { %v5346_v56 = vpop.permute.xlu0 %5345  ;;  %5489 = vst.msk [vmem:[%s9847_s15 + $0x70] sm:$0xff] %vm2524_vm6, %v5457_v25  ;;  %v5423_v17 = vmul.f32 %v10535_v0, %v5340_v1  ;;  %v5273_v8 = vmul.f32 %v5241_v29, %v10556_v34  ;;  %v5239_v0 = vsub.f32 1.0, %v10557_v10  ;;  %v10561_v39 = vunpack.c.l.bf16 %v10560_v53  ;;  %v10576_v34 = vld [vmem:[#allocation28_spill] sm:$0xff] }
 0x5e3   : > { %5484 = vst.msk [vmem:[%s9847_s15 + $0x48] sm:$0xff] %vm2524_vm6, %v5452_v26  ;;  %v5426_v63 = vmul.f32 %v10536_v23, %v5346_v56  ;;  %v10558_v23 = vunpack.c.h.bf16 %v10550_v46  ;;  %v10563_v56 = vunpack.c.h.bf16 %v10555_v7  ;;  %v10565_v51 = vunpack.c.h.bf16 %v10560_v53 }
 0x5e4   : > { %v5455_v52 = vadd.f32 %v5423_v17, %v5263_v45  ;;  %v5271_v25 = vmul.f32 %v5239_v0, %v10561_v39  ;;  %v5240_v45 = vsub.f32 1.0, %v10562_v59  ;;  %v10564_v17 = vld [vmem:[#allocation84_spill] sm:$0xff] }
 0x5e5   : > { %v5458_v47 = vadd.f32 %v5426_v63, %v5266_v58  ;;  %v5352_v41 = vpop.permute.xlu1 %5351  ;;  %v5268_v38 = vmul.f32 %v5236_v42, %v10558_v23  ;;  %v5245_v57 = vsub.f32 1.0, %v10564_v17  ;;  %v10579_v23 = vld [vmem:[#allocation91_spill] sm:$0xff] }
 0x5e6   : > { %v5342_v31 = vpop.permute.xlu0 %5341  ;;  %5487 = vst.msk [vmem:[%s9847_s15 + $0x60] sm:$0xff] %vm2524_vm6, %v5455_v52  ;;  %v5429_v3 = vmul.f32 %v10542_v11, %v5352_v41  ;;  %v5274_v11 = vmul.f32 %v5242_v33, %v10563_v56  ;;  %v5272_v52 = vmul.f32 %v5240_v45, %v10565_v51  ;;  %v10580_v33 = vld [vmem:[#allocation27_spill] sm:$0xff] }
 0x5e7   : > { %5490 = vst.msk [vmem:[%s9847_s15 + $0x78] sm:$0xff] %vm2524_vm6, %v5458_v47  ;;  %v5424_v27 = vmul.f32 %v10544_v9, %v5342_v31 }
 0x5e8   : > { %v5461_v48 = vadd.f32 %v5429_v3, %v5269_v5  ;;  %v10567_v5 = vld [vmem:[#allocation25_spill] sm:$0xff]  ;;  %v10569_v3 = vld [vmem:[#allocation86_spill] sm:$0xff] }
 0x5e9   : > { %v5456_v19 = vadd.f32 %v5424_v27, %v5264_v54  ;;  %v5348_v36 = vpop.permute.xlu1 %5347  ;;  %v10568_v41 = vunpack.c.l.bf16 %v10567_v5  ;;  %v5246_v2 = vsub.f32 1.0, %v10569_v3 }
 0x5ea   : > { %v5354_v16 = vpop.permute.xlu0 %5353  ;;  %5493 = vst.msk [vmem:[%s9847_s15 + $0x90] sm:$0xff] %vm2524_vm6, %v5461_v48  ;;  %v5427_v49 = vmul.f32 %v10547_v44, %v5348_v36 }
 0x5eb   : > { %5488 = vst.msk [vmem:[%s9847_s15 + $0x68] sm:$0xff] %vm2524_vm6, %v5456_v19  ;;  %v5430_v60 = vmul.f32 %v10549_v4, %v5354_v16  ;;  %v5277_v31 = vmul.f32 %v5245_v57, %v10568_v41  ;;  %v10570_v4 = vld [vmem:[#allocation26_spill] sm:$0xff] }
 0x5ec   : > { %v5459_v32 = vadd.f32 %v5427_v49, %v5267_v50  ;;  %v10571_v55 = vunpack.c.l.bf16 %v10570_v4  ;;  %v10572_v50 = vunpack.c.h.bf16 %v10567_v5  ;;  %v10574_v49 = vld [vmem:[#allocation89_spill] sm:$0xff]  ;;  %v10575_v42 = vunpack.c.h.bf16 %v10570_v4 }
 0x5ed   : > { %v5462_v24 = vadd.f32 %v5430_v60, %v5270_v18  ;;  %v5360_v40 = vpop.permute.xlu1 %5359  ;;  %v5247_v21 = vsub.f32 1.0, %v10574_v49 }
 0x5ee   : > { %v5350_v62 = vpop.permute.xlu0 %5349  ;;  %5491 = vst.msk [vmem:[%s9847_s15 + $0x80] sm:$0xff] %vm2524_vm6, %v5459_v32  ;;  %v5433_v15 = vmul.f32 %v10552_v43, %v5360_v40  ;;  %v5275_v48 = vmul.f32 %v5243_v13, %v10571_v55  ;;  %v5278_v36 = vmul.f32 %v5246_v2, %v10572_v50  ;;  %v10573_v43 = vld [vmem:[#allocation87_spill] sm:$0xff] }
 0x5ef   : > { %5494 = vst.msk [vmem:[%s9847_s15 + $0x98] sm:$0xff] %vm2524_vm6, %v5462_v24  ;;  %v5428_v12 = vmul.f32 %v10554_v22, %v5350_v62  ;;  %v5244_v29 = vsub.f32 1.0, %v10573_v43 }
 0x5f0   : > { %v5465_v20 = vadd.f32 %v5433_v15, %v5273_v8  ;;  %v10577_v8 = vunpack.c.l.bf16 %v10576_v34 }
 0x5f1   : > { %v5460_v6 = vadd.f32 %v5428_v12, %v5268_v38  ;;  %v5356_v26 = vpop.permute.xlu1 %5355  ;;  %v5276_v32 = vmul.f32 %v5244_v29, %v10575_v42  ;;  %v5248_v38 = vsub.f32 1.0, %v10579_v23 }
 0x5f2   : > { %v5362_v35 = vpop.permute.xlu0 %5361  ;;  %5497 = vst.msk [vmem:[%s9847_s15 + $0xb0] sm:$0xff] %vm2524_vm6, %v5465_v20  ;;  %v5431_v1 = vmul.f32 %v10557_v10, %v5356_v26  ;;  %v5279_v40 = vmul.f32 %v5247_v21, %v10577_v8  ;;  %v10578_v10 = vld [vmem:[#allocation88_spill] sm:$0xff]  ;;  %v10581_v20 = vunpack.c.l.bf16 %v10580_v33 }
 0x5f3   : > { %5492 = vst.msk [vmem:[%s9847_s15 + $0x88] sm:$0xff] %vm2524_vm6, %v5460_v6  ;;  %v5434_v37 = vmul.f32 %v10559_v14, %v5362_v35  ;;  %v5249_v0 = vsub.f32 1.0, %v10578_v10 }
 0x5f4   : > { %v5463_v58 = vadd.f32 %v5431_v1, %v5271_v25  ;;  %v10582_v25 = vunpack.c.h.bf16 %v10576_v34 }
 0x5f5   : > { %v5466_v63 = vadd.f32 %v5434_v37, %v5274_v11  ;;  %v5368_v9 = vpop.permute.xlu1 %5367  ;;  %v5281_v6 = vmul.f32 %v5249_v0, %v10581_v20  ;;  %v10584_v37 = vunpack.c.h.bf16 %v10580_v33 }
 0x5f6   : > { %v5358_v47 = vpop.permute.xlu0 %5357  ;;  %5495 = vst.msk [vmem:[%s9847_s15 + $0xa0] sm:$0xff] %vm2524_vm6, %v5463_v58  ;;  %v5437_v44 = vmul.f32 %v10564_v17, %v5368_v9  ;;  %v5280_v26 = vmul.f32 %v5248_v38, %v10582_v25 }
 0x5f7   : > { %5498 = vst.msk [vmem:[%s9847_s15 + $0xb8] sm:$0xff] %vm2524_vm6, %v5466_v63  ;;  %v5432_v30 = vmul.f32 %v10562_v59, %v5358_v47  ;;  %v10583_v59 = vld [vmem:[#allocation90_spill] sm:$0xff] }
 0x5f8   : > { %v5469_v54 = vadd.f32 %v5437_v44, %v5277_v31  ;;  %v5250_v45 = vsub.f32 1.0, %v10583_v59 }
 0x5f9   : > { %v5464_v27 = vadd.f32 %v5432_v30, %v5272_v52  ;;  %v5364_v19 = vpop.permute.xlu1 %5363 }
 0x5fa   : > { %v5370_v46 = vpop.permute.xlu0 %5369  ;;  %5501 = vst.msk [vmem:[%s9847_s15 + $0xd0] sm:$0xff] %vm2524_vm6, %v5469_v54  ;;  %v5435_v28 = vmul.f32 %v10566_v61, %v5364_v19  ;;  %v5282_v17 = vmul.f32 %v5250_v45, %v10584_v37 }
 0x5fb   : > { %5496 = vst.msk [vmem:[%s9847_s15 + $0xa8] sm:$0xff] %vm2524_vm6, %v5464_v27  ;;  %v5438_v16 = vmul.f32 %v10569_v3, %v5370_v46 }
 0x5fc   : > { %v5467_v18 = vadd.f32 %v5435_v28, %v5275_v48 }
 0x5fd   : > { %v5470_v60 = vadd.f32 %v5438_v16, %v5278_v36 }
 0x5fe   : > { %v5366_v22 = vpop.permute.xlu0 %5365  ;;  %5499 = vst.msk [vmem:[%s9847_s15 + $0xc0] sm:$0xff] %vm2524_vm6, %v5467_v18  ;;  %v5372_v7 = vpop.permute.xlu1 %5371 }
 0x5ff   : > { %5502 = vst.msk [vmem:[%s9847_s15 + $0xd8] sm:$0xff] %vm2524_vm6, %v5470_v60  ;;  %v5436_v24 = vmul.f32 %v10573_v43, %v5366_v22  ;;  %v5439_v62 = vmul.f32 %v10574_v49, %v5372_v7 }
 0x601   : > { %v5468_v15 = vadd.f32 %v5436_v24, %v5276_v32  ;;  %v5471_v12 = vadd.f32 %v5439_v62, %v5279_v40 }
 0x602   : > { %v5376_v14 = vpop.permute.xlu1 %5375 }
 0x603   : > { %5500 = vst.msk [vmem:[%s9847_s15 + $0xc8] sm:$0xff] %vm2524_vm6, %v5468_v15  ;;  %5503 = vst.msk [vmem:[%s9847_s15 + $0xe0] sm:$0xff] %vm2524_vm6, %v5471_v12  ;;  %v5441_v53 = vmul.f32 %v10578_v10, %v5376_v14  ;;  %v5374_v39 = vpop.permute.xlu0 %5373 }
 0x604   : > { %v5440_v35 = vmul.f32 %v10579_v23, %v5374_v39 }
 0x605   : > { %v5473_v1 = vadd.f32 %v5441_v53, %v5281_v6 }
 0x606   : > { %v5472_v56 = vadd.f32 %v5440_v35, %v5280_v26 }
 0x607   : > { %5505 = vst.msk [vmem:[%s9847_s15 + $0xf0] sm:$0xff] %vm2524_vm6, %v5473_v1  ;;  %v5378_v11 = vpop.permute.xlu0 %5377 }
 0x608   : > { %5504 = vst.msk [vmem:[%s9847_s15 + $0xe8] sm:$0xff] %vm2524_vm6, %v5472_v56  ;;  %v5442_v57 = vmul.f32 %v10583_v59, %v5378_v11 }
 0x60a   : > { %v5474_v58 = vadd.f32 %v5442_v57, %v5282_v17 }
 0x60c   : > { %5506 = vst.msk [vmem:[%s9847_s15 + $0xf8] sm:$0xff] %vm2524_vm6, %v5474_v58 }
 0x60d   : > { %6947 = shalt.err (!%p6944_p4)
}
 0x60e   : > { %s6948_s28 = scalar_lea.hbm %s10038_s17, 4096  ;;  %s6952_s12 = scalar_lea.hbm %s10091_s6, 8192 }
 0x60f   : > { %p6949_p9 = scmp.ne.s32.totalorder %s10038_s17, %s6948_s28  ;;  %p6953_p5 = scmp.lt.s32.totalorder %s10038_s17, %s10091_s6 }
 0x610   : > { %p6954_p8 = scmp.lt.s32.totalorder %s6952_s12, %s6948_s28 }
 0x611   : > { %p6950_p11 = pnand %p6949_p9, %p10585_p1 }
 0x612   : > { %p6955_p6 = por %p6954_p8, %p6953_p5 }
 0x613   : > { %p6951_p3 = pneg %p6950_p11 }
 0x615   : > { %p6956_p13 = pnand %p6955_p6, %p6951_p3 }
 0x617   : > { %6959 = shalt.err (!%p6956_p13)
}
 0x618   : > { %s7013_s16 = smov 128   ;;  %s7014_s8 = smov 8  }
 0x619   : > { %6415 = dma.vmem_to_hbm [thread:$0]  (%p10585_p1), %s10040_s0, 4096, %s10038_s17, %s5508_s25, %s7013_s16, %s7013_s16, %s7014_s8  }
 0x61a PF: > { %s5536_s13 = sand.u32 1, %s6990_s21   ;;  %p10586_p12 = scmp.ne.s32.totalorder %s10278_s10, 0 }
 0x61b   : > { %p10587_p7 = scmp.ge.s32.totalorder %s7002_s24, 2  ;;  %s5537_s7 = scalar_lea.sflag [#allocation4], %s5536_s13 }
 0x61d   : > { %p6425_p10 = pnand %p10587_p7, %p10586_p12 }
 0x61f   : > { %p6426_p0 = pneg %p6425_p10 }
 0x621   : > { %6985 = dma.done.wait (%p6426_p0), %s5537_s7, 4096  }
 0x622   : > { %6987 = vsyncadd (%p6426_p0), %s5537_s7, 4294963200  ;;  %p22_p2 = scmp.ge.s32.totalorder %s7075_s27, 4   ;;  %s10588_s21 = smov %s6994_s22 }
 0x623   : > { %s10589_s22 = smov %s6998_s23  ;;  %s10590_s23 = smov %s7087_s30 }
 0x624   : > { %s10591_s24 = smov %s7075_s27  ;;  %24 = sbr.rel (!%p22_p2) target bundleno = 9 (0x9), region = 108 }
 0x629   :  { %5542 = vsyncpa [#allocation3], 1 }
 0x62a   :  { %5544 = vsyncpa [#allocation3 + $0x1], 1 }
 0x62b   :  { %5545 = vsyncpa [#allocation6], 1 }
 0x62c   :  { %5547 = vsyncpa [#allocation6 + $0x1], 1 }
 0x62d   :  { %5548 = vsyncpa [#allocation4], 1 }
 0x62e   :  { %5550 = vsyncpa [#allocation4 + $0x1], 1 }

</bundles_post_ra>
